<compile_context>
chip_gen: v7x
topology: tpu7x:2x2x1
jax: 0.10.0
libtpu: 0.0.40
codegen_flags: <defaults>
</compile_context>

<pallas_src>
import functools
import math

import jax
import jax.numpy as jnp
import numpy as np
from jax import lax
from jax.experimental import pallas as pl
from jax.experimental.pallas import tpu as pltpu


# ----------------------------------------------------------------------------
# In-kernel helpers
# ----------------------------------------------------------------------------
_ERF_P = 0.3275911
_ERF_A1 = 0.254829592
_ERF_A2 = -0.284496736
_ERF_A3 = 1.421413741
_ERF_A4 = -1.453152027
_ERF_A5 = 1.061405429


def _erf(x):
    # TODO(synk): exact lax.erf lowering inside Mosaic is not guaranteed; use
    # the A&S 7.1.26 polynomial (|abs err| <= 1.5e-7, i.e. exact-GELU at f32
    # precision) built only from exp/abs/where.
    sgn = jnp.where(x >= 0.0, 1.0, -1.0)
    ax = jnp.abs(x)
    t = 1.0 / (1.0 + _ERF_P * ax)
    poly = ((((_ERF_A5 * t + _ERF_A4) * t + _ERF_A3) * t + _ERF_A2) * t
            + _ERF_A1) * t
    return sgn * (1.0 - poly * jnp.exp(-ax * ax))


def _gelu(x):
    return 0.5 * x * (1.0 + _erf(x * (1.0 / math.sqrt(2.0))))


def _layernorm(x, g, b, eps):
    mean = jnp.mean(x, axis=-1, keepdims=True)
    xc = x - mean
    var = jnp.mean(xc * xc, axis=-1, keepdims=True)
    return xc * lax.rsqrt(var + eps) * g + b


def _softmax_rows(s):
    m = jnp.max(s, axis=-1, keepdims=True)
    p = jnp.exp(s - m)
    return p * pl.reciprocal(jnp.sum(p, axis=-1, keepdims=True), approx=True)


# ----------------------------------------------------------------------------
# Fused forward kernel (one grid step = one batch row)
# ----------------------------------------------------------------------------
def _transformer_fwd_kernel(
    x_ref, pe_ref,
    wq_ref, wk_ref, wv_ref, bq_ref, bk_ref, bv_ref,
    wo_ref, bo_ref, g1_ref, b1_ref,
    w1_ref, bf1_ref, w2_ref, bf2_ref, g2_ref, b2_ref,
    fc1w_ref, fc1b_ref, fc2w_ref, fc2b_ref,
    o_ref,
    *, num_layers, nhead, eps,
):
    S, E = x_ref.shape[1], x_ref.shape[2]
    Dh = E // nhead
    scale = 1.0 / math.sqrt(Dh)

    # positional encoding: x * sqrt(d_model) + pe   (PositionalEncoder.forward)
    x = x_ref[0].astype(jnp.float32) * math.sqrt(E) + pe_ref[0].astype(jnp.float32)

    for l in range(num_layers):                       # static unroll
        # ---------------- self-attention block (post-norm) ----------------
        attn = jnp.zeros((S, E), jnp.float32)
        for h in range(nhead):                        # static unroll over heads
            q = jnp.dot(x, wq_ref[l, h], preferred_element_type=jnp.float32) + bq_ref[l, h]
            k = jnp.dot(x, wk_ref[l, h], preferred_element_type=jnp.float32) + bk_ref[l, h]
            v = jnp.dot(x, wv_ref[l, h], preferred_element_type=jnp.float32) + bv_ref[l, h]
            s = lax.dot_general(q, k, (((1,), (1,)), ((), ())),
                                preferred_element_type=jnp.float32) * scale   # (S,S)
            p = _softmax_rows(s)
            oh = jnp.dot(p, v, preferred_element_type=jnp.float32)            # (S,Dh)
            # fold out-projection per head: concat_h(oh) @ Wo == sum_h oh @ Wo[h]
            attn = attn + jnp.dot(oh, wo_ref[l, h], preferred_element_type=jnp.float32)
        attn = attn + bo_ref[l]
        x = _layernorm(x + attn, g1_ref[l], b1_ref[l], eps)

        # ---------------- feed-forward block ----------------
        hdn = jnp.dot(x, w1_ref[l], preferred_element_type=jnp.float32) + bf1_ref[l]
        hdn = _gelu(hdn)
        hdn = jnp.dot(hdn, w2_ref[l], preferred_element_type=jnp.float32) + bf2_ref[l]
        x = _layernorm(x + hdn, g2_ref[l], b2_ref[l], eps)

    # ---------------- classifier head on sequence position 0 ----------------
    # (the PyTorch reference reads x[:, 0] even though the cls token was
    #  appended at the END — reproduced exactly here)
    cls = x[0:1, :]                                                        # (1, E)
    hid = jnp.dot(cls, fc1w_ref[...], preferred_element_type=jnp.float32) + fc1b_ref[...]
    hid = jnp.maximum(hid, 0.0)
    out = jnp.dot(hid, fc2w_ref[...], preferred_element_type=jnp.float32) + fc2b_ref[...]
    o_ref[0] = out.astype(o_ref.dtype)                                     # (1, 128) lane-dense


# ----------------------------------------------------------------------------
# Parameter construction (deterministic, matches module shapes)
# ----------------------------------------------------------------------------
def build_positional_encoding(maxlen, d_model):
    # Reproduces the PyTorch double loop exactly (note the non-standard
    # exponent 2*(i+1)/d_model for odd columns — matches the reference code).
    pe = np.zeros((maxlen, d_model), dtype=np.float64)
    pos = np.arange(maxlen, dtype=np.float64)[:, None]
    i_even = np.arange(0, d_model, 2)
    pe[:, i_even] = np.sin(pos / (10000.0 ** (2.0 * i_even / d_model)))
    pe[:, i_even + 1] = np.cos(pos / (10000.0 ** (2.0 * (i_even + 1) / d_model)))
    return jnp.asarray(pe.astype(np.float32))[None]          # (1, maxlen, d_model)


def init_params(key, *, embed_dim, nhead, num_layers, max_words, dim_ff, maxlen):
    del nhead  # static config, NOT stored in the (traced) params pytree
    keys = jax.random.split(key, 8 + 8 * num_layers)
    kit = iter(keys)
    s = 0.02

    def rnd(shape, scale=s):
        return jax.random.normal(next(kit), shape, dtype=jnp.float32) * scale

    params = {
        "embed": jax.random.normal(next(kit), (max_words, embed_dim), jnp.float32),
        "cls": rnd((1, embed_dim), 1.0),                      # torch.randn(1, E)
        "pe": build_positional_encoding(maxlen + 1, embed_dim),
        "fc1_w": rnd((embed_dim, 2 * embed_dim)),
        "fc1_b": jnp.zeros((2 * embed_dim,), jnp.float32),
        "fc2_w": rnd((2 * embed_dim, 2)),
        "fc2_b": jnp.zeros((2,), jnp.float32),
        "layers": [],
    }
    for _ in range(num_layers):
        params["layers"].append({
            "in_proj_w": rnd((embed_dim, 3 * embed_dim)),
            "in_proj_b": jnp.zeros((3 * embed_dim,), jnp.float32),
            "out_proj_w": rnd((embed_dim, embed_dim)),
            "out_proj_b": jnp.zeros((embed_dim,), jnp.float32),
            "lin1_w": rnd((embed_dim, dim_ff)),
            "lin1_b": jnp.zeros((dim_ff,), jnp.float32),
            "lin2_w": rnd((dim_ff, embed_dim)),
            "lin2_b": jnp.zeros((embed_dim,), jnp.float32),
            "ln1_g": jnp.ones((embed_dim,), jnp.float32),
            "ln1_b": jnp.zeros((embed_dim,), jnp.float32),
            "ln2_g": jnp.ones((embed_dim,), jnp.float32),
            "ln2_b": jnp.zeros((embed_dim,), jnp.float32),
        })
    return params


# ----------------------------------------------------------------------------
# Forward pass (wrapper: gather + layout plumbing + ONE pallas_call)
# ----------------------------------------------------------------------------
def transformers_forward(params, tokens, *, nhead, num_layers):
    B, L = tokens.shape
    E = params["embed"].shape[1]
    H = nhead
    Dh = E // H
    S = L + 1
    FF = params["layers"][0]["lin1_w"].shape[1]
    NPAD = 128                      # lane-dense classifier output (real logits = first 2)
    eps = 1e-5

    # nn.Embedding(max_norm=1): rows with L2 norm > 1 are renormed to 1
    # (PyTorch uses max_norm / (norm + 1e-7) on the looked-up rows).
    w = params["embed"]
    norms = jnp.linalg.norm(w, axis=1, keepdims=True)
    w = jnp.where(norms > 1.0, w * (1.0 / (norms + 1e-7)), w)
    x = jnp.take(w, tokens, axis=0)                           # (B, L, E)

    # cls token appended at the END of the sequence (as in the torch.cat)
    cls = jnp.broadcast_to(params["cls"][None], (B, 1, E))
    x = jnp.concatenate([x, cls], axis=1)                     # (B, S, E)

    pe = params["pe"][:, :S]                                  # (1, S, E)

    # Stack per-layer params and split heads into LEADING dims so the kernel
    # only ever indexes leading (untiled) ref dimensions.
    def stack(name):
        return jnp.stack([lyr[name] for lyr in params["layers"]], axis=0)

    in_w = stack("in_proj_w")                                 # (NL, E, 3E)
    in_b = stack("in_proj_b")                                 # (NL, 3E)
    wq = in_w[:, :, 0 * E:1 * E].reshape(num_layers, E, H, Dh).transpose(0, 2, 1, 3)
    wk = in_w[:, :, 1 * E:2 * E].reshape(num_layers, E, H, Dh).transpose(0, 2, 1, 3)
    wv = in_w[:, :, 2 * E:3 * E].reshape(num_layers, E, H, Dh).transpose(0, 2, 1, 3)
    bq = in_b[:, 0 * E:1 * E].reshape(num_layers, H, 1, Dh)
    bk = in_b[:, 1 * E:2 * E].reshape(num_layers, H, 1, Dh)
    bv = in_b[:, 2 * E:3 * E].reshape(num_layers, H, 1, Dh)
    wo = stack("out_proj_w").reshape(num_layers, H, Dh, E)    # (NL, H, Dh, E)
    bo = stack("out_proj_b").reshape(num_layers, 1, E)
    g1 = stack("ln1_g").reshape(num_layers, 1, E)
    b1 = stack("ln1_b").reshape(num_layers, 1, E)
    w1 = stack("lin1_w")                                      # (NL, E, FF)
    bf1 = stack("lin1_b").reshape(num_layers, 1, FF)
    w2 = stack("lin2_w")                                      # (NL, FF, E)
    bf2 = stack("lin2_b").reshape(num_layers, 1, E)
    g2 = stack("ln2_g").reshape(num_layers, 1, E)
    b2 = stack("ln2_b").reshape(num_layers, 1, E)

    fc1w = params["fc1_w"]                                    # (E, 2E)
    fc1b = params["fc1_b"].reshape(1, -1)                     # (1, 2E)
    # Pad fc2's N=2 output to 128 lanes -> unmasked, lane-dense store in-kernel.
    fc2w = jnp.zeros((2 * E, NPAD), jnp.float32).at[:, :2].set(params["fc2_w"])
    fc2b = jnp.zeros((1, NPAD), jnp.float32).at[0, :2].set(params["fc2_b"])

    args = (x, pe, wq, wk, wv, bq, bk, bv, wo, bo, g1, b1,
            w1, bf1, w2, bf2, g2, b2, fc1w, fc1b, fc2w, fc2b)

    def const_spec(a):
        return pl.BlockSpec(a.shape, lambda i, nd=a.ndim: (0,) * nd)

    in_specs = [pl.BlockSpec((1, S, E), lambda i: (i, 0, 0))]
    in_specs += [const_spec(a) for a in args[1:]]

    kernel = functools.partial(
        _transformer_fwd_kernel, num_layers=num_layers, nhead=nhead, eps=eps)

    out = pl.pallas_call(
        kernel,
        out_shape=jax.ShapeDtypeStruct((B, 1, NPAD), jnp.float32),
        grid=(B,),
        in_specs=in_specs,
        out_specs=pl.BlockSpec((1, 1, NPAD), lambda i: (i, 0, 0)),
        compiler_params=pltpu.CompilerParams(dimension_semantics=("parallel",)),
    )(*args)

    return out[:, 0, :2]                                      # (B, 2)


# ----------------------------------------------------------------------------
if __name__ == "__main__":
    # Small but module-consistent hyperparameters.
    EMBED_DIM = 32
    NHEAD = 4
    NUM_LAYERS = 2
    DIM_FF = 64
    MAXLEN = 16
    MAX_WORDS = 50
    B, L = 2, 8

    key = jax.random.PRNGKey(0)
    pkey, tkey = jax.random.split(key)
    params = init_params(
        pkey,
        embed_dim=EMBED_DIM,
        nhead=NHEAD,
        num_layers=NUM_LAYERS,
        max_words=MAX_WORDS,
        dim_ff=DIM_FF,
        maxlen=MAXLEN,
    )
    tokens = jax.random.randint(tkey, (B, L), 0, MAX_WORDS, dtype=jnp.int32)

    fwd = jax.jit(functools.partial(transformers_forward,
                                    nhead=NHEAD, num_layers=NUM_LAYERS))
    out = jax.block_until_ready(fwd(params, tokens))
    assert out.shape == (B, 2) and out.dtype == jnp.float32
    print("KERNEL_OK")
</pallas_src>

<mosaic_0001>
module attributes {stable_mosaic.version = 11 : i64} {
  func.func @_transformer_fwd_kernel(%arg0: i32, %arg1: memref<1x9x32xf32, #tpu.memory_space<vmem>>, %arg2: memref<1x9x32xf32, #tpu.memory_space<vmem>>, %arg3: memref<2x4x32x8xf32, #tpu.memory_space<vmem>>, %arg4: memref<2x4x32x8xf32, #tpu.memory_space<vmem>>, %arg5: memref<2x4x32x8xf32, #tpu.memory_space<vmem>>, %arg6: memref<2x4x1x8xf32, #tpu.memory_space<vmem>>, %arg7: memref<2x4x1x8xf32, #tpu.memory_space<vmem>>, %arg8: memref<2x4x1x8xf32, #tpu.memory_space<vmem>>, %arg9: memref<2x4x8x32xf32, #tpu.memory_space<vmem>>, %arg10: memref<2x1x32xf32, #tpu.memory_space<vmem>>, %arg11: memref<2x1x32xf32, #tpu.memory_space<vmem>>, %arg12: memref<2x1x32xf32, #tpu.memory_space<vmem>>, %arg13: memref<2x32x64xf32, #tpu.memory_space<vmem>>, %arg14: memref<2x1x64xf32, #tpu.memory_space<vmem>>, %arg15: memref<2x64x32xf32, #tpu.memory_space<vmem>>, %arg16: memref<2x1x32xf32, #tpu.memory_space<vmem>>, %arg17: memref<2x1x32xf32, #tpu.memory_space<vmem>>, %arg18: memref<2x1x32xf32, #tpu.memory_space<vmem>>, %arg19: memref<32x64xf32, #tpu.memory_space<vmem>>, %arg20: memref<1x64xf32, #tpu.memory_space<vmem>>, %arg21: memref<64x128xf32, #tpu.memory_space<vmem>>, %arg22: memref<1x128xf32, #tpu.memory_space<vmem>>, %arg23: memref<1x1x128xf32, #tpu.memory_space<vmem>>) attributes {dimension_semantics = [#tpu.dimension_semantics<parallel>], iteration_bounds = array<i64: 2>, scalar_prefetch = 0 : i64, scratch_operands = 0 : i64, tpu.core_type = #tpu.core_type<tc>, window_params = [{transform_indices = @transform_0, window_bounds = array<i64: 1, 9, 32>}, {pipeline_mode = #tpu.pipeline_mode<synchronous>, transform_indices = @transform_1, window_bounds = array<i64: 1, 9, 32>}, {pipeline_mode = #tpu.pipeline_mode<synchronous>, transform_indices = @transform_2, window_bounds = array<i64: 2, 4, 32, 8>}, {pipeline_mode = #tpu.pipeline_mode<synchronous>, transform_indices = @transform_3, window_bounds = array<i64: 2, 4, 32, 8>}, {pipeline_mode = #tpu.pipeline_mode<synchronous>, transform_indices = @transform_4, window_bounds = array<i64: 2, 4, 32, 8>}, {pipeline_mode = #tpu.pipeline_mode<synchronous>, transform_indices = @transform_5, window_bounds = array<i64: 2, 4, 1, 8>}, {pipeline_mode = #tpu.pipeline_mode<synchronous>, transform_indices = @transform_6, window_bounds = array<i64: 2, 4, 1, 8>}, {pipeline_mode = #tpu.pipeline_mode<synchronous>, transform_indices = @transform_7, window_bounds = array<i64: 2, 4, 1, 8>}, {pipeline_mode = #tpu.pipeline_mode<synchronous>, transform_indices = @transform_8, window_bounds = array<i64: 2, 4, 8, 32>}, {pipeline_mode = #tpu.pipeline_mode<synchronous>, transform_indices = @transform_9, window_bounds = array<i64: 2, 1, 32>}, {pipeline_mode = #tpu.pipeline_mode<synchronous>, transform_indices = @transform_10, window_bounds = array<i64: 2, 1, 32>}, {pipeline_mode = #tpu.pipeline_mode<synchronous>, transform_indices = @transform_11, window_bounds = array<i64: 2, 1, 32>}, {pipeline_mode = #tpu.pipeline_mode<synchronous>, transform_indices = @transform_12, window_bounds = array<i64: 2, 32, 64>}, {pipeline_mode = #tpu.pipeline_mode<synchronous>, transform_indices = @transform_13, window_bounds = array<i64: 2, 1, 64>}, {pipeline_mode = #tpu.pipeline_mode<synchronous>, transform_indices = @transform_14, window_bounds = array<i64: 2, 64, 32>}, {pipeline_mode = #tpu.pipeline_mode<synchronous>, transform_indices = @transform_15, window_bounds = array<i64: 2, 1, 32>}, {pipeline_mode = #tpu.pipeline_mode<synchronous>, transform_indices = @transform_16, window_bounds = array<i64: 2, 1, 32>}, {pipeline_mode = #tpu.pipeline_mode<synchronous>, transform_indices = @transform_17, window_bounds = array<i64: 2, 1, 32>}, {pipeline_mode = #tpu.pipeline_mode<synchronous>, transform_indices = @transform_18, window_bounds = array<i64: 32, 64>}, {pipeline_mode = #tpu.pipeline_mode<synchronous>, transform_indices = @transform_19, window_bounds = array<i64: 1, 64>}, {pipeline_mode = #tpu.pipeline_mode<synchronous>, transform_indices = @transform_20, window_bounds = array<i64: 64, 128>}, {pipeline_mode = #tpu.pipeline_mode<synchronous>, transform_indices = @transform_21, window_bounds = array<i64: 1, 128>}, {transform_indices = @transform_22, window_bounds = array<i64: 1, 1, 128>}]} {
    %c0 = arith.constant 0 : index
    %c0_0 = arith.constant 0 : index
    %c0_1 = arith.constant 0 : index
    %0 = vector.load %arg1[%c0, %c0_0, %c0_1] : memref<1x9x32xf32, #tpu.memory_space<vmem>>, vector<1x9x32xf32>
    %1 = vector.shape_cast %0 : vector<1x9x32xf32> to vector<9x32xf32>
    %cst = arith.constant 5.65685415 : f32
    %2 = vector.broadcast %cst : f32 to vector<9x32xf32>
    %3 = arith.mulf %1, %2 : vector<9x32xf32>
    %c0_2 = arith.constant 0 : index
    %c0_3 = arith.constant 0 : index
    %c0_4 = arith.constant 0 : index
    %4 = vector.load %arg2[%c0_2, %c0_3, %c0_4] : memref<1x9x32xf32, #tpu.memory_space<vmem>>, vector<1x9x32xf32>
    %5 = vector.shape_cast %4 : vector<1x9x32xf32> to vector<9x32xf32>
    %6 = arith.addf %3, %5 : vector<9x32xf32>
    %cst_5 = arith.constant 0.000000e+00 : f32
    %7 = vector.broadcast %cst_5 : f32 to vector<9x32xf32>
    %c0_6 = arith.constant 0 : index
    %c0_7 = arith.constant 0 : index
    %c0_8 = arith.constant 0 : index
    %c0_9 = arith.constant 0 : index
    %8 = vector.load %arg3[%c0_6, %c0_7, %c0_8, %c0_9] : memref<2x4x32x8xf32, #tpu.memory_space<vmem>>, vector<1x1x32x8xf32>
    %9 = vector.shape_cast %8 : vector<1x1x32x8xf32> to vector<32x8xf32>
    %cst_10 = arith.constant dense<0.000000e+00> : vector<9x8xf32>
    %10 = tpu.matmul %6, %9, %cst_10 {dimension_numbers = #tpu.dot_dimension_numbers<[1], [0], [0], [1], [0, 0, 1, 1], [], []>} : vector<9x32xf32>, vector<32x8xf32>, vector<9x8xf32> -> vector<9x8xf32>
    %c0_11 = arith.constant 0 : index
    %c0_12 = arith.constant 0 : index
    %c0_13 = arith.constant 0 : index
    %c0_14 = arith.constant 0 : index
    %11 = vector.load %arg6[%c0_11, %c0_12, %c0_13, %c0_14] : memref<2x4x1x8xf32, #tpu.memory_space<vmem>>, vector<1x1x1x8xf32>
    %12 = vector.shape_cast %11 : vector<1x1x1x8xf32> to vector<1x8xf32>
    %13 = vector.broadcast %12 : vector<1x8xf32> to vector<9x8xf32>
    %14 = arith.addf %10, %13 : vector<9x8xf32>
    %c0_15 = arith.constant 0 : index
    %c0_16 = arith.constant 0 : index
    %c0_17 = arith.constant 0 : index
    %c0_18 = arith.constant 0 : index
    %15 = vector.load %arg4[%c0_15, %c0_16, %c0_17, %c0_18] : memref<2x4x32x8xf32, #tpu.memory_space<vmem>>, vector<1x1x32x8xf32>
    %16 = vector.shape_cast %15 : vector<1x1x32x8xf32> to vector<32x8xf32>
    %cst_19 = arith.constant dense<0.000000e+00> : vector<9x8xf32>
    %17 = tpu.matmul %6, %16, %cst_19 {dimension_numbers = #tpu.dot_dimension_numbers<[1], [0], [0], [1], [0, 0, 1, 1], [], []>} : vector<9x32xf32>, vector<32x8xf32>, vector<9x8xf32> -> vector<9x8xf32>
    %c0_20 = arith.constant 0 : index
    %c0_21 = arith.constant 0 : index
    %c0_22 = arith.constant 0 : index
    %c0_23 = arith.constant 0 : index
    %18 = vector.load %arg7[%c0_20, %c0_21, %c0_22, %c0_23] : memref<2x4x1x8xf32, #tpu.memory_space<vmem>>, vector<1x1x1x8xf32>
    %19 = vector.shape_cast %18 : vector<1x1x1x8xf32> to vector<1x8xf32>
    %20 = vector.broadcast %19 : vector<1x8xf32> to vector<9x8xf32>
    %21 = arith.addf %17, %20 : vector<9x8xf32>
    %c0_24 = arith.constant 0 : index
    %c0_25 = arith.constant 0 : index
    %c0_26 = arith.constant 0 : index
    %c0_27 = arith.constant 0 : index
    %22 = vector.load %arg5[%c0_24, %c0_25, %c0_26, %c0_27] : memref<2x4x32x8xf32, #tpu.memory_space<vmem>>, vector<1x1x32x8xf32>
    %23 = vector.shape_cast %22 : vector<1x1x32x8xf32> to vector<32x8xf32>
    %cst_28 = arith.constant dense<0.000000e+00> : vector<9x8xf32>
    %24 = tpu.matmul %6, %23, %cst_28 {dimension_numbers = #tpu.dot_dimension_numbers<[1], [0], [0], [1], [0, 0, 1, 1], [], []>} : vector<9x32xf32>, vector<32x8xf32>, vector<9x8xf32> -> vector<9x8xf32>
    %c0_29 = arith.constant 0 : index
    %c0_30 = arith.constant 0 : index
    %c0_31 = arith.constant 0 : index
    %c0_32 = arith.constant 0 : index
    %25 = vector.load %arg8[%c0_29, %c0_30, %c0_31, %c0_32] : memref<2x4x1x8xf32, #tpu.memory_space<vmem>>, vector<1x1x1x8xf32>
    %26 = vector.shape_cast %25 : vector<1x1x1x8xf32> to vector<1x8xf32>
    %27 = vector.broadcast %26 : vector<1x8xf32> to vector<9x8xf32>
    %28 = arith.addf %24, %27 : vector<9x8xf32>
    %cst_33 = arith.constant dense<0.000000e+00> : vector<9x9xf32>
    %29 = tpu.matmul %14, %21, %cst_33 {dimension_numbers = #tpu.dot_dimension_numbers<[1], [1], [0], [0], [0, 0, 1, 0], [], []>} : vector<9x8xf32>, vector<9x8xf32>, vector<9x9xf32> -> vector<9x9xf32>
    %cst_34 = arith.constant 0.353553385 : f32
    %30 = vector.broadcast %cst_34 : f32 to vector<9x9xf32>
    %31 = arith.mulf %29, %30 : vector<9x9xf32>
    %cst_35 = arith.constant dense<0xFF800000> : vector<9xf32>
    %32 = vector.multi_reduction <maximumf>, %31, %cst_35 [1] : vector<9x9xf32> to vector<9xf32>
    %33 = vector.shape_cast %32 : vector<9xf32> to vector<9x1xf32>
    %34 = vector.broadcast %33 : vector<9x1xf32> to vector<9x9xf32>
    %35 = arith.subf %31, %34 : vector<9x9xf32>
    %36 = math.exp %35 : vector<9x9xf32>
    %cst_36 = arith.constant dense<0.000000e+00> : vector<9xf32>
    %37 = vector.multi_reduction <add>, %36, %cst_36 [1] : vector<9x9xf32> to vector<9xf32>
    %38 = vector.shape_cast %37 : vector<9xf32> to vector<9x1xf32>
    %39 = tpu.reciprocal %38 {approx = true} : vector<9x1xf32> -> vector<9x1xf32>
    %40 = vector.broadcast %39 : vector<9x1xf32> to vector<9x9xf32>
    %41 = arith.mulf %36, %40 : vector<9x9xf32>
    %cst_37 = arith.constant dense<0.000000e+00> : vector<9x8xf32>
    %42 = tpu.matmul %41, %28, %cst_37 {dimension_numbers = #tpu.dot_dimension_numbers<[1], [0], [0], [1], [0, 0, 1, 1], [], []>} : vector<9x9xf32>, vector<9x8xf32>, vector<9x8xf32> -> vector<9x8xf32>
    %c0_38 = arith.constant 0 : index
    %c0_39 = arith.constant 0 : index
    %c0_40 = arith.constant 0 : index
    %c0_41 = arith.constant 0 : index
    %43 = vector.load %arg9[%c0_38, %c0_39, %c0_40, %c0_41] : memref<2x4x8x32xf32, #tpu.memory_space<vmem>>, vector<1x1x8x32xf32>
    %44 = vector.shape_cast %43 : vector<1x1x8x32xf32> to vector<8x32xf32>
    %cst_42 = arith.constant dense<0.000000e+00> : vector<9x32xf32>
    %45 = tpu.matmul %42, %44, %cst_42 {dimension_numbers = #tpu.dot_dimension_numbers<[1], [0], [0], [1], [0, 0, 1, 1], [], []>} : vector<9x8xf32>, vector<8x32xf32>, vector<9x32xf32> -> vector<9x32xf32>
    %46 = arith.addf %7, %45 : vector<9x32xf32>
    %c0_43 = arith.constant 0 : index
    %c1 = arith.constant 1 : index
    %c0_44 = arith.constant 0 : index
    %c0_45 = arith.constant 0 : index
    %47 = vector.load %arg3[%c0_43, %c1, %c0_44, %c0_45] : memref<2x4x32x8xf32, #tpu.memory_space<vmem>>, vector<1x1x32x8xf32>
    %48 = vector.shape_cast %47 : vector<1x1x32x8xf32> to vector<32x8xf32>
    %cst_46 = arith.constant dense<0.000000e+00> : vector<9x8xf32>
    %49 = tpu.matmul %6, %48, %cst_46 {dimension_numbers = #tpu.dot_dimension_numbers<[1], [0], [0], [1], [0, 0, 1, 1], [], []>} : vector<9x32xf32>, vector<32x8xf32>, vector<9x8xf32> -> vector<9x8xf32>
    %c0_47 = arith.constant 0 : index
    %c1_48 = arith.constant 1 : index
    %c0_49 = arith.constant 0 : index
    %c0_50 = arith.constant 0 : index
    %50 = vector.load %arg6[%c0_47, %c1_48, %c0_49, %c0_50] : memref<2x4x1x8xf32, #tpu.memory_space<vmem>>, vector<1x1x1x8xf32>
    %51 = vector.shape_cast %50 : vector<1x1x1x8xf32> to vector<1x8xf32>
    %52 = vector.broadcast %51 : vector<1x8xf32> to vector<9x8xf32>
    %53 = arith.addf %49, %52 : vector<9x8xf32>
    %c0_51 = arith.constant 0 : index
    %c1_52 = arith.constant 1 : index
    %c0_53 = arith.constant 0 : index
    %c0_54 = arith.constant 0 : index
    %54 = vector.load %arg4[%c0_51, %c1_52, %c0_53, %c0_54] : memref<2x4x32x8xf32, #tpu.memory_space<vmem>>, vector<1x1x32x8xf32>
    %55 = vector.shape_cast %54 : vector<1x1x32x8xf32> to vector<32x8xf32>
    %cst_55 = arith.constant dense<0.000000e+00> : vector<9x8xf32>
    %56 = tpu.matmul %6, %55, %cst_55 {dimension_numbers = #tpu.dot_dimension_numbers<[1], [0], [0], [1], [0, 0, 1, 1], [], []>} : vector<9x32xf32>, vector<32x8xf32>, vector<9x8xf32> -> vector<9x8xf32>
    %c0_56 = arith.constant 0 : index
    %c1_57 = arith.constant 1 : index
    %c0_58 = arith.constant 0 : index
    %c0_59 = arith.constant 0 : index
    %57 = vector.load %arg7[%c0_56, %c1_57, %c0_58, %c0_59] : memref<2x4x1x8xf32, #tpu.memory_space<vmem>>, vector<1x1x1x8xf32>
    %58 = vector.shape_cast %57 : vector<1x1x1x8xf32> to vector<1x8xf32>
    %59 = vector.broadcast %58 : vector<1x8xf32> to vector<9x8xf32>
    %60 = arith.addf %56, %59 : vector<9x8xf32>
    %c0_60 = arith.constant 0 : index
    %c1_61 = arith.constant 1 : index
    %c0_62 = arith.constant 0 : index
    %c0_63 = arith.constant 0 : index
    %61 = vector.load %arg5[%c0_60, %c1_61, %c0_62, %c0_63] : memref<2x4x32x8xf32, #tpu.memory_space<vmem>>, vector<1x1x32x8xf32>
    %62 = vector.shape_cast %61 : vector<1x1x32x8xf32> to vector<32x8xf32>
    %cst_64 = arith.constant dense<0.000000e+00> : vector<9x8xf32>
    %63 = tpu.matmul %6, %62, %cst_64 {dimension_numbers = #tpu.dot_dimension_numbers<[1], [0], [0], [1], [0, 0, 1, 1], [], []>} : vector<9x32xf32>, vector<32x8xf32>, vector<9x8xf32> -> vector<9x8xf32>
    %c0_65 = arith.constant 0 : index
    %c1_66 = arith.constant 1 : index
    %c0_67 = arith.constant 0 : index
    %c0_68 = arith.constant 0 : index
    %64 = vector.load %arg8[%c0_65, %c1_66, %c0_67, %c0_68] : memref<2x4x1x8xf32, #tpu.memory_space<vmem>>, vector<1x1x1x8xf32>
    %65 = vector.shape_cast %64 : vector<1x1x1x8xf32> to vector<1x8xf32>
    %66 = vector.broadcast %65 : vector<1x8xf32> to vector<9x8xf32>
    %67 = arith.addf %63, %66 : vector<9x8xf32>
    %cst_69 = arith.constant dense<0.000000e+00> : vector<9x9xf32>
    %68 = tpu.matmul %53, %60, %cst_69 {dimension_numbers = #tpu.dot_dimension_numbers<[1], [1], [0], [0], [0, 0, 1, 0], [], []>} : vector<9x8xf32>, vector<9x8xf32>, vector<9x9xf32> -> vector<9x9xf32>
    %cst_70 = arith.constant 0.353553385 : f32
    %69 = vector.broadcast %cst_70 : f32 to vector<9x9xf32>
    %70 = arith.mulf %68, %69 : vector<9x9xf32>
    %cst_71 = arith.constant dense<0xFF800000> : vector<9xf32>
    %71 = vector.multi_reduction <maximumf>, %70, %cst_71 [1] : vector<9x9xf32> to vector<9xf32>
    %72 = vector.shape_cast %71 : vector<9xf32> to vector<9x1xf32>
    %73 = vector.broadcast %72 : vector<9x1xf32> to vector<9x9xf32>
    %74 = arith.subf %70, %73 : vector<9x9xf32>
    %75 = math.exp %74 : vector<9x9xf32>
    %cst_72 = arith.constant dense<0.000000e+00> : vector<9xf32>
    %76 = vector.multi_reduction <add>, %75, %cst_72 [1] : vector<9x9xf32> to vector<9xf32>
    %77 = vector.shape_cast %76 : vector<9xf32> to vector<9x1xf32>
    %78 = tpu.reciprocal %77 {approx = true} : vector<9x1xf32> -> vector<9x1xf32>
    %79 = vector.broadcast %78 : vector<9x1xf32> to vector<9x9xf32>
    %80 = arith.mulf %75, %79 : vector<9x9xf32>
    %cst_73 = arith.constant dense<0.000000e+00> : vector<9x8xf32>
    %81 = tpu.matmul %80, %67, %cst_73 {dimension_numbers = #tpu.dot_dimension_numbers<[1], [0], [0], [1], [0, 0, 1, 1], [], []>} : vector<9x9xf32>, vector<9x8xf32>, vector<9x8xf32> -> vector<9x8xf32>
    %c0_74 = arith.constant 0 : index
    %c1_75 = arith.constant 1 : index
    %c0_76 = arith.constant 0 : index
    %c0_77 = arith.constant 0 : index
    %82 = vector.load %arg9[%c0_74, %c1_75, %c0_76, %c0_77] : memref<2x4x8x32xf32, #tpu.memory_space<vmem>>, vector<1x1x8x32xf32>
    %83 = vector.shape_cast %82 : vector<1x1x8x32xf32> to vector<8x32xf32>
    %cst_78 = arith.constant dense<0.000000e+00> : vector<9x32xf32>
    %84 = tpu.matmul %81, %83, %cst_78 {dimension_numbers = #tpu.dot_dimension_numbers<[1], [0], [0], [1], [0, 0, 1, 1], [], []>} : vector<9x8xf32>, vector<8x32xf32>, vector<9x32xf32> -> vector<9x32xf32>
    %85 = arith.addf %46, %84 : vector<9x32xf32>
    %c0_79 = arith.constant 0 : index
    %c2 = arith.constant 2 : index
    %c0_80 = arith.constant 0 : index
    %c0_81 = arith.constant 0 : index
    %86 = vector.load %arg3[%c0_79, %c2, %c0_80, %c0_81] : memref<2x4x32x8xf32, #tpu.memory_space<vmem>>, vector<1x1x32x8xf32>
    %87 = vector.shape_cast %86 : vector<1x1x32x8xf32> to vector<32x8xf32>
    %cst_82 = arith.constant dense<0.000000e+00> : vector<9x8xf32>
    %88 = tpu.matmul %6, %87, %cst_82 {dimension_numbers = #tpu.dot_dimension_numbers<[1], [0], [0], [1], [0, 0, 1, 1], [], []>} : vector<9x32xf32>, vector<32x8xf32>, vector<9x8xf32> -> vector<9x8xf32>
    %c0_83 = arith.constant 0 : index
    %c2_84 = arith.constant 2 : index
    %c0_85 = arith.constant 0 : index
    %c0_86 = arith.constant 0 : index
    %89 = vector.load %arg6[%c0_83, %c2_84, %c0_85, %c0_86] : memref<2x4x1x8xf32, #tpu.memory_space<vmem>>, vector<1x1x1x8xf32>
    %90 = vector.shape_cast %89 : vector<1x1x1x8xf32> to vector<1x8xf32>
    %91 = vector.broadcast %90 : vector<1x8xf32> to vector<9x8xf32>
    %92 = arith.addf %88, %91 : vector<9x8xf32>
    %c0_87 = arith.constant 0 : index
    %c2_88 = arith.constant 2 : index
    %c0_89 = arith.constant 0 : index
    %c0_90 = arith.constant 0 : index
    %93 = vector.load %arg4[%c0_87, %c2_88, %c0_89, %c0_90] : memref<2x4x32x8xf32, #tpu.memory_space<vmem>>, vector<1x1x32x8xf32>
    %94 = vector.shape_cast %93 : vector<1x1x32x8xf32> to vector<32x8xf32>
    %cst_91 = arith.constant dense<0.000000e+00> : vector<9x8xf32>
    %95 = tpu.matmul %6, %94, %cst_91 {dimension_numbers = #tpu.dot_dimension_numbers<[1], [0], [0], [1], [0, 0, 1, 1], [], []>} : vector<9x32xf32>, vector<32x8xf32>, vector<9x8xf32> -> vector<9x8xf32>
    %c0_92 = arith.constant 0 : index
    %c2_93 = arith.constant 2 : index
    %c0_94 = arith.constant 0 : index
    %c0_95 = arith.constant 0 : index
    %96 = vector.load %arg7[%c0_92, %c2_93, %c0_94, %c0_95] : memref<2x4x1x8xf32, #tpu.memory_space<vmem>>, vector<1x1x1x8xf32>
    %97 = vector.shape_cast %96 : vector<1x1x1x8xf32> to vector<1x8xf32>
    %98 = vector.broadcast %97 : vector<1x8xf32> to vector<9x8xf32>
    %99 = arith.addf %95, %98 : vector<9x8xf32>
    %c0_96 = arith.constant 0 : index
    %c2_97 = arith.constant 2 : index
    %c0_98 = arith.constant 0 : index
    %c0_99 = arith.constant 0 : index
    %100 = vector.load %arg5[%c0_96, %c2_97, %c0_98, %c0_99] : memref<2x4x32x8xf32, #tpu.memory_space<vmem>>, vector<1x1x32x8xf32>
    %101 = vector.shape_cast %100 : vector<1x1x32x8xf32> to vector<32x8xf32>
    %cst_100 = arith.constant dense<0.000000e+00> : vector<9x8xf32>
    %102 = tpu.matmul %6, %101, %cst_100 {dimension_numbers = #tpu.dot_dimension_numbers<[1], [0], [0], [1], [0, 0, 1, 1], [], []>} : vector<9x32xf32>, vector<32x8xf32>, vector<9x8xf32> -> vector<9x8xf32>
    %c0_101 = arith.constant 0 : index
    %c2_102 = arith.constant 2 : index
    %c0_103 = arith.constant 0 : index
    %c0_104 = arith.constant 0 : index
    %103 = vector.load %arg8[%c0_101, %c2_102, %c0_103, %c0_104] : memref<2x4x1x8xf32, #tpu.memory_space<vmem>>, vector<1x1x1x8xf32>
    %104 = vector.shape_cast %103 : vector<1x1x1x8xf32> to vector<1x8xf32>
    %105 = vector.broadcast %104 : vector<1x8xf32> to vector<9x8xf32>
    %106 = arith.addf %102, %105 : vector<9x8xf32>
    %cst_105 = arith.constant dense<0.000000e+00> : vector<9x9xf32>
    %107 = tpu.matmul %92, %99, %cst_105 {dimension_numbers = #tpu.dot_dimension_numbers<[1], [1], [0], [0], [0, 0, 1, 0], [], []>} : vector<9x8xf32>, vector<9x8xf32>, vector<9x9xf32> -> vector<9x9xf32>
    %cst_106 = arith.constant 0.353553385 : f32
    %108 = vector.broadcast %cst_106 : f32 to vector<9x9xf32>
    %109 = arith.mulf %107, %108 : vector<9x9xf32>
    %cst_107 = arith.constant dense<0xFF800000> : vector<9xf32>
    %110 = vector.multi_reduction <maximumf>, %109, %cst_107 [1] : vector<9x9xf32> to vector<9xf32>
    %111 = vector.shape_cast %110 : vector<9xf32> to vector<9x1xf32>
    %112 = vector.broadcast %111 : vector<9x1xf32> to vector<9x9xf32>
    %113 = arith.subf %109, %112 : vector<9x9xf32>
    %114 = math.exp %113 : vector<9x9xf32>
    %cst_108 = arith.constant dense<0.000000e+00> : vector<9xf32>
    %115 = vector.multi_reduction <add>, %114, %cst_108 [1] : vector<9x9xf32> to vector<9xf32>
    %116 = vector.shape_cast %115 : vector<9xf32> to vector<9x1xf32>
    %117 = tpu.reciprocal %116 {approx = true} : vector<9x1xf32> -> vector<9x1xf32>
    %118 = vector.broadcast %117 : vector<9x1xf32> to vector<9x9xf32>
    %119 = arith.mulf %114, %118 : vector<9x9xf32>
    %cst_109 = arith.constant dense<0.000000e+00> : vector<9x8xf32>
    %120 = tpu.matmul %119, %106, %cst_109 {dimension_numbers = #tpu.dot_dimension_numbers<[1], [0], [0], [1], [0, 0, 1, 1], [], []>} : vector<9x9xf32>, vector<9x8xf32>, vector<9x8xf32> -> vector<9x8xf32>
    %c0_110 = arith.constant 0 : index
    %c2_111 = arith.constant 2 : index
    %c0_112 = arith.constant 0 : index
    %c0_113 = arith.constant 0 : index
    %121 = vector.load %arg9[%c0_110, %c2_111, %c0_112, %c0_113] : memref<2x4x8x32xf32, #tpu.memory_space<vmem>>, vector<1x1x8x32xf32>
    %122 = vector.shape_cast %121 : vector<1x1x8x32xf32> to vector<8x32xf32>
    %cst_114 = arith.constant dense<0.000000e+00> : vector<9x32xf32>
    %123 = tpu.matmul %120, %122, %cst_114 {dimension_numbers = #tpu.dot_dimension_numbers<[1], [0], [0], [1], [0, 0, 1, 1], [], []>} : vector<9x8xf32>, vector<8x32xf32>, vector<9x32xf32> -> vector<9x32xf32>
    %124 = arith.addf %85, %123 : vector<9x32xf32>
    %c0_115 = arith.constant 0 : index
    %c3 = arith.constant 3 : index
    %c0_116 = arith.constant 0 : index
    %c0_117 = arith.constant 0 : index
    %125 = vector.load %arg3[%c0_115, %c3, %c0_116, %c0_117] : memref<2x4x32x8xf32, #tpu.memory_space<vmem>>, vector<1x1x32x8xf32>
    %126 = vector.shape_cast %125 : vector<1x1x32x8xf32> to vector<32x8xf32>
    %cst_118 = arith.constant dense<0.000000e+00> : vector<9x8xf32>
    %127 = tpu.matmul %6, %126, %cst_118 {dimension_numbers = #tpu.dot_dimension_numbers<[1], [0], [0], [1], [0, 0, 1, 1], [], []>} : vector<9x32xf32>, vector<32x8xf32>, vector<9x8xf32> -> vector<9x8xf32>
    %c0_119 = arith.constant 0 : index
    %c3_120 = arith.constant 3 : index
    %c0_121 = arith.constant 0 : index
    %c0_122 = arith.constant 0 : index
    %128 = vector.load %arg6[%c0_119, %c3_120, %c0_121, %c0_122] : memref<2x4x1x8xf32, #tpu.memory_space<vmem>>, vector<1x1x1x8xf32>
    %129 = vector.shape_cast %128 : vector<1x1x1x8xf32> to vector<1x8xf32>
    %130 = vector.broadcast %129 : vector<1x8xf32> to vector<9x8xf32>
    %131 = arith.addf %127, %130 : vector<9x8xf32>
    %c0_123 = arith.constant 0 : index
    %c3_124 = arith.constant 3 : index
    %c0_125 = arith.constant 0 : index
    %c0_126 = arith.constant 0 : index
    %132 = vector.load %arg4[%c0_123, %c3_124, %c0_125, %c0_126] : memref<2x4x32x8xf32, #tpu.memory_space<vmem>>, vector<1x1x32x8xf32>
    %133 = vector.shape_cast %132 : vector<1x1x32x8xf32> to vector<32x8xf32>
    %cst_127 = arith.constant dense<0.000000e+00> : vector<9x8xf32>
    %134 = tpu.matmul %6, %133, %cst_127 {dimension_numbers = #tpu.dot_dimension_numbers<[1], [0], [0], [1], [0, 0, 1, 1], [], []>} : vector<9x32xf32>, vector<32x8xf32>, vector<9x8xf32> -> vector<9x8xf32>
    %c0_128 = arith.constant 0 : index
    %c3_129 = arith.constant 3 : index
    %c0_130 = arith.constant 0 : index
    %c0_131 = arith.constant 0 : index
    %135 = vector.load %arg7[%c0_128, %c3_129, %c0_130, %c0_131] : memref<2x4x1x8xf32, #tpu.memory_space<vmem>>, vector<1x1x1x8xf32>
    %136 = vector.shape_cast %135 : vector<1x1x1x8xf32> to vector<1x8xf32>
    %137 = vector.broadcast %136 : vector<1x8xf32> to vector<9x8xf32>
    %138 = arith.addf %134, %137 : vector<9x8xf32>
    %c0_132 = arith.constant 0 : index
    %c3_133 = arith.constant 3 : index
    %c0_134 = arith.constant 0 : index
    %c0_135 = arith.constant 0 : index
    %139 = vector.load %arg5[%c0_132, %c3_133, %c0_134, %c0_135] : memref<2x4x32x8xf32, #tpu.memory_space<vmem>>, vector<1x1x32x8xf32>
    %140 = vector.shape_cast %139 : vector<1x1x32x8xf32> to vector<32x8xf32>
    %cst_136 = arith.constant dense<0.000000e+00> : vector<9x8xf32>
    %141 = tpu.matmul %6, %140, %cst_136 {dimension_numbers = #tpu.dot_dimension_numbers<[1], [0], [0], [1], [0, 0, 1, 1], [], []>} : vector<9x32xf32>, vector<32x8xf32>, vector<9x8xf32> -> vector<9x8xf32>
    %c0_137 = arith.constant 0 : index
    %c3_138 = arith.constant 3 : index
    %c0_139 = arith.constant 0 : index
    %c0_140 = arith.constant 0 : index
    %142 = vector.load %arg8[%c0_137, %c3_138, %c0_139, %c0_140] : memref<2x4x1x8xf32, #tpu.memory_space<vmem>>, vector<1x1x1x8xf32>
    %143 = vector.shape_cast %142 : vector<1x1x1x8xf32> to vector<1x8xf32>
    %144 = vector.broadcast %143 : vector<1x8xf32> to vector<9x8xf32>
    %145 = arith.addf %141, %144 : vector<9x8xf32>
    %cst_141 = arith.constant dense<0.000000e+00> : vector<9x9xf32>
    %146 = tpu.matmul %131, %138, %cst_141 {dimension_numbers = #tpu.dot_dimension_numbers<[1], [1], [0], [0], [0, 0, 1, 0], [], []>} : vector<9x8xf32>, vector<9x8xf32>, vector<9x9xf32> -> vector<9x9xf32>
    %cst_142 = arith.constant 0.353553385 : f32
    %147 = vector.broadcast %cst_142 : f32 to vector<9x9xf32>
    %148 = arith.mulf %146, %147 : vector<9x9xf32>
    %cst_143 = arith.constant dense<0xFF800000> : vector<9xf32>
    %149 = vector.multi_reduction <maximumf>, %148, %cst_143 [1] : vector<9x9xf32> to vector<9xf32>
    %150 = vector.shape_cast %149 : vector<9xf32> to vector<9x1xf32>
    %151 = vector.broadcast %150 : vector<9x1xf32> to vector<9x9xf32>
    %152 = arith.subf %148, %151 : vector<9x9xf32>
    %153 = math.exp %152 : vector<9x9xf32>
    %cst_144 = arith.constant dense<0.000000e+00> : vector<9xf32>
    %154 = vector.multi_reduction <add>, %153, %cst_144 [1] : vector<9x9xf32> to vector<9xf32>
    %155 = vector.shape_cast %154 : vector<9xf32> to vector<9x1xf32>
    %156 = tpu.reciprocal %155 {approx = true} : vector<9x1xf32> -> vector<9x1xf32>
    %157 = vector.broadcast %156 : vector<9x1xf32> to vector<9x9xf32>
    %158 = arith.mulf %153, %157 : vector<9x9xf32>
    %cst_145 = arith.constant dense<0.000000e+00> : vector<9x8xf32>
    %159 = tpu.matmul %158, %145, %cst_145 {dimension_numbers = #tpu.dot_dimension_numbers<[1], [0], [0], [1], [0, 0, 1, 1], [], []>} : vector<9x9xf32>, vector<9x8xf32>, vector<9x8xf32> -> vector<9x8xf32>
    %c0_146 = arith.constant 0 : index
    %c3_147 = arith.constant 3 : index
    %c0_148 = arith.constant 0 : index
    %c0_149 = arith.constant 0 : index
    %160 = vector.load %arg9[%c0_146, %c3_147, %c0_148, %c0_149] : memref<2x4x8x32xf32, #tpu.memory_space<vmem>>, vector<1x1x8x32xf32>
    %161 = vector.shape_cast %160 : vector<1x1x8x32xf32> to vector<8x32xf32>
    %cst_150 = arith.constant dense<0.000000e+00> : vector<9x32xf32>
    %162 = tpu.matmul %159, %161, %cst_150 {dimension_numbers = #tpu.dot_dimension_numbers<[1], [0], [0], [1], [0, 0, 1, 1], [], []>} : vector<9x8xf32>, vector<8x32xf32>, vector<9x32xf32> -> vector<9x32xf32>
    %163 = arith.addf %124, %162 : vector<9x32xf32>
    %c0_151 = arith.constant 0 : index
    %c0_152 = arith.constant 0 : index
    %c0_153 = arith.constant 0 : index
    %164 = vector.load %arg10[%c0_151, %c0_152, %c0_153] : memref<2x1x32xf32, #tpu.memory_space<vmem>>, vector<1x1x32xf32>
    %165 = vector.shape_cast %164 : vector<1x1x32xf32> to vector<1x32xf32>
    %166 = vector.broadcast %165 : vector<1x32xf32> to vector<9x32xf32>
    %167 = arith.addf %163, %166 : vector<9x32xf32>
    %168 = arith.addf %6, %167 : vector<9x32xf32>
    %c0_154 = arith.constant 0 : index
    %c0_155 = arith.constant 0 : index
    %c0_156 = arith.constant 0 : index
    %169 = vector.load %arg11[%c0_154, %c0_155, %c0_156] : memref<2x1x32xf32, #tpu.memory_space<vmem>>, vector<1x1x32xf32>
    %170 = vector.shape_cast %169 : vector<1x1x32xf32> to vector<1x32xf32>
    %c0_157 = arith.constant 0 : index
    %c0_158 = arith.constant 0 : index
    %c0_159 = arith.constant 0 : index
    %171 = vector.load %arg12[%c0_157, %c0_158, %c0_159] : memref<2x1x32xf32, #tpu.memory_space<vmem>>, vector<1x1x32xf32>
    %172 = vector.shape_cast %171 : vector<1x1x32xf32> to vector<1x32xf32>
    %cst_160 = arith.constant dense<0.000000e+00> : vector<9xf32>
    %173 = vector.multi_reduction <add>, %168, %cst_160 [1] : vector<9x32xf32> to vector<9xf32>
    %174 = vector.shape_cast %173 : vector<9xf32> to vector<9x1xf32>
    %cst_161 = arith.constant 3.200000e+01 : f32
    %175 = vector.broadcast %cst_161 : f32 to vector<9x1xf32>
    %176 = arith.divf %174, %175 : vector<9x1xf32>
    %177 = vector.broadcast %176 : vector<9x1xf32> to vector<9x32xf32>
    %178 = arith.subf %168, %177 : vector<9x32xf32>
    %179 = arith.mulf %178, %178 : vector<9x32xf32>
    %cst_162 = arith.constant dense<0.000000e+00> : vector<9xf32>
    %180 = vector.multi_reduction <add>, %179, %cst_162 [1] : vector<9x32xf32> to vector<9xf32>
    %181 = vector.shape_cast %180 : vector<9xf32> to vector<9x1xf32>
    %cst_163 = arith.constant 3.200000e+01 : f32
    %182 = vector.broadcast %cst_163 : f32 to vector<9x1xf32>
    %183 = arith.divf %181, %182 : vector<9x1xf32>
    %cst_164 = arith.constant 9.99999974E-6 : f32
    %184 = vector.broadcast %cst_164 : f32 to vector<9x1xf32>
    %185 = arith.addf %183, %184 : vector<9x1xf32>
    %186 = math.rsqrt %185 : vector<9x1xf32>
    %187 = vector.broadcast %186 : vector<9x1xf32> to vector<9x32xf32>
    %188 = arith.mulf %178, %187 : vector<9x32xf32>
    %189 = vector.broadcast %170 : vector<1x32xf32> to vector<9x32xf32>
    %190 = arith.mulf %188, %189 : vector<9x32xf32>
    %191 = vector.broadcast %172 : vector<1x32xf32> to vector<9x32xf32>
    %192 = arith.addf %190, %191 : vector<9x32xf32>
    %c0_165 = arith.constant 0 : index
    %c0_166 = arith.constant 0 : index
    %c0_167 = arith.constant 0 : index
    %193 = vector.load %arg13[%c0_165, %c0_166, %c0_167] : memref<2x32x64xf32, #tpu.memory_space<vmem>>, vector<1x32x64xf32>
    %194 = vector.shape_cast %193 : vector<1x32x64xf32> to vector<32x64xf32>
    %cst_168 = arith.constant dense<0.000000e+00> : vector<9x64xf32>
    %195 = tpu.matmul %192, %194, %cst_168 {dimension_numbers = #tpu.dot_dimension_numbers<[1], [0], [0], [1], [0, 0, 1, 1], [], []>} : vector<9x32xf32>, vector<32x64xf32>, vector<9x64xf32> -> vector<9x64xf32>
    %c0_169 = arith.constant 0 : index
    %c0_170 = arith.constant 0 : index
    %c0_171 = arith.constant 0 : index
    %196 = vector.load %arg14[%c0_169, %c0_170, %c0_171] : memref<2x1x64xf32, #tpu.memory_space<vmem>>, vector<1x1x64xf32>
    %197 = vector.shape_cast %196 : vector<1x1x64xf32> to vector<1x64xf32>
    %198 = vector.broadcast %197 : vector<1x64xf32> to vector<9x64xf32>
    %199 = arith.addf %195, %198 : vector<9x64xf32>
    %cst_172 = arith.constant 5.000000e-01 : f32
    %200 = vector.broadcast %cst_172 : f32 to vector<9x64xf32>
    %201 = arith.mulf %200, %199 : vector<9x64xf32>
    %cst_173 = arith.constant 0.707106769 : f32
    %202 = vector.broadcast %cst_173 : f32 to vector<9x64xf32>
    %203 = arith.mulf %199, %202 : vector<9x64xf32>
    %cst_174 = arith.constant 0.000000e+00 : f32
    %204 = vector.broadcast %cst_174 : f32 to vector<9x64xf32>
    %205 = arith.cmpf oge, %203, %204 : vector<9x64xf32>
    %cst_175 = arith.constant 1.000000e+00 : f32
    %cst_176 = arith.constant -1.000000e+00 : f32
    %206 = vector.broadcast %cst_175 : f32 to vector<9x64xf32>
    %207 = vector.broadcast %cst_176 : f32 to vector<9x64xf32>
    %208 = arith.select %205, %206, %207 : vector<9x64xi1>, vector<9x64xf32>
    %209 = math.absf %203 : vector<9x64xf32>
    %cst_177 = arith.constant 0.327591091 : f32
    %210 = vector.broadcast %cst_177 : f32 to vector<9x64xf32>
    %211 = arith.mulf %210, %209 : vector<9x64xf32>
    %cst_178 = arith.constant 1.000000e+00 : f32
    %212 = vector.broadcast %cst_178 : f32 to vector<9x64xf32>
    %213 = arith.addf %212, %211 : vector<9x64xf32>
    %cst_179 = arith.constant 1.000000e+00 : f32
    %214 = vector.broadcast %cst_179 : f32 to vector<9x64xf32>
    %215 = arith.divf %214, %213 : vector<9x64xf32>
    %cst_180 = arith.constant 1.06140542 : f32
    %216 = vector.broadcast %cst_180 : f32 to vector<9x64xf32>
    %217 = arith.mulf %216, %215 : vector<9x64xf32>
    %cst_181 = arith.constant -1.45315206 : f32
    %218 = vector.broadcast %cst_181 : f32 to vector<9x64xf32>
    %219 = arith.addf %217, %218 : vector<9x64xf32>
    %220 = arith.mulf %219, %215 : vector<9x64xf32>
    %cst_182 = arith.constant 1.42141378 : f32
    %221 = vector.broadcast %cst_182 : f32 to vector<9x64xf32>
    %222 = arith.addf %220, %221 : vector<9x64xf32>
    %223 = arith.mulf %222, %215 : vector<9x64xf32>
    %cst_183 = arith.constant -0.284496725 : f32
    %224 = vector.broadcast %cst_183 : f32 to vector<9x64xf32>
    %225 = arith.addf %223, %224 : vector<9x64xf32>
    %226 = arith.mulf %225, %215 : vector<9x64xf32>
    %cst_184 = arith.constant 0.254829586 : f32
    %227 = vector.broadcast %cst_184 : f32 to vector<9x64xf32>
    %228 = arith.addf %226, %227 : vector<9x64xf32>
    %229 = arith.mulf %228, %215 : vector<9x64xf32>
    %cst_185 = arith.constant 0.000000e+00 : f32
    %230 = vector.broadcast %cst_185 : f32 to vector<9x64xf32>
    %231 = arith.subf %230, %209 : vector<9x64xf32>
    %232 = arith.mulf %231, %209 : vector<9x64xf32>
    %233 = math.exp %232 : vector<9x64xf32>
    %234 = arith.mulf %229, %233 : vector<9x64xf32>
    %cst_186 = arith.constant 1.000000e+00 : f32
    %235 = vector.broadcast %cst_186 : f32 to vector<9x64xf32>
    %236 = arith.subf %235, %234 : vector<9x64xf32>
    %237 = arith.mulf %208, %236 : vector<9x64xf32>
    %cst_187 = arith.constant 1.000000e+00 : f32
    %238 = vector.broadcast %cst_187 : f32 to vector<9x64xf32>
    %239 = arith.addf %238, %237 : vector<9x64xf32>
    %240 = arith.mulf %201, %239 : vector<9x64xf32>
    %c0_188 = arith.constant 0 : index
    %c0_189 = arith.constant 0 : index
    %c0_190 = arith.constant 0 : index
    %241 = vector.load %arg15[%c0_188, %c0_189, %c0_190] : memref<2x64x32xf32, #tpu.memory_space<vmem>>, vector<1x64x32xf32>
    %242 = vector.shape_cast %241 : vector<1x64x32xf32> to vector<64x32xf32>
    %cst_191 = arith.constant dense<0.000000e+00> : vector<9x32xf32>
    %243 = tpu.matmul %240, %242, %cst_191 {dimension_numbers = #tpu.dot_dimension_numbers<[1], [0], [0], [1], [0, 0, 1, 1], [], []>} : vector<9x64xf32>, vector<64x32xf32>, vector<9x32xf32> -> vector<9x32xf32>
    %c0_192 = arith.constant 0 : index
    %c0_193 = arith.constant 0 : index
    %c0_194 = arith.constant 0 : index
    %244 = vector.load %arg16[%c0_192, %c0_193, %c0_194] : memref<2x1x32xf32, #tpu.memory_space<vmem>>, vector<1x1x32xf32>
    %245 = vector.shape_cast %244 : vector<1x1x32xf32> to vector<1x32xf32>
    %246 = vector.broadcast %245 : vector<1x32xf32> to vector<9x32xf32>
    %247 = arith.addf %243, %246 : vector<9x32xf32>
    %248 = arith.addf %192, %247 : vector<9x32xf32>
    %c0_195 = arith.constant 0 : index
    %c0_196 = arith.constant 0 : index
    %c0_197 = arith.constant 0 : index
    %249 = vector.load %arg17[%c0_195, %c0_196, %c0_197] : memref<2x1x32xf32, #tpu.memory_space<vmem>>, vector<1x1x32xf32>
    %250 = vector.shape_cast %249 : vector<1x1x32xf32> to vector<1x32xf32>
    %c0_198 = arith.constant 0 : index
    %c0_199 = arith.constant 0 : index
    %c0_200 = arith.constant 0 : index
    %251 = vector.load %arg18[%c0_198, %c0_199, %c0_200] : memref<2x1x32xf32, #tpu.memory_space<vmem>>, vector<1x1x32xf32>
    %252 = vector.shape_cast %251 : vector<1x1x32xf32> to vector<1x32xf32>
    %cst_201 = arith.constant dense<0.000000e+00> : vector<9xf32>
    %253 = vector.multi_reduction <add>, %248, %cst_201 [1] : vector<9x32xf32> to vector<9xf32>
    %254 = vector.shape_cast %253 : vector<9xf32> to vector<9x1xf32>
    %cst_202 = arith.constant 3.200000e+01 : f32
    %255 = vector.broadcast %cst_202 : f32 to vector<9x1xf32>
    %256 = arith.divf %254, %255 : vector<9x1xf32>
    %257 = vector.broadcast %256 : vector<9x1xf32> to vector<9x32xf32>
    %258 = arith.subf %248, %257 : vector<9x32xf32>
    %259 = arith.mulf %258, %258 : vector<9x32xf32>
    %cst_203 = arith.constant dense<0.000000e+00> : vector<9xf32>
    %260 = vector.multi_reduction <add>, %259, %cst_203 [1] : vector<9x32xf32> to vector<9xf32>
    %261 = vector.shape_cast %260 : vector<9xf32> to vector<9x1xf32>
    %cst_204 = arith.constant 3.200000e+01 : f32
    %262 = vector.broadcast %cst_204 : f32 to vector<9x1xf32>
    %263 = arith.divf %261, %262 : vector<9x1xf32>
    %cst_205 = arith.constant 9.99999974E-6 : f32
    %264 = vector.broadcast %cst_205 : f32 to vector<9x1xf32>
    %265 = arith.addf %263, %264 : vector<9x1xf32>
    %266 = math.rsqrt %265 : vector<9x1xf32>
    %267 = vector.broadcast %266 : vector<9x1xf32> to vector<9x32xf32>
    %268 = arith.mulf %258, %267 : vector<9x32xf32>
    %269 = vector.broadcast %250 : vector<1x32xf32> to vector<9x32xf32>
    %270 = arith.mulf %268, %269 : vector<9x32xf32>
    %271 = vector.broadcast %252 : vector<1x32xf32> to vector<9x32xf32>
    %272 = arith.addf %270, %271 : vector<9x32xf32>
    %cst_206 = arith.constant 0.000000e+00 : f32
    %273 = vector.broadcast %cst_206 : f32 to vector<9x32xf32>
    %c1_207 = arith.constant 1 : index
    %c0_208 = arith.constant 0 : index
    %c0_209 = arith.constant 0 : index
    %c0_210 = arith.constant 0 : index
    %274 = vector.load %arg3[%c1_207, %c0_208, %c0_209, %c0_210] : memref<2x4x32x8xf32, #tpu.memory_space<vmem>>, vector<1x1x32x8xf32>
    %275 = vector.shape_cast %274 : vector<1x1x32x8xf32> to vector<32x8xf32>
    %cst_211 = arith.constant dense<0.000000e+00> : vector<9x8xf32>
    %276 = tpu.matmul %272, %275, %cst_211 {dimension_numbers = #tpu.dot_dimension_numbers<[1], [0], [0], [1], [0, 0, 1, 1], [], []>} : vector<9x32xf32>, vector<32x8xf32>, vector<9x8xf32> -> vector<9x8xf32>
    %c1_212 = arith.constant 1 : index
    %c0_213 = arith.constant 0 : index
    %c0_214 = arith.constant 0 : index
    %c0_215 = arith.constant 0 : index
    %277 = vector.load %arg6[%c1_212, %c0_213, %c0_214, %c0_215] : memref<2x4x1x8xf32, #tpu.memory_space<vmem>>, vector<1x1x1x8xf32>
    %278 = vector.shape_cast %277 : vector<1x1x1x8xf32> to vector<1x8xf32>
    %279 = vector.broadcast %278 : vector<1x8xf32> to vector<9x8xf32>
    %280 = arith.addf %276, %279 : vector<9x8xf32>
    %c1_216 = arith.constant 1 : index
    %c0_217 = arith.constant 0 : index
    %c0_218 = arith.constant 0 : index
    %c0_219 = arith.constant 0 : index
    %281 = vector.load %arg4[%c1_216, %c0_217, %c0_218, %c0_219] : memref<2x4x32x8xf32, #tpu.memory_space<vmem>>, vector<1x1x32x8xf32>
    %282 = vector.shape_cast %281 : vector<1x1x32x8xf32> to vector<32x8xf32>
    %cst_220 = arith.constant dense<0.000000e+00> : vector<9x8xf32>
    %283 = tpu.matmul %272, %282, %cst_220 {dimension_numbers = #tpu.dot_dimension_numbers<[1], [0], [0], [1], [0, 0, 1, 1], [], []>} : vector<9x32xf32>, vector<32x8xf32>, vector<9x8xf32> -> vector<9x8xf32>
    %c1_221 = arith.constant 1 : index
    %c0_222 = arith.constant 0 : index
    %c0_223 = arith.constant 0 : index
    %c0_224 = arith.constant 0 : index
    %284 = vector.load %arg7[%c1_221, %c0_222, %c0_223, %c0_224] : memref<2x4x1x8xf32, #tpu.memory_space<vmem>>, vector<1x1x1x8xf32>
    %285 = vector.shape_cast %284 : vector<1x1x1x8xf32> to vector<1x8xf32>
    %286 = vector.broadcast %285 : vector<1x8xf32> to vector<9x8xf32>
    %287 = arith.addf %283, %286 : vector<9x8xf32>
    %c1_225 = arith.constant 1 : index
    %c0_226 = arith.constant 0 : index
    %c0_227 = arith.constant 0 : index
    %c0_228 = arith.constant 0 : index
    %288 = vector.load %arg5[%c1_225, %c0_226, %c0_227, %c0_228] : memref<2x4x32x8xf32, #tpu.memory_space<vmem>>, vector<1x1x32x8xf32>
    %289 = vector.shape_cast %288 : vector<1x1x32x8xf32> to vector<32x8xf32>
    %cst_229 = arith.constant dense<0.000000e+00> : vector<9x8xf32>
    %290 = tpu.matmul %272, %289, %cst_229 {dimension_numbers = #tpu.dot_dimension_numbers<[1], [0], [0], [1], [0, 0, 1, 1], [], []>} : vector<9x32xf32>, vector<32x8xf32>, vector<9x8xf32> -> vector<9x8xf32>
    %c1_230 = arith.constant 1 : index
    %c0_231 = arith.constant 0 : index
    %c0_232 = arith.constant 0 : index
    %c0_233 = arith.constant 0 : index
    %291 = vector.load %arg8[%c1_230, %c0_231, %c0_232, %c0_233] : memref<2x4x1x8xf32, #tpu.memory_space<vmem>>, vector<1x1x1x8xf32>
    %292 = vector.shape_cast %291 : vector<1x1x1x8xf32> to vector<1x8xf32>
    %293 = vector.broadcast %292 : vector<1x8xf32> to vector<9x8xf32>
    %294 = arith.addf %290, %293 : vector<9x8xf32>
    %cst_234 = arith.constant dense<0.000000e+00> : vector<9x9xf32>
    %295 = tpu.matmul %280, %287, %cst_234 {dimension_numbers = #tpu.dot_dimension_numbers<[1], [1], [0], [0], [0, 0, 1, 0], [], []>} : vector<9x8xf32>, vector<9x8xf32>, vector<9x9xf32> -> vector<9x9xf32>
    %cst_235 = arith.constant 0.353553385 : f32
    %296 = vector.broadcast %cst_235 : f32 to vector<9x9xf32>
    %297 = arith.mulf %295, %296 : vector<9x9xf32>
    %cst_236 = arith.constant dense<0xFF800000> : vector<9xf32>
    %298 = vector.multi_reduction <maximumf>, %297, %cst_236 [1] : vector<9x9xf32> to vector<9xf32>
    %299 = vector.shape_cast %298 : vector<9xf32> to vector<9x1xf32>
    %300 = vector.broadcast %299 : vector<9x1xf32> to vector<9x9xf32>
    %301 = arith.subf %297, %300 : vector<9x9xf32>
    %302 = math.exp %301 : vector<9x9xf32>
    %cst_237 = arith.constant dense<0.000000e+00> : vector<9xf32>
    %303 = vector.multi_reduction <add>, %302, %cst_237 [1] : vector<9x9xf32> to vector<9xf32>
    %304 = vector.shape_cast %303 : vector<9xf32> to vector<9x1xf32>
    %305 = tpu.reciprocal %304 {approx = true} : vector<9x1xf32> -> vector<9x1xf32>
    %306 = vector.broadcast %305 : vector<9x1xf32> to vector<9x9xf32>
    %307 = arith.mulf %302, %306 : vector<9x9xf32>
    %cst_238 = arith.constant dense<0.000000e+00> : vector<9x8xf32>
    %308 = tpu.matmul %307, %294, %cst_238 {dimension_numbers = #tpu.dot_dimension_numbers<[1], [0], [0], [1], [0, 0, 1, 1], [], []>} : vector<9x9xf32>, vector<9x8xf32>, vector<9x8xf32> -> vector<9x8xf32>
    %c1_239 = arith.constant 1 : index
    %c0_240 = arith.constant 0 : index
    %c0_241 = arith.constant 0 : index
    %c0_242 = arith.constant 0 : index
    %309 = vector.load %arg9[%c1_239, %c0_240, %c0_241, %c0_242] : memref<2x4x8x32xf32, #tpu.memory_space<vmem>>, vector<1x1x8x32xf32>
    %310 = vector.shape_cast %309 : vector<1x1x8x32xf32> to vector<8x32xf32>
    %cst_243 = arith.constant dense<0.000000e+00> : vector<9x32xf32>
    %311 = tpu.matmul %308, %310, %cst_243 {dimension_numbers = #tpu.dot_dimension_numbers<[1], [0], [0], [1], [0, 0, 1, 1], [], []>} : vector<9x8xf32>, vector<8x32xf32>, vector<9x32xf32> -> vector<9x32xf32>
    %312 = arith.addf %273, %311 : vector<9x32xf32>
    %c1_244 = arith.constant 1 : index
    %c1_245 = arith.constant 1 : index
    %c0_246 = arith.constant 0 : index
    %c0_247 = arith.constant 0 : index
    %313 = vector.load %arg3[%c1_244, %c1_245, %c0_246, %c0_247] : memref<2x4x32x8xf32, #tpu.memory_space<vmem>>, vector<1x1x32x8xf32>
    %314 = vector.shape_cast %313 : vector<1x1x32x8xf32> to vector<32x8xf32>
    %cst_248 = arith.constant dense<0.000000e+00> : vector<9x8xf32>
    %315 = tpu.matmul %272, %314, %cst_248 {dimension_numbers = #tpu.dot_dimension_numbers<[1], [0], [0], [1], [0, 0, 1, 1], [], []>} : vector<9x32xf32>, vector<32x8xf32>, vector<9x8xf32> -> vector<9x8xf32>
    %c1_249 = arith.constant 1 : index
    %c1_250 = arith.constant 1 : index
    %c0_251 = arith.constant 0 : index
    %c0_252 = arith.constant 0 : index
    %316 = vector.load %arg6[%c1_249, %c1_250, %c0_251, %c0_252] : memref<2x4x1x8xf32, #tpu.memory_space<vmem>>, vector<1x1x1x8xf32>
    %317 = vector.shape_cast %316 : vector<1x1x1x8xf32> to vector<1x8xf32>
    %318 = vector.broadcast %317 : vector<1x8xf32> to vector<9x8xf32>
    %319 = arith.addf %315, %318 : vector<9x8xf32>
    %c1_253 = arith.constant 1 : index
    %c1_254 = arith.constant 1 : index
    %c0_255 = arith.constant 0 : index
    %c0_256 = arith.constant 0 : index
    %320 = vector.load %arg4[%c1_253, %c1_254, %c0_255, %c0_256] : memref<2x4x32x8xf32, #tpu.memory_space<vmem>>, vector<1x1x32x8xf32>
    %321 = vector.shape_cast %320 : vector<1x1x32x8xf32> to vector<32x8xf32>
    %cst_257 = arith.constant dense<0.000000e+00> : vector<9x8xf32>
    %322 = tpu.matmul %272, %321, %cst_257 {dimension_numbers = #tpu.dot_dimension_numbers<[1], [0], [0], [1], [0, 0, 1, 1], [], []>} : vector<9x32xf32>, vector<32x8xf32>, vector<9x8xf32> -> vector<9x8xf32>
    %c1_258 = arith.constant 1 : index
    %c1_259 = arith.constant 1 : index
    %c0_260 = arith.constant 0 : index
    %c0_261 = arith.constant 0 : index
    %323 = vector.load %arg7[%c1_258, %c1_259, %c0_260, %c0_261] : memref<2x4x1x8xf32, #tpu.memory_space<vmem>>, vector<1x1x1x8xf32>
    %324 = vector.shape_cast %323 : vector<1x1x1x8xf32> to vector<1x8xf32>
    %325 = vector.broadcast %324 : vector<1x8xf32> to vector<9x8xf32>
    %326 = arith.addf %322, %325 : vector<9x8xf32>
    %c1_262 = arith.constant 1 : index
    %c1_263 = arith.constant 1 : index
    %c0_264 = arith.constant 0 : index
    %c0_265 = arith.constant 0 : index
    %327 = vector.load %arg5[%c1_262, %c1_263, %c0_264, %c0_265] : memref<2x4x32x8xf32, #tpu.memory_space<vmem>>, vector<1x1x32x8xf32>
    %328 = vector.shape_cast %327 : vector<1x1x32x8xf32> to vector<32x8xf32>
    %cst_266 = arith.constant dense<0.000000e+00> : vector<9x8xf32>
    %329 = tpu.matmul %272, %328, %cst_266 {dimension_numbers = #tpu.dot_dimension_numbers<[1], [0], [0], [1], [0, 0, 1, 1], [], []>} : vector<9x32xf32>, vector<32x8xf32>, vector<9x8xf32> -> vector<9x8xf32>
    %c1_267 = arith.constant 1 : index
    %c1_268 = arith.constant 1 : index
    %c0_269 = arith.constant 0 : index
    %c0_270 = arith.constant 0 : index
    %330 = vector.load %arg8[%c1_267, %c1_268, %c0_269, %c0_270] : memref<2x4x1x8xf32, #tpu.memory_space<vmem>>, vector<1x1x1x8xf32>
    %331 = vector.shape_cast %330 : vector<1x1x1x8xf32> to vector<1x8xf32>
    %332 = vector.broadcast %331 : vector<1x8xf32> to vector<9x8xf32>
    %333 = arith.addf %329, %332 : vector<9x8xf32>
    %cst_271 = arith.constant dense<0.000000e+00> : vector<9x9xf32>
    %334 = tpu.matmul %319, %326, %cst_271 {dimension_numbers = #tpu.dot_dimension_numbers<[1], [1], [0], [0], [0, 0, 1, 0], [], []>} : vector<9x8xf32>, vector<9x8xf32>, vector<9x9xf32> -> vector<9x9xf32>
    %cst_272 = arith.constant 0.353553385 : f32
    %335 = vector.broadcast %cst_272 : f32 to vector<9x9xf32>
    %336 = arith.mulf %334, %335 : vector<9x9xf32>
    %cst_273 = arith.constant dense<0xFF800000> : vector<9xf32>
    %337 = vector.multi_reduction <maximumf>, %336, %cst_273 [1] : vector<9x9xf32> to vector<9xf32>
    %338 = vector.shape_cast %337 : vector<9xf32> to vector<9x1xf32>
    %339 = vector.broadcast %338 : vector<9x1xf32> to vector<9x9xf32>
    %340 = arith.subf %336, %339 : vector<9x9xf32>
    %341 = math.exp %340 : vector<9x9xf32>
    %cst_274 = arith.constant dense<0.000000e+00> : vector<9xf32>
    %342 = vector.multi_reduction <add>, %341, %cst_274 [1] : vector<9x9xf32> to vector<9xf32>
    %343 = vector.shape_cast %342 : vector<9xf32> to vector<9x1xf32>
    %344 = tpu.reciprocal %343 {approx = true} : vector<9x1xf32> -> vector<9x1xf32>
    %345 = vector.broadcast %344 : vector<9x1xf32> to vector<9x9xf32>
    %346 = arith.mulf %341, %345 : vector<9x9xf32>
    %cst_275 = arith.constant dense<0.000000e+00> : vector<9x8xf32>
    %347 = tpu.matmul %346, %333, %cst_275 {dimension_numbers = #tpu.dot_dimension_numbers<[1], [0], [0], [1], [0, 0, 1, 1], [], []>} : vector<9x9xf32>, vector<9x8xf32>, vector<9x8xf32> -> vector<9x8xf32>
    %c1_276 = arith.constant 1 : index
    %c1_277 = arith.constant 1 : index
    %c0_278 = arith.constant 0 : index
    %c0_279 = arith.constant 0 : index
    %348 = vector.load %arg9[%c1_276, %c1_277, %c0_278, %c0_279] : memref<2x4x8x32xf32, #tpu.memory_space<vmem>>, vector<1x1x8x32xf32>
    %349 = vector.shape_cast %348 : vector<1x1x8x32xf32> to vector<8x32xf32>
    %cst_280 = arith.constant dense<0.000000e+00> : vector<9x32xf32>
    %350 = tpu.matmul %347, %349, %cst_280 {dimension_numbers = #tpu.dot_dimension_numbers<[1], [0], [0], [1], [0, 0, 1, 1], [], []>} : vector<9x8xf32>, vector<8x32xf32>, vector<9x32xf32> -> vector<9x32xf32>
    %351 = arith.addf %312, %350 : vector<9x32xf32>
    %c1_281 = arith.constant 1 : index
    %c2_282 = arith.constant 2 : index
    %c0_283 = arith.constant 0 : index
    %c0_284 = arith.constant 0 : index
    %352 = vector.load %arg3[%c1_281, %c2_282, %c0_283, %c0_284] : memref<2x4x32x8xf32, #tpu.memory_space<vmem>>, vector<1x1x32x8xf32>
    %353 = vector.shape_cast %352 : vector<1x1x32x8xf32> to vector<32x8xf32>
    %cst_285 = arith.constant dense<0.000000e+00> : vector<9x8xf32>
    %354 = tpu.matmul %272, %353, %cst_285 {dimension_numbers = #tpu.dot_dimension_numbers<[1], [0], [0], [1], [0, 0, 1, 1], [], []>} : vector<9x32xf32>, vector<32x8xf32>, vector<9x8xf32> -> vector<9x8xf32>
    %c1_286 = arith.constant 1 : index
    %c2_287 = arith.constant 2 : index
    %c0_288 = arith.constant 0 : index
    %c0_289 = arith.constant 0 : index
    %355 = vector.load %arg6[%c1_286, %c2_287, %c0_288, %c0_289] : memref<2x4x1x8xf32, #tpu.memory_space<vmem>>, vector<1x1x1x8xf32>
    %356 = vector.shape_cast %355 : vector<1x1x1x8xf32> to vector<1x8xf32>
    %357 = vector.broadcast %356 : vector<1x8xf32> to vector<9x8xf32>
    %358 = arith.addf %354, %357 : vector<9x8xf32>
    %c1_290 = arith.constant 1 : index
    %c2_291 = arith.constant 2 : index
    %c0_292 = arith.constant 0 : index
    %c0_293 = arith.constant 0 : index
    %359 = vector.load %arg4[%c1_290, %c2_291, %c0_292, %c0_293] : memref<2x4x32x8xf32, #tpu.memory_space<vmem>>, vector<1x1x32x8xf32>
    %360 = vector.shape_cast %359 : vector<1x1x32x8xf32> to vector<32x8xf32>
    %cst_294 = arith.constant dense<0.000000e+00> : vector<9x8xf32>
    %361 = tpu.matmul %272, %360, %cst_294 {dimension_numbers = #tpu.dot_dimension_numbers<[1], [0], [0], [1], [0, 0, 1, 1], [], []>} : vector<9x32xf32>, vector<32x8xf32>, vector<9x8xf32> -> vector<9x8xf32>
    %c1_295 = arith.constant 1 : index
    %c2_296 = arith.constant 2 : index
    %c0_297 = arith.constant 0 : index
    %c0_298 = arith.constant 0 : index
    %362 = vector.load %arg7[%c1_295, %c2_296, %c0_297, %c0_298] : memref<2x4x1x8xf32, #tpu.memory_space<vmem>>, vector<1x1x1x8xf32>
    %363 = vector.shape_cast %362 : vector<1x1x1x8xf32> to vector<1x8xf32>
    %364 = vector.broadcast %363 : vector<1x8xf32> to vector<9x8xf32>
    %365 = arith.addf %361, %364 : vector<9x8xf32>
    %c1_299 = arith.constant 1 : index
    %c2_300 = arith.constant 2 : index
    %c0_301 = arith.constant 0 : index
    %c0_302 = arith.constant 0 : index
    %366 = vector.load %arg5[%c1_299, %c2_300, %c0_301, %c0_302] : memref<2x4x32x8xf32, #tpu.memory_space<vmem>>, vector<1x1x32x8xf32>
    %367 = vector.shape_cast %366 : vector<1x1x32x8xf32> to vector<32x8xf32>
    %cst_303 = arith.constant dense<0.000000e+00> : vector<9x8xf32>
    %368 = tpu.matmul %272, %367, %cst_303 {dimension_numbers = #tpu.dot_dimension_numbers<[1], [0], [0], [1], [0, 0, 1, 1], [], []>} : vector<9x32xf32>, vector<32x8xf32>, vector<9x8xf32> -> vector<9x8xf32>
    %c1_304 = arith.constant 1 : index
    %c2_305 = arith.constant 2 : index
    %c0_306 = arith.constant 0 : index
    %c0_307 = arith.constant 0 : index
    %369 = vector.load %arg8[%c1_304, %c2_305, %c0_306, %c0_307] : memref<2x4x1x8xf32, #tpu.memory_space<vmem>>, vector<1x1x1x8xf32>
    %370 = vector.shape_cast %369 : vector<1x1x1x8xf32> to vector<1x8xf32>
    %371 = vector.broadcast %370 : vector<1x8xf32> to vector<9x8xf32>
    %372 = arith.addf %368, %371 : vector<9x8xf32>
    %cst_308 = arith.constant dense<0.000000e+00> : vector<9x9xf32>
    %373 = tpu.matmul %358, %365, %cst_308 {dimension_numbers = #tpu.dot_dimension_numbers<[1], [1], [0], [0], [0, 0, 1, 0], [], []>} : vector<9x8xf32>, vector<9x8xf32>, vector<9x9xf32> -> vector<9x9xf32>
    %cst_309 = arith.constant 0.353553385 : f32
    %374 = vector.broadcast %cst_309 : f32 to vector<9x9xf32>
    %375 = arith.mulf %373, %374 : vector<9x9xf32>
    %cst_310 = arith.constant dense<0xFF800000> : vector<9xf32>
    %376 = vector.multi_reduction <maximumf>, %375, %cst_310 [1] : vector<9x9xf32> to vector<9xf32>
    %377 = vector.shape_cast %376 : vector<9xf32> to vector<9x1xf32>
    %378 = vector.broadcast %377 : vector<9x1xf32> to vector<9x9xf32>
    %379 = arith.subf %375, %378 : vector<9x9xf32>
    %380 = math.exp %379 : vector<9x9xf32>
    %cst_311 = arith.constant dense<0.000000e+00> : vector<9xf32>
    %381 = vector.multi_reduction <add>, %380, %cst_311 [1] : vector<9x9xf32> to vector<9xf32>
    %382 = vector.shape_cast %381 : vector<9xf32> to vector<9x1xf32>
    %383 = tpu.reciprocal %382 {approx = true} : vector<9x1xf32> -> vector<9x1xf32>
    %384 = vector.broadcast %383 : vector<9x1xf32> to vector<9x9xf32>
    %385 = arith.mulf %380, %384 : vector<9x9xf32>
    %cst_312 = arith.constant dense<0.000000e+00> : vector<9x8xf32>
    %386 = tpu.matmul %385, %372, %cst_312 {dimension_numbers = #tpu.dot_dimension_numbers<[1], [0], [0], [1], [0, 0, 1, 1], [], []>} : vector<9x9xf32>, vector<9x8xf32>, vector<9x8xf32> -> vector<9x8xf32>
    %c1_313 = arith.constant 1 : index
    %c2_314 = arith.constant 2 : index
    %c0_315 = arith.constant 0 : index
    %c0_316 = arith.constant 0 : index
    %387 = vector.load %arg9[%c1_313, %c2_314, %c0_315, %c0_316] : memref<2x4x8x32xf32, #tpu.memory_space<vmem>>, vector<1x1x8x32xf32>
    %388 = vector.shape_cast %387 : vector<1x1x8x32xf32> to vector<8x32xf32>
    %cst_317 = arith.constant dense<0.000000e+00> : vector<9x32xf32>
    %389 = tpu.matmul %386, %388, %cst_317 {dimension_numbers = #tpu.dot_dimension_numbers<[1], [0], [0], [1], [0, 0, 1, 1], [], []>} : vector<9x8xf32>, vector<8x32xf32>, vector<9x32xf32> -> vector<9x32xf32>
    %390 = arith.addf %351, %389 : vector<9x32xf32>
    %c1_318 = arith.constant 1 : index
    %c3_319 = arith.constant 3 : index
    %c0_320 = arith.constant 0 : index
    %c0_321 = arith.constant 0 : index
    %391 = vector.load %arg3[%c1_318, %c3_319, %c0_320, %c0_321] : memref<2x4x32x8xf32, #tpu.memory_space<vmem>>, vector<1x1x32x8xf32>
    %392 = vector.shape_cast %391 : vector<1x1x32x8xf32> to vector<32x8xf32>
    %cst_322 = arith.constant dense<0.000000e+00> : vector<9x8xf32>
    %393 = tpu.matmul %272, %392, %cst_322 {dimension_numbers = #tpu.dot_dimension_numbers<[1], [0], [0], [1], [0, 0, 1, 1], [], []>} : vector<9x32xf32>, vector<32x8xf32>, vector<9x8xf32> -> vector<9x8xf32>
    %c1_323 = arith.constant 1 : index
    %c3_324 = arith.constant 3 : index
    %c0_325 = arith.constant 0 : index
    %c0_326 = arith.constant 0 : index
    %394 = vector.load %arg6[%c1_323, %c3_324, %c0_325, %c0_326] : memref<2x4x1x8xf32, #tpu.memory_space<vmem>>, vector<1x1x1x8xf32>
    %395 = vector.shape_cast %394 : vector<1x1x1x8xf32> to vector<1x8xf32>
    %396 = vector.broadcast %395 : vector<1x8xf32> to vector<9x8xf32>
    %397 = arith.addf %393, %396 : vector<9x8xf32>
    %c1_327 = arith.constant 1 : index
    %c3_328 = arith.constant 3 : index
    %c0_329 = arith.constant 0 : index
    %c0_330 = arith.constant 0 : index
    %398 = vector.load %arg4[%c1_327, %c3_328, %c0_329, %c0_330] : memref<2x4x32x8xf32, #tpu.memory_space<vmem>>, vector<1x1x32x8xf32>
    %399 = vector.shape_cast %398 : vector<1x1x32x8xf32> to vector<32x8xf32>
    %cst_331 = arith.constant dense<0.000000e+00> : vector<9x8xf32>
    %400 = tpu.matmul %272, %399, %cst_331 {dimension_numbers = #tpu.dot_dimension_numbers<[1], [0], [0], [1], [0, 0, 1, 1], [], []>} : vector<9x32xf32>, vector<32x8xf32>, vector<9x8xf32> -> vector<9x8xf32>
    %c1_332 = arith.constant 1 : index
    %c3_333 = arith.constant 3 : index
    %c0_334 = arith.constant 0 : index
    %c0_335 = arith.constant 0 : index
    %401 = vector.load %arg7[%c1_332, %c3_333, %c0_334, %c0_335] : memref<2x4x1x8xf32, #tpu.memory_space<vmem>>, vector<1x1x1x8xf32>
    %402 = vector.shape_cast %401 : vector<1x1x1x8xf32> to vector<1x8xf32>
    %403 = vector.broadcast %402 : vector<1x8xf32> to vector<9x8xf32>
    %404 = arith.addf %400, %403 : vector<9x8xf32>
    %c1_336 = arith.constant 1 : index
    %c3_337 = arith.constant 3 : index
    %c0_338 = arith.constant 0 : index
    %c0_339 = arith.constant 0 : index
    %405 = vector.load %arg5[%c1_336, %c3_337, %c0_338, %c0_339] : memref<2x4x32x8xf32, #tpu.memory_space<vmem>>, vector<1x1x32x8xf32>
    %406 = vector.shape_cast %405 : vector<1x1x32x8xf32> to vector<32x8xf32>
    %cst_340 = arith.constant dense<0.000000e+00> : vector<9x8xf32>
    %407 = tpu.matmul %272, %406, %cst_340 {dimension_numbers = #tpu.dot_dimension_numbers<[1], [0], [0], [1], [0, 0, 1, 1], [], []>} : vector<9x32xf32>, vector<32x8xf32>, vector<9x8xf32> -> vector<9x8xf32>
    %c1_341 = arith.constant 1 : index
    %c3_342 = arith.constant 3 : index
    %c0_343 = arith.constant 0 : index
    %c0_344 = arith.constant 0 : index
    %408 = vector.load %arg8[%c1_341, %c3_342, %c0_343, %c0_344] : memref<2x4x1x8xf32, #tpu.memory_space<vmem>>, vector<1x1x1x8xf32>
    %409 = vector.shape_cast %408 : vector<1x1x1x8xf32> to vector<1x8xf32>
    %410 = vector.broadcast %409 : vector<1x8xf32> to vector<9x8xf32>
    %411 = arith.addf %407, %410 : vector<9x8xf32>
    %cst_345 = arith.constant dense<0.000000e+00> : vector<9x9xf32>
    %412 = tpu.matmul %397, %404, %cst_345 {dimension_numbers = #tpu.dot_dimension_numbers<[1], [1], [0], [0], [0, 0, 1, 0], [], []>} : vector<9x8xf32>, vector<9x8xf32>, vector<9x9xf32> -> vector<9x9xf32>
    %cst_346 = arith.constant 0.353553385 : f32
    %413 = vector.broadcast %cst_346 : f32 to vector<9x9xf32>
    %414 = arith.mulf %412, %413 : vector<9x9xf32>
    %cst_347 = arith.constant dense<0xFF800000> : vector<9xf32>
    %415 = vector.multi_reduction <maximumf>, %414, %cst_347 [1] : vector<9x9xf32> to vector<9xf32>
    %416 = vector.shape_cast %415 : vector<9xf32> to vector<9x1xf32>
    %417 = vector.broadcast %416 : vector<9x1xf32> to vector<9x9xf32>
    %418 = arith.subf %414, %417 : vector<9x9xf32>
    %419 = math.exp %418 : vector<9x9xf32>
    %cst_348 = arith.constant dense<0.000000e+00> : vector<9xf32>
    %420 = vector.multi_reduction <add>, %419, %cst_348 [1] : vector<9x9xf32> to vector<9xf32>
    %421 = vector.shape_cast %420 : vector<9xf32> to vector<9x1xf32>
    %422 = tpu.reciprocal %421 {approx = true} : vector<9x1xf32> -> vector<9x1xf32>
    %423 = vector.broadcast %422 : vector<9x1xf32> to vector<9x9xf32>
    %424 = arith.mulf %419, %423 : vector<9x9xf32>
    %cst_349 = arith.constant dense<0.000000e+00> : vector<9x8xf32>
    %425 = tpu.matmul %424, %411, %cst_349 {dimension_numbers = #tpu.dot_dimension_numbers<[1], [0], [0], [1], [0, 0, 1, 1], [], []>} : vector<9x9xf32>, vector<9x8xf32>, vector<9x8xf32> -> vector<9x8xf32>
    %c1_350 = arith.constant 1 : index
    %c3_351 = arith.constant 3 : index
    %c0_352 = arith.constant 0 : index
    %c0_353 = arith.constant 0 : index
    %426 = vector.load %arg9[%c1_350, %c3_351, %c0_352, %c0_353] : memref<2x4x8x32xf32, #tpu.memory_space<vmem>>, vector<1x1x8x32xf32>
    %427 = vector.shape_cast %426 : vector<1x1x8x32xf32> to vector<8x32xf32>
    %cst_354 = arith.constant dense<0.000000e+00> : vector<9x32xf32>
    %428 = tpu.matmul %425, %427, %cst_354 {dimension_numbers = #tpu.dot_dimension_numbers<[1], [0], [0], [1], [0, 0, 1, 1], [], []>} : vector<9x8xf32>, vector<8x32xf32>, vector<9x32xf32> -> vector<9x32xf32>
    %429 = arith.addf %390, %428 : vector<9x32xf32>
    %c1_355 = arith.constant 1 : index
    %c0_356 = arith.constant 0 : index
    %c0_357 = arith.constant 0 : index
    %430 = vector.load %arg10[%c1_355, %c0_356, %c0_357] : memref<2x1x32xf32, #tpu.memory_space<vmem>>, vector<1x1x32xf32>
    %431 = vector.shape_cast %430 : vector<1x1x32xf32> to vector<1x32xf32>
    %432 = vector.broadcast %431 : vector<1x32xf32> to vector<9x32xf32>
    %433 = arith.addf %429, %432 : vector<9x32xf32>
    %434 = arith.addf %272, %433 : vector<9x32xf32>
    %c1_358 = arith.constant 1 : index
    %c0_359 = arith.constant 0 : index
    %c0_360 = arith.constant 0 : index
    %435 = vector.load %arg11[%c1_358, %c0_359, %c0_360] : memref<2x1x32xf32, #tpu.memory_space<vmem>>, vector<1x1x32xf32>
    %436 = vector.shape_cast %435 : vector<1x1x32xf32> to vector<1x32xf32>
    %c1_361 = arith.constant 1 : index
    %c0_362 = arith.constant 0 : index
    %c0_363 = arith.constant 0 : index
    %437 = vector.load %arg12[%c1_361, %c0_362, %c0_363] : memref<2x1x32xf32, #tpu.memory_space<vmem>>, vector<1x1x32xf32>
    %438 = vector.shape_cast %437 : vector<1x1x32xf32> to vector<1x32xf32>
    %cst_364 = arith.constant dense<0.000000e+00> : vector<9xf32>
    %439 = vector.multi_reduction <add>, %434, %cst_364 [1] : vector<9x32xf32> to vector<9xf32>
    %440 = vector.shape_cast %439 : vector<9xf32> to vector<9x1xf32>
    %cst_365 = arith.constant 3.200000e+01 : f32
    %441 = vector.broadcast %cst_365 : f32 to vector<9x1xf32>
    %442 = arith.divf %440, %441 : vector<9x1xf32>
    %443 = vector.broadcast %442 : vector<9x1xf32> to vector<9x32xf32>
    %444 = arith.subf %434, %443 : vector<9x32xf32>
    %445 = arith.mulf %444, %444 : vector<9x32xf32>
    %cst_366 = arith.constant dense<0.000000e+00> : vector<9xf32>
    %446 = vector.multi_reduction <add>, %445, %cst_366 [1] : vector<9x32xf32> to vector<9xf32>
    %447 = vector.shape_cast %446 : vector<9xf32> to vector<9x1xf32>
    %cst_367 = arith.constant 3.200000e+01 : f32
    %448 = vector.broadcast %cst_367 : f32 to vector<9x1xf32>
    %449 = arith.divf %447, %448 : vector<9x1xf32>
    %cst_368 = arith.constant 9.99999974E-6 : f32
    %450 = vector.broadcast %cst_368 : f32 to vector<9x1xf32>
    %451 = arith.addf %449, %450 : vector<9x1xf32>
    %452 = math.rsqrt %451 : vector<9x1xf32>
    %453 = vector.broadcast %452 : vector<9x1xf32> to vector<9x32xf32>
    %454 = arith.mulf %444, %453 : vector<9x32xf32>
    %455 = vector.broadcast %436 : vector<1x32xf32> to vector<9x32xf32>
    %456 = arith.mulf %454, %455 : vector<9x32xf32>
    %457 = vector.broadcast %438 : vector<1x32xf32> to vector<9x32xf32>
    %458 = arith.addf %456, %457 : vector<9x32xf32>
    %c1_369 = arith.constant 1 : index
    %c0_370 = arith.constant 0 : index
    %c0_371 = arith.constant 0 : index
    %459 = vector.load %arg13[%c1_369, %c0_370, %c0_371] : memref<2x32x64xf32, #tpu.memory_space<vmem>>, vector<1x32x64xf32>
    %460 = vector.shape_cast %459 : vector<1x32x64xf32> to vector<32x64xf32>
    %cst_372 = arith.constant dense<0.000000e+00> : vector<9x64xf32>
    %461 = tpu.matmul %458, %460, %cst_372 {dimension_numbers = #tpu.dot_dimension_numbers<[1], [0], [0], [1], [0, 0, 1, 1], [], []>} : vector<9x32xf32>, vector<32x64xf32>, vector<9x64xf32> -> vector<9x64xf32>
    %c1_373 = arith.constant 1 : index
    %c0_374 = arith.constant 0 : index
    %c0_375 = arith.constant 0 : index
    %462 = vector.load %arg14[%c1_373, %c0_374, %c0_375] : memref<2x1x64xf32, #tpu.memory_space<vmem>>, vector<1x1x64xf32>
    %463 = vector.shape_cast %462 : vector<1x1x64xf32> to vector<1x64xf32>
    %464 = vector.broadcast %463 : vector<1x64xf32> to vector<9x64xf32>
    %465 = arith.addf %461, %464 : vector<9x64xf32>
    %cst_376 = arith.constant 5.000000e-01 : f32
    %466 = vector.broadcast %cst_376 : f32 to vector<9x64xf32>
    %467 = arith.mulf %466, %465 : vector<9x64xf32>
    %cst_377 = arith.constant 0.707106769 : f32
    %468 = vector.broadcast %cst_377 : f32 to vector<9x64xf32>
    %469 = arith.mulf %465, %468 : vector<9x64xf32>
    %cst_378 = arith.constant 0.000000e+00 : f32
    %470 = vector.broadcast %cst_378 : f32 to vector<9x64xf32>
    %471 = arith.cmpf oge, %469, %470 : vector<9x64xf32>
    %cst_379 = arith.constant 1.000000e+00 : f32
    %cst_380 = arith.constant -1.000000e+00 : f32
    %472 = vector.broadcast %cst_379 : f32 to vector<9x64xf32>
    %473 = vector.broadcast %cst_380 : f32 to vector<9x64xf32>
    %474 = arith.select %471, %472, %473 : vector<9x64xi1>, vector<9x64xf32>
    %475 = math.absf %469 : vector<9x64xf32>
    %cst_381 = arith.constant 0.327591091 : f32
    %476 = vector.broadcast %cst_381 : f32 to vector<9x64xf32>
    %477 = arith.mulf %476, %475 : vector<9x64xf32>
    %cst_382 = arith.constant 1.000000e+00 : f32
    %478 = vector.broadcast %cst_382 : f32 to vector<9x64xf32>
    %479 = arith.addf %478, %477 : vector<9x64xf32>
    %cst_383 = arith.constant 1.000000e+00 : f32
    %480 = vector.broadcast %cst_383 : f32 to vector<9x64xf32>
    %481 = arith.divf %480, %479 : vector<9x64xf32>
    %cst_384 = arith.constant 1.06140542 : f32
    %482 = vector.broadcast %cst_384 : f32 to vector<9x64xf32>
    %483 = arith.mulf %482, %481 : vector<9x64xf32>
    %cst_385 = arith.constant -1.45315206 : f32
    %484 = vector.broadcast %cst_385 : f32 to vector<9x64xf32>
    %485 = arith.addf %483, %484 : vector<9x64xf32>
    %486 = arith.mulf %485, %481 : vector<9x64xf32>
    %cst_386 = arith.constant 1.42141378 : f32
    %487 = vector.broadcast %cst_386 : f32 to vector<9x64xf32>
    %488 = arith.addf %486, %487 : vector<9x64xf32>
    %489 = arith.mulf %488, %481 : vector<9x64xf32>
    %cst_387 = arith.constant -0.284496725 : f32
    %490 = vector.broadcast %cst_387 : f32 to vector<9x64xf32>
    %491 = arith.addf %489, %490 : vector<9x64xf32>
    %492 = arith.mulf %491, %481 : vector<9x64xf32>
    %cst_388 = arith.constant 0.254829586 : f32
    %493 = vector.broadcast %cst_388 : f32 to vector<9x64xf32>
    %494 = arith.addf %492, %493 : vector<9x64xf32>
    %495 = arith.mulf %494, %481 : vector<9x64xf32>
    %cst_389 = arith.constant 0.000000e+00 : f32
    %496 = vector.broadcast %cst_389 : f32 to vector<9x64xf32>
    %497 = arith.subf %496, %475 : vector<9x64xf32>
    %498 = arith.mulf %497, %475 : vector<9x64xf32>
    %499 = math.exp %498 : vector<9x64xf32>
    %500 = arith.mulf %495, %499 : vector<9x64xf32>
    %cst_390 = arith.constant 1.000000e+00 : f32
    %501 = vector.broadcast %cst_390 : f32 to vector<9x64xf32>
    %502 = arith.subf %501, %500 : vector<9x64xf32>
    %503 = arith.mulf %474, %502 : vector<9x64xf32>
    %cst_391 = arith.constant 1.000000e+00 : f32
    %504 = vector.broadcast %cst_391 : f32 to vector<9x64xf32>
    %505 = arith.addf %504, %503 : vector<9x64xf32>
    %506 = arith.mulf %467, %505 : vector<9x64xf32>
    %c1_392 = arith.constant 1 : index
    %c0_393 = arith.constant 0 : index
    %c0_394 = arith.constant 0 : index
    %507 = vector.load %arg15[%c1_392, %c0_393, %c0_394] : memref<2x64x32xf32, #tpu.memory_space<vmem>>, vector<1x64x32xf32>
    %508 = vector.shape_cast %507 : vector<1x64x32xf32> to vector<64x32xf32>
    %cst_395 = arith.constant dense<0.000000e+00> : vector<9x32xf32>
    %509 = tpu.matmul %506, %508, %cst_395 {dimension_numbers = #tpu.dot_dimension_numbers<[1], [0], [0], [1], [0, 0, 1, 1], [], []>} : vector<9x64xf32>, vector<64x32xf32>, vector<9x32xf32> -> vector<9x32xf32>
    %c1_396 = arith.constant 1 : index
    %c0_397 = arith.constant 0 : index
    %c0_398 = arith.constant 0 : index
    %510 = vector.load %arg16[%c1_396, %c0_397, %c0_398] : memref<2x1x32xf32, #tpu.memory_space<vmem>>, vector<1x1x32xf32>
    %511 = vector.shape_cast %510 : vector<1x1x32xf32> to vector<1x32xf32>
    %512 = vector.broadcast %511 : vector<1x32xf32> to vector<9x32xf32>
    %513 = arith.addf %509, %512 : vector<9x32xf32>
    %514 = arith.addf %458, %513 : vector<9x32xf32>
    %c1_399 = arith.constant 1 : index
    %c0_400 = arith.constant 0 : index
    %c0_401 = arith.constant 0 : index
    %515 = vector.load %arg17[%c1_399, %c0_400, %c0_401] : memref<2x1x32xf32, #tpu.memory_space<vmem>>, vector<1x1x32xf32>
    %516 = vector.shape_cast %515 : vector<1x1x32xf32> to vector<1x32xf32>
    %c1_402 = arith.constant 1 : index
    %c0_403 = arith.constant 0 : index
    %c0_404 = arith.constant 0 : index
    %517 = vector.load %arg18[%c1_402, %c0_403, %c0_404] : memref<2x1x32xf32, #tpu.memory_space<vmem>>, vector<1x1x32xf32>
    %518 = vector.shape_cast %517 : vector<1x1x32xf32> to vector<1x32xf32>
    %cst_405 = arith.constant dense<0.000000e+00> : vector<9xf32>
    %519 = vector.multi_reduction <add>, %514, %cst_405 [1] : vector<9x32xf32> to vector<9xf32>
    %520 = vector.shape_cast %519 : vector<9xf32> to vector<9x1xf32>
    %cst_406 = arith.constant 3.200000e+01 : f32
    %521 = vector.broadcast %cst_406 : f32 to vector<9x1xf32>
    %522 = arith.divf %520, %521 : vector<9x1xf32>
    %523 = vector.broadcast %522 : vector<9x1xf32> to vector<9x32xf32>
    %524 = arith.subf %514, %523 : vector<9x32xf32>
    %525 = arith.mulf %524, %524 : vector<9x32xf32>
    %cst_407 = arith.constant dense<0.000000e+00> : vector<9xf32>
    %526 = vector.multi_reduction <add>, %525, %cst_407 [1] : vector<9x32xf32> to vector<9xf32>
    %527 = vector.shape_cast %526 : vector<9xf32> to vector<9x1xf32>
    %cst_408 = arith.constant 3.200000e+01 : f32
    %528 = vector.broadcast %cst_408 : f32 to vector<9x1xf32>
    %529 = arith.divf %527, %528 : vector<9x1xf32>
    %cst_409 = arith.constant 9.99999974E-6 : f32
    %530 = vector.broadcast %cst_409 : f32 to vector<9x1xf32>
    %531 = arith.addf %529, %530 : vector<9x1xf32>
    %532 = math.rsqrt %531 : vector<9x1xf32>
    %533 = vector.broadcast %532 : vector<9x1xf32> to vector<9x32xf32>
    %534 = arith.mulf %524, %533 : vector<9x32xf32>
    %535 = vector.broadcast %516 : vector<1x32xf32> to vector<9x32xf32>
    %536 = arith.mulf %534, %535 : vector<9x32xf32>
    %537 = vector.broadcast %518 : vector<1x32xf32> to vector<9x32xf32>
    %538 = arith.addf %536, %537 : vector<9x32xf32>
    %539 = vector.extract_strided_slice %538 {offsets = [0, 0], sizes = [1, 32], strides = [1, 1]} : vector<9x32xf32> to vector<1x32xf32>
    %c0_410 = arith.constant 0 : index
    %c0_411 = arith.constant 0 : index
    %540 = vector.load %arg19[%c0_410, %c0_411] : memref<32x64xf32, #tpu.memory_space<vmem>>, vector<32x64xf32>
    %cst_412 = arith.constant dense<0.000000e+00> : vector<1x64xf32>
    %541 = tpu.matmul %539, %540, %cst_412 {dimension_numbers = #tpu.dot_dimension_numbers<[1], [0], [0], [1], [0, 0, 1, 1], [], []>} : vector<1x32xf32>, vector<32x64xf32>, vector<1x64xf32> -> vector<1x64xf32>
    %c0_413 = arith.constant 0 : index
    %c0_414 = arith.constant 0 : index
    %542 = vector.load %arg20[%c0_413, %c0_414] : memref<1x64xf32, #tpu.memory_space<vmem>>, vector<1x64xf32>
    %543 = arith.addf %541, %542 : vector<1x64xf32>
    %cst_415 = arith.constant 0.000000e+00 : f32
    %544 = vector.broadcast %cst_415 : f32 to vector<1x64xf32>
    %545 = arith.maximumf %543, %544 : vector<1x64xf32>
    %c0_416 = arith.constant 0 : index
    %c0_417 = arith.constant 0 : index
    %546 = vector.load %arg21[%c0_416, %c0_417] : memref<64x128xf32, #tpu.memory_space<vmem>>, vector<64x128xf32>
    %cst_418 = arith.constant dense<0.000000e+00> : vector<1x128xf32>
    %547 = tpu.matmul %545, %546, %cst_418 {dimension_numbers = #tpu.dot_dimension_numbers<[1], [0], [0], [1], [0, 0, 1, 1], [], []>} : vector<1x64xf32>, vector<64x128xf32>, vector<1x128xf32> -> vector<1x128xf32>
    %c0_419 = arith.constant 0 : index
    %c0_420 = arith.constant 0 : index
    %548 = vector.load %arg22[%c0_419, %c0_420] : memref<1x128xf32, #tpu.memory_space<vmem>>, vector<1x128xf32>
    %549 = arith.addf %547, %548 : vector<1x128xf32>
    %c0_421 = arith.constant 0 : index
    %c0_422 = arith.constant 0 : index
    %c0_423 = arith.constant 0 : index
    %550 = vector.load %arg23[%c0_421, %c0_422, %c0_423] : memref<1x1x128xf32, #tpu.memory_space<vmem>>, vector<1x1x128xf32>
    %551 = vector.shape_cast %550 : vector<1x1x128xf32> to vector<1x128xf32>
    %552 = vector.shape_cast %549 : vector<1x128xf32> to vector<1x1x128xf32>
    tpu.vector_store %arg23[%c0_421, %c0_422, %c0_423], %552 {strides = array<i32>} : memref<1x1x128xf32, #tpu.memory_space<vmem>>, vector<1x1x128xf32>,
    return
  }
  func.func @transform_0(%arg0: i32) -> (i32, i32, i32) {
    %c0_i32 = arith.constant 0 : i32
    %c0_i32_0 = arith.constant 0 : i32
    %c0_i32_1 = arith.constant 0 : i32
    return %arg0, %c0_i32, %c0_i32_0 : i32, i32, i32
  }
  func.func @transform_1(%arg0: i32) -> (i32, i32, i32) {
    %c0_i32 = arith.constant 0 : i32
    %c0_i32_0 = arith.constant 0 : i32
    %c0_i32_1 = arith.constant 0 : i32
    %c0_i32_2 = arith.constant 0 : i32
    return %c0_i32, %c0_i32_0, %c0_i32_1 : i32, i32, i32
  }
  func.func @transform_2(%arg0: i32) -> (i32, i32, i32, i32) {
    %c0_i32 = arith.constant 0 : i32
    %c0_i32_0 = arith.constant 0 : i32
    %c0_i32_1 = arith.constant 0 : i32
    %c0_i32_2 = arith.constant 0 : i32
    %c0_i32_3 = arith.constant 0 : i32
    return %c0_i32, %c0_i32_0, %c0_i32_1, %c0_i32_2 : i32, i32, i32, i32
  }
  func.func @transform_3(%arg0: i32) -> (i32, i32, i32, i32) {
    %c0_i32 = arith.constant 0 : i32
    %c0_i32_0 = arith.constant 0 : i32
    %c0_i32_1 = arith.constant 0 : i32
    %c0_i32_2 = arith.constant 0 : i32
    %c0_i32_3 = arith.constant 0 : i32
    return %c0_i32, %c0_i32_0, %c0_i32_1, %c0_i32_2 : i32, i32, i32, i32
  }
  func.func @transform_4(%arg0: i32) -> (i32, i32, i32, i32) {
    %c0_i32 = arith.constant 0 : i32
    %c0_i32_0 = arith.constant 0 : i32
    %c0_i32_1 = arith.constant 0 : i32
    %c0_i32_2 = arith.constant 0 : i32
    %c0_i32_3 = arith.constant 0 : i32
    return %c0_i32, %c0_i32_0, %c0_i32_1, %c0_i32_2 : i32, i32, i32, i32
  }
  func.func @transform_5(%arg0: i32) -> (i32, i32, i32, i32) {
    %c0_i32 = arith.constant 0 : i32
    %c0_i32_0 = arith.constant 0 : i32
    %c0_i32_1 = arith.constant 0 : i32
    %c0_i32_2 = arith.constant 0 : i32
    %c0_i32_3 = arith.constant 0 : i32
    return %c0_i32, %c0_i32_0, %c0_i32_1, %c0_i32_2 : i32, i32, i32, i32
  }
  func.func @transform_6(%arg0: i32) -> (i32, i32, i32, i32) {
    %c0_i32 = arith.constant 0 : i32
    %c0_i32_0 = arith.constant 0 : i32
    %c0_i32_1 = arith.constant 0 : i32
    %c0_i32_2 = arith.constant 0 : i32
    %c0_i32_3 = arith.constant 0 : i32
    return %c0_i32, %c0_i32_0, %c0_i32_1, %c0_i32_2 : i32, i32, i32, i32
  }
  func.func @transform_7(%arg0: i32) -> (i32, i32, i32, i32) {
    %c0_i32 = arith.constant 0 : i32
    %c0_i32_0 = arith.constant 0 : i32
    %c0_i32_1 = arith.constant 0 : i32
    %c0_i32_2 = arith.constant 0 : i32
    %c0_i32_3 = arith.constant 0 : i32
    return %c0_i32, %c0_i32_0, %c0_i32_1, %c0_i32_2 : i32, i32, i32, i32
  }
  func.func @transform_8(%arg0: i32) -> (i32, i32, i32, i32) {
    %c0_i32 = arith.constant 0 : i32
    %c0_i32_0 = arith.constant 0 : i32
    %c0_i32_1 = arith.constant 0 : i32
    %c0_i32_2 = arith.constant 0 : i32
    %c0_i32_3 = arith.constant 0 : i32
    return %c0_i32, %c0_i32_0, %c0_i32_1, %c0_i32_2 : i32, i32, i32, i32
  }
  func.func @transform_9(%arg0: i32) -> (i32, i32, i32) {
    %c0_i32 = arith.constant 0 : i32
    %c0_i32_0 = arith.constant 0 : i32
    %c0_i32_1 = arith.constant 0 : i32
    %c0_i32_2 = arith.constant 0 : i32
    return %c0_i32, %c0_i32_0, %c0_i32_1 : i32, i32, i32
  }
  func.func @transform_10(%arg0: i32) -> (i32, i32, i32) {
    %c0_i32 = arith.constant 0 : i32
    %c0_i32_0 = arith.constant 0 : i32
    %c0_i32_1 = arith.constant 0 : i32
    %c0_i32_2 = arith.constant 0 : i32
    return %c0_i32, %c0_i32_0, %c0_i32_1 : i32, i32, i32
  }
  func.func @transform_11(%arg0: i32) -> (i32, i32, i32) {
    %c0_i32 = arith.constant 0 : i32
    %c0_i32_0 = arith.constant 0 : i32
    %c0_i32_1 = arith.constant 0 : i32
    %c0_i32_2 = arith.constant 0 : i32
    return %c0_i32, %c0_i32_0, %c0_i32_1 : i32, i32, i32
  }
  func.func @transform_12(%arg0: i32) -> (i32, i32, i32) {
    %c0_i32 = arith.constant 0 : i32
    %c0_i32_0 = arith.constant 0 : i32
    %c0_i32_1 = arith.constant 0 : i32
    %c0_i32_2 = arith.constant 0 : i32
    return %c0_i32, %c0_i32_0, %c0_i32_1 : i32, i32, i32
  }
  func.func @transform_13(%arg0: i32) -> (i32, i32, i32) {
    %c0_i32 = arith.constant 0 : i32
    %c0_i32_0 = arith.constant 0 : i32
    %c0_i32_1 = arith.constant 0 : i32
    %c0_i32_2 = arith.constant 0 : i32
    return %c0_i32, %c0_i32_0, %c0_i32_1 : i32, i32, i32
  }
  func.func @transform_14(%arg0: i32) -> (i32, i32, i32) {
    %c0_i32 = arith.constant 0 : i32
    %c0_i32_0 = arith.constant 0 : i32
    %c0_i32_1 = arith.constant 0 : i32
    %c0_i32_2 = arith.constant 0 : i32
    return %c0_i32, %c0_i32_0, %c0_i32_1 : i32, i32, i32
  }
  func.func @transform_15(%arg0: i32) -> (i32, i32, i32) {
    %c0_i32 = arith.constant 0 : i32
    %c0_i32_0 = arith.constant 0 : i32
    %c0_i32_1 = arith.constant 0 : i32
    %c0_i32_2 = arith.constant 0 : i32
    return %c0_i32, %c0_i32_0, %c0_i32_1 : i32, i32, i32
  }
  func.func @transform_16(%arg0: i32) -> (i32, i32, i32) {
    %c0_i32 = arith.constant 0 : i32
    %c0_i32_0 = arith.constant 0 : i32
    %c0_i32_1 = arith.constant 0 : i32
    %c0_i32_2 = arith.constant 0 : i32
    return %c0_i32, %c0_i32_0, %c0_i32_1 : i32, i32, i32
  }
  func.func @transform_17(%arg0: i32) -> (i32, i32, i32) {
    %c0_i32 = arith.constant 0 : i32
    %c0_i32_0 = arith.constant 0 : i32
    %c0_i32_1 = arith.constant 0 : i32
    %c0_i32_2 = arith.constant 0 : i32
    return %c0_i32, %c0_i32_0, %c0_i32_1 : i32, i32, i32
  }
  func.func @transform_18(%arg0: i32) -> (i32, i32) {
    %c0_i32 = arith.constant 0 : i32
    %c0_i32_0 = arith.constant 0 : i32
    %c0_i32_1 = arith.constant 0 : i32
    return %c0_i32, %c0_i32_0 : i32, i32
  }
  func.func @transform_19(%arg0: i32) -> (i32, i32) {
    %c0_i32 = arith.constant 0 : i32
    %c0_i32_0 = arith.constant 0 : i32
    %c0_i32_1 = arith.constant 0 : i32
    return %c0_i32, %c0_i32_0 : i32, i32
  }
  func.func @transform_20(%arg0: i32) -> (i32, i32) {
    %c0_i32 = arith.constant 0 : i32
    %c0_i32_0 = arith.constant 0 : i32
    %c0_i32_1 = arith.constant 0 : i32
    return %c0_i32, %c0_i32_0 : i32, i32
  }
  func.func @transform_21(%arg0: i32) -> (i32, i32) {
    %c0_i32 = arith.constant 0 : i32
    %c0_i32_0 = arith.constant 0 : i32
    %c0_i32_1 = arith.constant 0 : i32
    return %c0_i32, %c0_i32_0 : i32, i32
  }
  func.func @transform_22(%arg0: i32) -> (i32, i32, i32) {
    %c0_i32 = arith.constant 0 : i32
    %c0_i32_0 = arith.constant 0 : i32
    %c0_i32_1 = arith.constant 0 : i32
    return %arg0, %c0_i32, %c0_i32_0 : i32, i32, i32
  }
}

</mosaic_0001>

<bundles_post_ra>
// kernel: transformers_forward.1
= control target key start
LH: loop header
LB: loop body
LE: loop exit
PB: predicated region body
PF: predicated region fallthrough
CT: control target
= control target key end

     0   :  { %s8698_s0 = inlined_call_operand.vmem [shape: f32[2,9,32], index: 0, kind: input, shape index: {}]   ;;  %s8699_s1 = inlined_call_operand.vmem [shape: f32[1,9,32], index: 1, kind: input, shape index: {}]   ;;  %s8700_s2 = inlined_call_operand.vmem [shape: f32[2,4,32,8], index: 2, kind: input, shape index: {}]   ;;  %s8701_s3 = inlined_call_operand.vmem [shape: f32[2,4,32,8], index: 3, kind: input, shape index: {}]   ;;  %s8702_s4 = inlined_call_operand.vmem [shape: f32[2,4,32,8], index: 4, kind: input, shape index: {}]   ;;  %s8703_s5 = inlined_call_operand.vmem [shape: f32[2,4,1,8], index: 5, kind: input, shape index: {}]   ;;  %s8704_s6 = inlined_call_operand.vmem [shape: f32[2,4,1,8], index: 6, kind: input, shape index: {}]   ;;  %s8705_s7 = inlined_call_operand.vmem [shape: f32[2,4,1,8], index: 7, kind: input, shape index: {}]   ;;  %s8706_s8 = inlined_call_operand.vmem [shape: f32[2,4,8,32], index: 8, kind: input, shape index: {}]   ;;  %s8707_s9 = inlined_call_operand.vmem [shape: f32[2,1,32], index: 9, kind: input, shape index: {}]   ;;  %s8708_s10 = inlined_call_operand.vmem [shape: f32[2,1,32], index: 10, kind: input, shape index: {}]   ;;  %s8709_s11 = inlined_call_operand.vmem [shape: f32[2,1,32], index: 11, kind: input, shape index: {}]   ;;  %s8710_s12 = inlined_call_operand.vmem [shape: f32[2,32,64], index: 12, kind: input, shape index: {}]   ;;  %s8711_s13 = inlined_call_operand.vmem [shape: f32[2,1,64], index: 13, kind: input, shape index: {}]   ;;  %s8712_s14 = inlined_call_operand.vmem [shape: f32[2,64,32], index: 14, kind: input, shape index: {}]   ;;  %s8713_s15 = inlined_call_operand.vmem [shape: f32[2,1,32], index: 15, kind: input, shape index: {}]   ;;  %s8714_s16 = inlined_call_operand.vmem [shape: f32[2,1,32], index: 16, kind: input, shape index: {}]   ;;  %s8715_s17 = inlined_call_operand.vmem [shape: f32[2,1,32], index: 17, kind: input, shape index: {}]   ;;  %s8716_s18 = inlined_call_operand.vmem [shape: f32[32,64], index: 18, kind: input, shape index: {}]   ;;  %s8717_s19 = inlined_call_operand.vmem [shape: f32[1,64], index: 19, kind: input, shape index: {}]   ;;  %s8718_s20 = inlined_call_operand.vmem [shape: f32[64,128], index: 20, kind: input, shape index: {}]   ;;  %s8719_s21 = inlined_call_operand.vmem [shape: f32[1,128], index: 21, kind: input, shape index: {}]   ;;  %s8720_s22 = inlined_call_operand.hbm [shape: f32[2,1,128], index: 22, kind: output, shape index: {}]  }
   0x1   :  { %8738 = sst [smem:[#allocation12_spill]] %s8698_s0 }
   0x2   :  { %8739 = sst [smem:[#allocation13_spill]] %s8699_s1 }
   0x3   :  { %8740 = sst [smem:[#allocation14_spill]] %s8700_s2 }
   0x4   :  { %8741 = sst [smem:[#allocation15_spill]] %s8701_s3 }
   0x5   :  { %8742 = sst [smem:[#allocation16_spill]] %s8702_s4 }
   0x6   :  { %8743 = sst [smem:[#allocation17_spill]] %s8703_s5 }
   0x7   :  { %8744 = sst [smem:[#allocation18_spill]] %s8704_s6 }
   0x8   :  { %8745 = sst [smem:[#allocation19_spill]] %s8705_s7 }
   0x9   :  { %8746 = sst [smem:[#allocation20_spill]] %s8706_s8 }
   0xa   :  { %8747 = sst [smem:[#allocation21_spill]] %s8719_s21 }
   0xb   :  { %8748 = sst [smem:[#allocation22_spill]] %s8720_s22 }
   0xc   :  { %27 = vsyncpa [#allocation3], 0 }
   0xd   :  { %29 = vsyncpa [#allocation3 + $0x1], 0  ;;  %s7736_s3 = smov 0   ;;  %s7738_s28 = smov 0  }
   0xe   :  { %s7740_s29 = smov 0   ;;  %s7742_s30 = smov 0  }
   0xf LB: > { %8749 = sst [smem:[#allocation5_spill]] %s7601_s3  ;;  %s7757_s4 = sadd.s32 4294967295, %s7613_s30   ;;  %s7613_s30 = sphi %s7742_s30, %s8779_s30   ;;  %s7609_s29 = sphi %s7740_s29, %s8781_s29   ;;  %s7605_s28 = sphi %s7738_s28, %s8783_s28   ;;  %s7601_s3 = sphi %s7736_s3, %s8782_s3  }
  0x10   : > { %8750 = sst [smem:[#allocation6_spill]] %s7609_s29  ;;  %s5954_s0 = sadd.s32 4294967294, %s7613_s30  }
  0x11   : > { %8751 = sst [smem:[#allocation7_spill]] %s7613_s30  ;;  %s7761_s23 = sadd.s32 1, %s7613_s30  }
  0x12   : > { %8752 = sst [smem:[#allocation8_spill]] %s7761_s23  ;;  %s509_s1 = sadd.s32 1, %s7609_s29 }
  0x13   : > { %s506_s5 = ssub.s32 %s7613_s30, %s7761_s23  ;;  %p519_p0 = scmp.ne.s32.totalorder %s7609_s29, %s7605_s28 }
  0x14   : > { %p507_p1 = scmp.eq.s32.totalorder %s506_s5, 0  ;;  %p520_p2 = scmp.eq.s32.totalorder %s7757_s4, 1 }
  0x15   : > { %p525_p3 = scmp.ne.s32.totalorder %s7605_s28, %s7601_s3  ;;  %p526_p4 = scmp.eq.s32.totalorder %s5954_s0, 1 }
  0x16   : > { %s7772_s24 = scalar_select %p507_p1, %s7609_s29, %s509_s1  }
  0x17   : > { %p7774_p5 = por %p520_p2, %p519_p0  ;;  %p7778_p6 = por %p526_p4, %p525_p3 }
  0x18   : > { %8753 = sst [smem:[#allocation9_spill]] %s7772_s24  ;;  %p5957_p7 = scmp.ge.s32.totalorder %s7613_s30, 1 }
  0x19   : > { %s8754_s6 = scalar_select %p7774_p5, 1, 0 }
  0x1a   : > { %s8756_s25 = scalar_select %p7778_p6, 1, 0 }
  0x1b   : > { %8755 = sst [smem:[#allocation10_spill]] %s8754_s6  ;;  %p615_p8 = scmp.lt.s32.totalorder %s7613_s30, 3 }
  0x1c   : > { %8757 = sst [smem:[#allocation11_spill]] %s8756_s25 }
  0x1d   : > { %p616_p9 = pnand %p5957_p7, %p615_p8 }
  0x1e   : > { %s8758_s27 = sld [smem:[#allocation15_spill]] (!%p616_p9)  ;;  %p676_p10 = scmp.lt.s32.totalorder (!%p616_p9), %s7757_s4, 1  ;;  %vm700_vm0 = vcmask (!%p616_p9), 261120   ;;  %vm954_vm1 = vcmask (!%p616_p9), 64512   ;;  %vm1044_vm3 = vcmask (!%p616_p9), 72704   ;;  %vm1048_vm4 = vcmask (!%p616_p9), 65536  }
  0x1f   : > { %619 = sbr.rel (%p616_p9) target bundleno = 10540 (0x292c), region = 108  ;;  %s8759_s26 = sld [smem:[#allocation14_spill]] (!%p616_p9)  ;;  %vm7841_vm2 = vmpackc.low (!%p616_p9), %vm954_vm1, %vm954_vm1  ;;  %vm1074_vm5 = vcmask (!%p616_p9), 1040384   ;;  %vm7615_vm6 = vmmov (!%p616_p9), 1   ;;  %vm2881_vm8 = vcmask (!%p616_p9), 253952   ;;  %vm3083_vm11 = vcmask (!%p616_p9), 523264  }
  0x20   : > { %s8760_s25 = sld [smem:[#allocation12_spill]] (!%p616_p9)  ;;  %s8761_s6 = sld [smem:[#allocation13_spill]] (!%p616_p9)  ;;  %vm7874_vm7 = vmpackc.low (!%p616_p9), %vm1074_vm5, %vm7615_vm6  ;;  %vm7618_vm14 = vmmov (!%p616_p9), 0  }
  0x21   : > { %s8762_s24 = sld [smem:[#allocation18_spill]] (!%p616_p9)  ;;  %s8763_s3 = sld [smem:[#allocation17_spill]] (!%p616_p9) }
  0x22   : > { %s8767_s30 = sld [smem:[#allocation16_spill]] (!%p616_p9)  ;;  %s8769_s7 = sld [smem:[#allocation19_spill]] (!%p616_p9) }
  0x23   : > { %s8772_s8 = sld [smem:[#allocation20_spill]] (!%p616_p9)  ;;  %s674_s22 = sand.u32 (!%p616_p9), 1, %s7605_s28  }
  0x24   : > { %v782_v0 = vld [vmem:[%s8758_s27] sm:$0xff] (!%p616_p9)  ;;  %v783_v1 = vld [vmem:[%s8758_s27 + $0x8] sm:$0xff] (!%p616_p9)  ;;  %v784_v2 = vld [vmem:[%s8758_s27 + $0x10] sm:$0xff] (!%p616_p9) }
  0x25   : > { %v7055_v3 = vpack.c.bf16 (!%p616_p9), %v783_v1, %v782_v0  ;;  %v785_v4 = vld [vmem:[%s8758_s27 + $0x18] sm:$0xff] (!%p616_p9)  ;;  %v689_v5 = vld [vmem:[%s8759_s26] sm:$0xff] (!%p616_p9)  ;;  %v690_v7 = vld [vmem:[%s8759_s26 + $0x8] sm:$0xff] (!%p616_p9) }
  0x26   : > { %v7059_v6 = vpack.c.bf16 %v785_v4, %v784_v2  ;;  %s677_s2 = scalar_select %p676_p10, %s7757_s4, 1  ;;  %v691_v8 = vld [vmem:[%s8759_s26 + $0x10] sm:$0xff]  ;;  %v7047_v9 = vpack.c.bf16 %v690_v7, %v689_v5  ;;  %v692_v10 = vld [vmem:[%s8759_s26 + $0x18] sm:$0xff]  ;;  %v685_v12 = vld [vmem:[%s8761_s6] sm:$0xff] }
  0x27   : > { %7056 = vmatprep.subr.bf16.mxu1 %v7055_v3  ;;  %v7051_v11 = vpack.c.bf16 %v692_v10, %v691_v8  ;;  %v686_v15 = vld [vmem:[%s8761_s6 + $0x8] sm:$0x1]  ;;  %v5963_v20 = vld [vmem:[%s8762_s24] ss:$0 sm:$0xff]  ;;  %s8764_s23 = smov %s8763_s3  ;;  %v5979_v4 = vld [vmem:[%s8759_s26 + $0x38] sm:$0xff]  ;;  %s8774_s6 = sld [smem:[#allocation21_spill]] }
  0x28   : > { %7058 = vmatpush3.bf16.msra.mxu1 %v7055_v3  ;;  %s6262_s29 = sshll.u32 %s677_s2, 4  ;;  %7048 = vmatprep.subr.bf16.mxu0 %v7047_v9  ;;  %v5960_v22 = vld [vmem:[%s8763_s3] ss:$0 sm:$0xff]  ;;  %s8768_s0 = smov %s8767_s30  ;;  %v5985_v62 = vld [vmem:[%s8758_s27 + $0x28] sm:$0xff]  ;;  %v5978_v3 = vld [vmem:[%s8759_s26 + $0x30] sm:$0xff] }
  0x29   : > { %7060 = vmatprep.subr.bf16.mxu1 %v7059_v6  ;;  %s680_s21 = scalar_lea.vmem %s8760_s25, %s6262_s29  ;;  %7050 = vmatpush3.bf16.msra.mxu0 %v7047_v9  ;;  %v868_v32 = vld [vmem:[%s8767_s30] sm:$0xff]  ;;  %v869_v33 = vld [vmem:[%s8768_s0 + $0x8] sm:$0xff]  ;;  %v870_v34 = vld [vmem:[%s8768_s0 + $0x10] sm:$0xff]  ;;  %v7087_v5 = vpack.c.bf16 %v5979_v4, %v5978_v3  ;;  %s675_s2 = scalar_lea.vmem [#allocation2], %s674_s22 }
  0x2a   : > { %v681_v13 = vld [vmem:[%s680_s21] sm:$0xff]  ;;  %v682_v14 = vld [vmem:[%s680_s21 + $0x8] sm:$0x1]  ;;  %7052 = vmatprep.subr.bf16.mxu0 %v7051_v11  ;;  %v7063_v35 = vpack.c.bf16 %v869_v33, %v868_v32  ;;  %v871_v36 = vld [vmem:[%s8768_s0 + $0x18] sm:$0xff]  ;;  %s6259_s21 = sshll.u32 %s7757_s4, 4  ;;  %s5899_s5 = sshll.u32 %s675_s2, 4  ;;  %s8658_s5 = int_to_ptr.vmem [resolvable:$true] %s5899_s5 }
  0x2b   : > { %v683_v16 = vmul.f32 5.656854, %v681_v13  ;;  %v684_v17 = vmul.f32 5.656854, %v682_v14  ;;  %v7067_v37 = vpack.c.bf16 %v871_v36, %v870_v34  ;;  %v5966_v55 = vld [vmem:[%s8769_s7] ss:$0 sm:$0xff] }
  0x2c   : > { %7062 = vmatpush3.bf16.msra.mxu1 %v7059_v6  ;;  %v5984_v61 = vld [vmem:[%s8758_s27 + $0x20] sm:$0xff]  ;;  %v5977_v1 = vld [vmem:[%s8759_s26 + $0x28] sm:$0xff]  ;;  %v5986_v10 = vld [vmem:[%s8758_s27 + $0x30] sm:$0xff]  ;;  %s7551_s30 = scalar_lea.vmem %s8658_s5, 16  ;;  %s7620_s4 = smov [#allocation2]  }
  0x2d   : > { %v7819_v18 = vadd.f32 %v685_v12, %v683_v16  ;;  %v7821_v19 = vadd.f32 %v686_v15, %v684_v17  ;;  %7054 = vmatpush3.bf16.msra.mxu0 %v7051_v11  ;;  %v7091_v63 = vpack.c.bf16 %v5985_v62, %v5984_v61  ;;  %v5976_v0 = vld [vmem:[%s8759_s26 + $0x20] sm:$0xff]  ;;  %v5987_v11 = vld [vmem:[%s8758_s27 + $0x38] sm:$0xff]  ;;  %v5993_v32 = vld [vmem:[%s8768_s0 + $0x28] sm:$0xff]  ;;  %p7552_p11 = scmp.ne.s32.totalorder %s8658_s5, %s7551_s30  ;;  %s7555_s1 = sshll.u32 %s7620_s4, 4  ;;  %s7556_s1 = int_to_ptr.vmem [resolvable:$false] %s7555_s1 }
  0x2e   : > { %7064 = vmatprep.subr.bf16.mxu0 %v7063_v35  ;;  %v7083_v2 = vpack.c.bf16 %v5977_v1, %v5976_v0  ;;  %v7095_v14 = vpack.c.bf16 %v5987_v11, %v5986_v10  ;;  %v5981_v15 = vld [vmem:[%s8764_s23 + $0x1] ss:$0 sm:$0xff]  ;;  %v5994_v33 = vld [vmem:[%s8768_s0 + $0x30] sm:$0xff]  ;;  %v6021_v11 = vld [vmem:[%s8758_s27 + $0x48] sm:$0xff]  ;;  %p7558_p0 = scmp.lt.s32.totalorder %s8658_s5, %s7556_s1 }
  0x2f   : > { %6560 = vmatprep.mubr.msk.f32.mxu1 %vm700_vm0, %v7819_v18  ;;  %6549 = vmatprep.mubr.msk.f32.mxu0 %vm700_vm0, %v7819_v18  ;;  %v1153_v3 = vld [vmem:[%s8772_s8] sm:$0xff]  ;;  %p7553_p12 = pnand %p7552_p11, %p7774_p5 }
  0x30   : > { %6561 = vmatmul.mubr.msk.f32.vlgmr.msra.gmra.mrb[0].mxu1 %vm700_vm0, %v7821_v19  ;;  %6550 = vmatmul.mubr.msk.f32.vlgmr.msra.gmra.mrb[0].mxu0 %vm700_vm0, %v7821_v19  ;;  %v6012_v4 = vld [vmem:[%s8759_s26 + $0x40] sm:$0xff] }
  0x31   : > { %6571 = vmatprep.mubr.msk.f32.mxu0 %vm700_vm0, %v7819_v18  ;;  %7066 = vmatpush3.bf16.msra.mxu0 %v7063_v35  ;;  %v5995_v35 = vld [vmem:[%s8768_s0 + $0x38] sm:$0xff]  ;;  %v6020_v10 = vld [vmem:[%s8758_s27 + $0x40] sm:$0xff]  ;;  %p7554_p13 = pneg %p7553_p12 }
  0x32   : > { %7068 = vmatprep.subr.bf16.mxu0 %v7067_v37  ;;  %v7103_v36 = vpack.c.bf16 %v5995_v35, %v5994_v33  ;;  %v6029_v33 = vld [vmem:[%s8768_s0 + $0x48] sm:$0xff] }
  0x35   : > { %7070 = vmatpush3.bf16.msra.mxu0 %v7067_v37 }
  0x38   : > { %6572 = vmatmul.mubr.msk.f32.vlgmr.msra.gmra.mrb[2].mxu0 %vm700_vm0, %v7821_v19 }
 0x103   : > { %v6562_v21 = vpop.f32.mrb[0].mxu1  ;;  %v6551_v25 = vpop.f32.mrb[0].mxu0 }
 0x104   : > { %v865_v23 = vadd.f32 %v6562_v21, %v5963_v20  ;;  %v859_v24 = vpop.f32.mrb[1].mxu1  ;;  %v773_v27 = vpop.f32.mrb[1].mxu0  ;;  %v779_v31 = vadd.f32 %v6551_v25, %v5960_v22 }
 0x105   : > { %v860_v26 = vadd.f32 %v5963_v20, %v859_v24  ;;  %v774_v29 = vadd.f32 %v5960_v22, %v773_v27  ;;  %v5989_v24 = vld [vmem:[%s8762_s24 + $0x1] ss:$0 sm:$0xff] }
 0x107   : > { %v7071_v30 = vpack.c.bf16 %v865_v23, %v860_v26  ;;  %6578 = vmatprep.mubr.msk.f32.mxu1 %vm954_vm1, %v774_v29 }
 0x109   : > { %7073 = vmatprep.subr.msk.bf16.mxu1 %vm7841_vm2, %v7071_v30 }
 0x10a   : > { %7076 = vmatpush3.bf16.xpose.msk.msra.mxu1 %vm7841_vm2, %v7071_v30 }
 0x10b   : > { %v6573_v54 = vpop.f32.mrb[2].mxu0  ;;  %7084 = vmatprep.subr.bf16.mxu1 %v7083_v2 }
 0x10c   : > { %v945_v56 = vpop.f32.mrb[3].mxu0  ;;  %v951_v57 = vadd.f32 %v6573_v54, %v5966_v55  ;;  %v5997_v54 = vld [vmem:[%s8769_s7 + $0x1] ss:$0 sm:$0xff] }
 0x10d   : > { %v946_v58 = vadd.f32 %v5966_v55, %v945_v56 }
 0x10f   : > { %v7077_v59 = vpack.c.bf16 %v951_v57, %v946_v58 }
 0x111   : > { %6579 = vmatmul.mubr.msk.f32.vlgmr.msra.gmra.mrb[2].mxu1 %vm954_vm1, %v779_v31  ;;  %7079 = vmatprep.subr.msk.bf16.mxu0 %vm7874_vm7, %v7077_v59  ;;  %v5992_v31 = vld [vmem:[%s8768_s0 + $0x20] sm:$0xff] }
 0x112   : > { %6596 = vmatprep.mubr.msk.f32.mxu1 %vm700_vm0, %v7819_v18  ;;  %7082 = vmatpush3.bf16.msk.msra.mxu0 %vm7874_vm7, %v7077_v59  ;;  %v7099_v34 = vpack.c.bf16 %v5993_v32, %v5992_v31  ;;  %v6007_v59 = vld [vmem:[%s8772_s8 + $0x8] sm:$0xff]  ;;  %v6028_v32 = vld [vmem:[%s8768_s0 + $0x40] sm:$0xff] }
 0x113   : > { %7092 = vmatprep.subr.bf16.mxu0 %v7091_v63  ;;  %7086 = vmatpush3.bf16.msra.mxu1 %v7083_v2  ;;  %v7135_v35 = vpack.c.bf16 %v6029_v33, %v6028_v32  ;;  %v6062_v32 = vld [vmem:[%s8768_s0 + $0x60] sm:$0xff]  ;;  %v6063_v33 = vld [vmem:[%s8768_s0 + $0x68] sm:$0xff] }
 0x114   : > { %7088 = vmatprep.subr.bf16.mxu1 %v7087_v5 }
 0x117   : > { %7090 = vmatpush3.bf16.msra.mxu1 %v7087_v5  ;;  %v6013_v5 = vld [vmem:[%s8759_s26 + $0x48] sm:$0xff] }
 0x118   : > { %7100 = vmatprep.subr.bf16.mxu1 %v7099_v34 }
 0x11a   : > { %6597 = vmatmul.mubr.msk.f32.vlgmr.msra.gmra.mrb[4].mxu1 %vm700_vm0, %v7821_v19 }
 0x11b   : > { %6618 = vmatprep.mubr.msk.f32.mxu1 %vm700_vm0, %v7819_v18  ;;  %7102 = vmatpush3.bf16.msra.mxu1 %v7099_v34  ;;  %v6030_v34 = vld [vmem:[%s8768_s0 + $0x50] sm:$0xff] }
 0x11c   : > { %7104 = vmatprep.subr.bf16.mxu1 %v7103_v36 }
 0x11f   : > { %7106 = vmatpush3.bf16.msra.mxu1 %v7103_v36  ;;  %v6031_v36 = vld [vmem:[%s8768_s0 + $0x58] sm:$0xff] }
 0x122   : > { %6619 = vmatmul.mubr.msk.f32.vlgmr.msra.gmra.mrb[6].mxu1 %vm700_vm0, %v7821_v19 }
 0x123   : > { %6653 = vmatprep.mubr.msk.f32.mxu1 %vm700_vm0, %v7819_v18 }
 0x1e4   : > { %v6580_v38 = vpop.f32.mrb[2].mxu1 }
 0x1e5   : > { %v1033_v39 = vpop.f32.mrb[3].mxu1  ;;  %v1043_v41 = vmul.f32 0.35355338, %v6580_v38 }
 0x1e6   : > { %v1042_v40 = vmul.f32 0.35355338, %v1033_v39 }
 0x1e7   : > { %v1049_v43 = vsel %vm1048_vm4, %v1043_v41, -inf }
 0x1e8   : > { %v1045_v42 = vsel %vm1044_vm3, %v1042_v40, -inf }
 0x1e9   : > { %1046 = vmax.xlane.f32.xlu0 %v1045_v42 }
 0x1ed   : > { %1050 = vmax.xlane.f32.xlu0 %v1049_v43  ;;  %v6598_v16 = vpop.f32.mrb[4].mxu1 }
 0x1ee   : > { %v1239_v17 = vadd.f32 %v6598_v16, %v5981_v15  ;;  %v1233_v20 = vpop.f32.mrb[5].mxu1  ;;  %v6023_v16 = vld [vmem:[%s8758_s27 + $0x58] sm:$0xff] }
 0x1ef   : > { %v1234_v21 = vadd.f32 %v5981_v15, %v1233_v20  ;;  %v6022_v15 = vld [vmem:[%s8758_s27 + $0x50] sm:$0xff]  ;;  %v6017_v20 = vld [vmem:[%s8764_s23 + $0x2] ss:$0 sm:$0xff] }
 0x276   : > { %v1047_v44 = vpop.xlane.xlu0 %1046 }
 0x277   : > { %v1052_v45 = vsub.f32 %v1042_v40, %v1047_v44 }
 0x279   : > { %v1054_v46 = vmul.f32 1.442695, %v1052_v45 }
 0x27a   : > { %v1051_v47 = vpop.xlane.xlu0 %1050 }
 0x27b   : > { %7457 = vpow2.f32 %v1054_v46  ;;  %v1053_v48 = vsub.f32 %v1043_v41, %v1051_v47 }
 0x27d   : > { %v1056_v49 = vmul.f32 1.442695, %v1053_v48 }
 0x27f   : > { %7459 = vpow2.f32 %v1056_v49 }
 0x285   : > { %v7458_v50 = vpop.eup %7457 }
 0x286   : > { %v1058_v51 = vsel %vm1044_vm3, %v7458_v50, 0.0 }
 0x287   : > { %1059 = vadd.xlane.f32.xlu1 %v1058_v51 }
 0x289   : > { %v7460_v52 = vpop.eup %7459 }
 0x28a   : > { %v1061_v53 = vsel %vm1048_vm4, %v7460_v52, 0.0 }
 0x28b   : > { %1062 = vadd.xlane.f32.xlu1 %v1061_v53  ;;  %v6620_v53 = vpop.f32.mrb[6].mxu1 }
 0x28c   : > { %v1409_v55 = vpop.f32.mrb[7].mxu1  ;;  %v1415_v56 = vadd.f32 %v6620_v53, %v5997_v54 }
 0x28d   : > { %v1410_v57 = vadd.f32 %v5997_v54, %v1409_v55  ;;  %v6033_v55 = vld [vmem:[%s8769_s7 + $0x2] ss:$0 sm:$0xff] }
 0x28f   : > { %v7113_v58 = vpack.c.bf16 %v1415_v56, %v1410_v57 }
 0x314   : > { %v1060_v6 = vpop.xlane.xlu1 %1059 }
 0x315   : > { %7461 = vrcp.f32 %v1060_v6  ;;  %v7119_v6 = vpack.c.bf16 %v6013_v5, %v6012_v4  ;;  %v6054_v4 = vld [vmem:[%s8758_s27 + $0x60] sm:$0xff]  ;;  %v6055_v5 = vld [vmem:[%s8758_s27 + $0x68] sm:$0xff] }
 0x317   : > { %7120 = vmatprep.subr.bf16.mxu1 %v7119_v6 }
 0x318   : > { %v1063_v7 = vpop.xlane.xlu1 %1062  ;;  %7122 = vmatpush3.bf16.msra.mxu1 %v7119_v6  ;;  %v7163_v6 = vpack.c.bf16 %v6055_v5, %v6054_v4 }
 0x319   : > { %7463 = vrcp.f32 %v1063_v7  ;;  %v6014_v7 = vld [vmem:[%s8759_s26 + $0x50] sm:$0xff] }
 0x31f   : > { %v7462_v8 = vpop.eup %7461 }
 0x320   : > { %v1066_v9 = vmul.f32 %v7462_v8, %v7458_v50  ;;  %v6015_v8 = vld [vmem:[%s8759_s26 + $0x58] sm:$0xff] }
 0x322   : > { %6585 = vmatprep.mubr.msk.f32.mxu0 %vm1044_vm3, %v1066_v9  ;;  %v7123_v9 = vpack.c.bf16 %v6015_v8, %v6014_v7  ;;  %v6046_v7 = vld [vmem:[%s8759_s26 + $0x60] sm:$0xff]  ;;  %v6047_v8 = vld [vmem:[%s8759_s26 + $0x68] sm:$0xff] }
 0x323   : > { %v7464_v12 = vpop.eup %7463 }
 0x324   : > { %v1067_v13 = vmul.f32 %v7464_v12, %v7460_v52  ;;  %7124 = vmatprep.subr.bf16.mxu1 %v7123_v9 }
 0x325   : > { %7126 = vmatpush3.bf16.msra.mxu1 %v7123_v9  ;;  %v7155_v9 = vpack.c.bf16 %v6047_v8, %v6046_v7 }
 0x326   : > { %6586 = vmatmul.mubr.msk.f32.vlgmr.msra.gmra.mrb[4].mxu0 %vm1044_vm3, %v1067_v13  ;;  %7136 = vmatprep.subr.bf16.mxu1 %v7135_v35 }
 0x327   : > { %7094 = vmatpush3.bf16.msra.mxu0 %v7091_v63  ;;  %6607 = vmatprep.mubr.msk.f32.mxu0 %vm700_vm0, %v7819_v18 }
 0x328   : > { %7096 = vmatprep.subr.bf16.mxu0 %v7095_v14  ;;  %6654 = vmatmul.mubr.msk.f32.vlgmr.msra.gmra.mrb[8].mxu1 %vm700_vm0, %v7821_v19 }
 0x329   : > { %6675 = vmatprep.mubr.msk.f32.mxu1 %vm700_vm0, %v7819_v18  ;;  %7138 = vmatpush3.bf16.msra.mxu1 %v7135_v35  ;;  %v7171_v35 = vpack.c.bf16 %v6063_v33, %v6062_v32 }
 0x32b   : > { %7098 = vmatpush3.bf16.msra.mxu0 %v7095_v14  ;;  %v7127_v14 = vpack.c.bf16 %v6021_v11, %v6020_v10  ;;  %v6048_v10 = vld [vmem:[%s8759_s26 + $0x70] sm:$0xff]  ;;  %v6049_v11 = vld [vmem:[%s8759_s26 + $0x78] sm:$0xff] }
 0x32e   : > { %6608 = vmatmul.mubr.msk.f32.vlgmr.msra.gmra.mrb[6].mxu0 %vm700_vm0, %v7821_v19 }
 0x32f   : > { %6625 = vmatprep.mubr.msk.f32.mxu0 %vm954_vm1, %v1234_v21 }
 0x3f9   : > { %v7920_v22 = vpop.f32.mrb[4].mxu0 }
 0x3fa   : > { %v7922_v23 = vpop.f32.mrb[5].mxu0 }
 0x3fb   : > { %v6655_v21 = vpop.f32.mrb[8].mxu1 }
 0x401   : > { %v6609_v25 = vpop.f32.mrb[6].mxu0 }
 0x402   : > { %v1327_v26 = vadd.f32 %v6609_v25, %v5989_v24  ;;  %v1321_v27 = vpop.f32.mrb[7].mxu0 }
 0x403   : > { %v1322_v29 = vadd.f32 %v5989_v24, %v1321_v27  ;;  %v1856_v24 = vpop.f32.mrb[9].mxu1 }
 0x404   : > { %v1857_v25 = vadd.f32 %v6017_v20, %v1856_v24 }
 0x405   : > { %v7107_v30 = vpack.c.bf16 %v1327_v26, %v1322_v29 }
 0x407   : > { %7109 = vmatprep.subr.msk.bf16.mxu0 %vm7841_vm2, %v7107_v30 }
 0x408   : > { %7112 = vmatpush3.bf16.xpose.msk.msra.mxu0 %vm7841_vm2, %v7107_v30 }
 0x409   : > { %7115 = vmatprep.subr.msk.bf16.mxu0 %vm7874_vm7, %v7113_v58 }
 0x40f   : > { %6626 = vmatmul.mubr.msk.f32.vlgmr.msra.gmra.mrb[8].mxu0 %vm954_vm1, %v1239_v17  ;;  %v7131_v17 = vpack.c.bf16 %v6023_v16, %v6022_v15 }
 0x410   : > { %7118 = vmatpush3.bf16.msk.msra.mxu0 %vm7874_vm7, %v7113_v58 }
 0x411   : > { %6635 = vmatprep.subr.mxu0 %v6007_v59 }
 0x4e2   : > { %v6627_v37 = vpop.f32.mrb[8].mxu0 }
 0x4e3   : > { %v1506_v38 = vmul.f32 0.35355338, %v6627_v37  ;;  %v1496_v39 = vpop.f32.mrb[9].mxu0  ;;  %v7139_v37 = vpack.c.bf16 %v6031_v36, %v6030_v34  ;;  %v6064_v34 = vld [vmem:[%s8768_s0 + $0x70] sm:$0xff]  ;;  %v6065_v36 = vld [vmem:[%s8768_s0 + $0x78] sm:$0xff] }
 0x4e4   : > { %v1505_v40 = vmul.f32 0.35355338, %v1496_v39 }
 0x4e5   : > { %v1510_v41 = vsel %vm1048_vm4, %v1506_v38, -inf  ;;  %7140 = vmatprep.subr.bf16.mxu1 %v7139_v37 }
 0x4e6   : > { %1511 = vmax.xlane.f32.xlu1 %v1510_v41  ;;  %v1507_v42 = vsel %vm1044_vm3, %v1505_v40, -inf  ;;  %7142 = vmatpush3.bf16.msra.mxu1 %v7139_v37  ;;  %v7175_v37 = vpack.c.bf16 %v6065_v36, %v6064_v34 }
 0x4e7   : > { %1508 = vmax.xlane.f32.xlu0 %v1507_v42 }
 0x4e9   : > { %6676 = vmatmul.mubr.msk.f32.vlgmr.msra.gmra.mrb[10].mxu1 %vm700_vm0, %v7821_v19 }
 0x573   : > { %v1512_v43 = vpop.xlane.xlu1 %1511 }
 0x574   : > { %v1514_v44 = vsub.f32 %v1506_v38, %v1512_v43  ;;  %v1509_v45 = vpop.xlane.xlu0 %1508 }
 0x575   : > { %v1513_v46 = vsub.f32 %v1505_v40, %v1509_v45 }
 0x576   : > { %v1517_v47 = vmul.f32 1.442695, %v1514_v44 }
 0x577   : > { %v1515_v48 = vmul.f32 1.442695, %v1513_v46 }
 0x578   : > { %7465 = vpow2.f32 %v1517_v47 }
 0x579   : > { %7467 = vpow2.f32 %v1515_v48 }
 0x582   : > { %v7466_v49 = vpop.eup %7465 }
 0x583   : > { %v7468_v50 = vpop.eup %7467  ;;  %v1522_v51 = vsel %vm1048_vm4, %v7466_v49, 0.0 }
 0x584   : > { %1523 = vadd.xlane.f32.xlu1 %v1522_v51  ;;  %v1519_v52 = vsel %vm1044_vm3, %v7468_v50, 0.0 }
 0x585   : > { %1520 = vadd.xlane.f32.xlu0 %v1519_v52 }
 0x5bc   : > { %v6677_v54 = vpop.f32.mrb[10].mxu1 }
 0x5bd   : > { %v2032_v56 = vpop.f32.mrb[11].mxu1  ;;  %v2038_v57 = vadd.f32 %v6677_v54, %v6033_v55 }
 0x5be   : > { %v2033_v58 = vadd.f32 %v6033_v55, %v2032_v56  ;;  %v6067_v55 = vld [vmem:[%s8769_s7 + $0x3] ss:$0 sm:$0xff] }
 0x611   : > { %v1524_v61 = vpop.xlane.xlu1 %1523 }
 0x612   : > { %7469 = vrcp.f32 %v1524_v61  ;;  %v1521_v62 = vpop.xlane.xlu0 %1520  ;;  %v6043_v61 = vld [vmem:[%s8772_s8 + $0x10] sm:$0xff] }
 0x613   : > { %7471 = vrcp.f32 %v1521_v62 }
 0x61c   : > { %v7470_v63 = vpop.eup %7469 }
 0x61d   : > { %v7472_v0 = vpop.eup %7471  ;;  %v1528_v2 = vmul.f32 %v7470_v63, %v7466_v49 }
 0x61e   : > { %v1527_v1 = vmul.f32 %v7472_v0, %v7468_v50 }
 0x620   : > { %6632 = vmatprep.mubr.msk.f32.mxu0 %vm1044_vm3, %v1527_v1 }
 0x621   : > { %6633 = vmatmul.mubr.msk.f32.vlgmr.msra.gmra.mrb[10].mxu0 %vm1044_vm3, %v1528_v2 }
 0x622   : > { %6636 = vmatpush3.msra.mxu0 %v6007_v59  ;;  %v7149_v59 = vpack.c.bf16 %v2038_v57, %v2033_v58 }
 0x623   : > { %6640 = vmatprep.subr.mxu0 %v1153_v3 }
 0x624   : > { %7151 = vmatprep.subr.msk.bf16.mxu1 %vm7874_vm7, %v7149_v59 }
 0x625   : > { %7154 = vmatpush3.bf16.msk.msra.mxu1 %vm7874_vm7, %v7149_v59 }
 0x626   : > { %7156 = vmatprep.subr.bf16.mxu1 %v7155_v9 }
 0x6f4   : > { %v6634_v12 = vpop.f32.mrb[10].mxu0 }
 0x6f5   : > { %v1604_v13 = vpop.f32.mrb[11].mxu0 }
 0x6f6   : > { %6637 = vmatprep.mubr.msk.f32.mxu0 %vm954_vm1, %v1604_v13  ;;  %v6056_v13 = vld [vmem:[%s8758_s27 + $0x70] sm:$0xff] }
 0x6f7   : > { %6638 = vmatmul.mubr.msk.f32.vlgmr.msra.gmra.mrb[12].mxu0 %vm954_vm1, %v6634_v12  ;;  %v7159_v12 = vpack.c.bf16 %v6049_v11, %v6048_v10 }
 0x6f8   : > { %6641 = vmatpush3.msra.mxu0 %v1153_v3  ;;  %6642 = vmatprep.mubr.msk.f32.mxu0 %vm954_vm1, %v7922_v23  ;;  %v1862_v23 = vadd.f32 %v6655_v21, %v6017_v20  ;;  %v6051_v20 = vld [vmem:[%s8764_s23 + $0x3] ss:$0 sm:$0xff] }
 0x6f9   : > { %7128 = vmatprep.subr.bf16.mxu0 %v7127_v14 }
 0x6ff   : > { %6643 = vmatmul.mubr.msk.f32.vlgmr.msra.gmra.mrb[12].mxu0 %vm954_vm1, %v7920_v22  ;;  %v6025_v22 = vld [vmem:[%s8762_s24 + $0x2] ss:$0 sm:$0xff] }
 0x700   : > { %7130 = vmatpush3.bf16.msra.mxu0 %v7127_v14  ;;  %6664 = vmatprep.mubr.msk.f32.mxu0 %vm700_vm0, %v7819_v18  ;;  %v6057_v14 = vld [vmem:[%s8758_s27 + $0x78] sm:$0xff] }
 0x701   : > { %7132 = vmatprep.subr.bf16.mxu0 %v7131_v17 }
 0x704   : > { %7134 = vmatpush3.bf16.msra.mxu0 %v7131_v17  ;;  %v7167_v17 = vpack.c.bf16 %v6057_v14, %v6056_v13 }
 0x707   : > { %6665 = vmatmul.mubr.msk.f32.vlgmr.msra.gmra.mrb[14].mxu0 %vm700_vm0, %v7821_v19 }
 0x708   : > { %6682 = vmatprep.mubr.msk.f32.mxu0 %vm954_vm1, %v1857_v25 }
 0x7da   : > { %v6666_v26 = vpop.f32.mrb[14].mxu0 }
 0x7db   : > { %v1950_v27 = vadd.f32 %v6666_v26, %v6025_v22  ;;  %v1944_v29 = vpop.f32.mrb[15].mxu0 }
 0x7dc   : > { %v1945_v30 = vadd.f32 %v6025_v22, %v1944_v29  ;;  %v6059_v22 = vld [vmem:[%s8762_s24 + $0x3] ss:$0 sm:$0xff] }
 0x7de   : > { %v7143_v31 = vpack.c.bf16 %v1950_v27, %v1945_v30 }
 0x7e0   : > { %7145 = vmatprep.subr.msk.bf16.mxu0 %vm7841_vm2, %v7143_v31 }
 0x7e1   : > { %7148 = vmatpush3.bf16.xpose.msk.msra.mxu0 %vm7841_vm2, %v7143_v31 }
 0x7e2   : > { %6692 = vmatprep.subr.mxu0 %v6043_v61 }
 0x7e8   : > { %6683 = vmatmul.mubr.msk.f32.vlgmr.msra.gmra.mrb[16].mxu0 %vm954_vm1, %v1862_v23 }
 0x7e9   : > { %6693 = vmatpush3.msra.mxu0 %v6043_v61  ;;  %v6077_v61 = vld [vmem:[%s8772_s8 + $0x18] sm:$0xff] }
 0x7ea   : > { %7164 = vmatprep.subr.bf16.mxu0 %v7163_v6 }
 0x8bb   : > { %v6684_v38 = vpop.f32.mrb[16].mxu0 }
 0x8bc   : > { %v2129_v39 = vmul.f32 0.35355338, %v6684_v38  ;;  %v2119_v40 = vpop.f32.mrb[17].mxu0 }
 0x8bd   : > { %v2128_v41 = vmul.f32 0.35355338, %v2119_v40 }
 0x8be   : > { %v2133_v42 = vsel %vm1048_vm4, %v2129_v39, -inf }
 0x8bf   : > { %2134 = vmax.xlane.f32.xlu1 %v2133_v42  ;;  %v2130_v43 = vsel %vm1044_vm3, %v2128_v41, -inf }
 0x8c0   : > { %2131 = vmax.xlane.f32.xlu0 %v2130_v43 }
 0x94c   : > { %v2135_v44 = vpop.xlane.xlu1 %2134 }
 0x94d   : > { %v2137_v45 = vsub.f32 %v2129_v39, %v2135_v44  ;;  %v2132_v46 = vpop.xlane.xlu0 %2131 }
 0x94e   : > { %v2136_v47 = vsub.f32 %v2128_v41, %v2132_v46 }
 0x94f   : > { %v2140_v48 = vmul.f32 1.442695, %v2137_v45 }
 0x950   : > { %v2138_v49 = vmul.f32 1.442695, %v2136_v47 }
 0x951   : > { %7473 = vpow2.f32 %v2140_v48 }
 0x952   : > { %7475 = vpow2.f32 %v2138_v49 }
 0x95b   : > { %v7474_v50 = vpop.eup %7473 }
 0x95c   : > { %v7476_v51 = vpop.eup %7475  ;;  %v2145_v52 = vsel %vm1048_vm4, %v7474_v50, 0.0 }
 0x95d   : > { %2146 = vadd.xlane.f32.xlu1 %v2145_v52  ;;  %v2142_v53 = vsel %vm1044_vm3, %v7476_v51, 0.0 }
 0x95e   : > { %2143 = vadd.xlane.f32.xlu0 %v2142_v53 }
 0x9ea   : > { %v2147_v62 = vpop.xlane.xlu1 %2146 }
 0x9eb   : > { %7477 = vrcp.f32 %v2147_v62  ;;  %v2144_v63 = vpop.xlane.xlu0 %2143 }
 0x9ec   : > { %7479 = vrcp.f32 %v2144_v63 }
 0x9f5   : > { %v7478_v0 = vpop.eup %7477 }
 0x9f6   : > { %v7480_v1 = vpop.eup %7479  ;;  %v2151_v3 = vmul.f32 %v7478_v0, %v7474_v50 }
 0x9f7   : > { %v2150_v2 = vmul.f32 %v7480_v1, %v7476_v51 }
 0x9f9   : > { %6689 = vmatprep.mubr.msk.f32.mxu1 %vm1044_vm3, %v2150_v2 }
 0x9fa   : > { %6690 = vmatmul.mubr.msk.f32.vlgmr.msra.gmra.mrb[12].mxu1 %vm1044_vm3, %v2151_v3 }
 0x9fb   : > { %6705 = vmatprep.mubr.msk.f32.mxu1 %vm700_vm0, %v7819_v18  ;;  %7158 = vmatpush3.bf16.msra.mxu1 %v7155_v9 }
 0x9fc   : > { %7160 = vmatprep.subr.bf16.mxu1 %v7159_v12 }
 0x9ff   : > { %7162 = vmatpush3.bf16.msra.mxu1 %v7159_v12 }
 0xa00   : > { %7172 = vmatprep.subr.bf16.mxu1 %v7171_v35 }
 0xa02   : > { %6706 = vmatmul.mubr.msk.f32.vlgmr.msra.gmra.mrb[14].mxu1 %vm700_vm0, %v7821_v19 }
 0xa03   : > { %6727 = vmatprep.mubr.msk.f32.mxu1 %vm700_vm0, %v7819_v18  ;;  %7174 = vmatpush3.bf16.msra.mxu1 %v7171_v35 }
 0xa04   : > { %7176 = vmatprep.subr.bf16.mxu1 %v7175_v37 }
 0xa07   : > { %7178 = vmatpush3.bf16.msra.mxu1 %v7175_v37 }
 0xa0a   : > { %6728 = vmatmul.mubr.msk.f32.vlgmr.msra.gmra.mrb[16].mxu1 %vm700_vm0, %v7821_v19 }
 0xacd   : > { %v6691_v15 = vpop.f32.mrb[12].mxu1 }
 0xace   : > { %v2227_v16 = vpop.f32.mrb[13].mxu1 }
 0xacf   : > { %6694 = vmatprep.mubr.msk.f32.mxu0 %vm954_vm1, %v2227_v16 }
 0xad0   : > { %6695 = vmatmul.mubr.msk.f32.vlgmr.msra.gmra.mrb[12].mxu0 %vm954_vm1, %v6691_v15 }
 0xad1   : > { %7166 = vmatpush3.bf16.msra.mxu0 %v7163_v6  ;;  %6716 = vmatprep.mubr.msk.f32.mxu0 %vm700_vm0, %v7819_v18  ;;  %v6080_v6 = vld [vmem:[%s8707_s9] ss:$0 sm:$0xff] }
 0xad2   : > { %7168 = vmatprep.subr.bf16.mxu0 %v7167_v17 }
 0xad5   : > { %7170 = vmatpush3.bf16.msra.mxu0 %v7167_v17  ;;  %v6707_v21 = vpop.f32.mrb[14].mxu1 }
 0xad6   : > { %v2406_v23 = vadd.f32 %v6707_v21, %v6051_v20  ;;  %v2400_v24 = vpop.f32.mrb[15].mxu1 }
 0xad7   : > { %v2401_v25 = vadd.f32 %v6051_v20, %v2400_v24 }
 0xad8   : > { %6717 = vmatmul.mubr.msk.f32.vlgmr.msra.gmra.mrb[18].mxu0 %vm700_vm0, %v7821_v19 }
 0xad9   : > { %6734 = vmatprep.mubr.msk.f32.mxu0 %vm954_vm1, %v2401_v25 }
 0xadd   : > { %v6729_v54 = vpop.f32.mrb[16].mxu1 }
 0xade   : > { %v2576_v56 = vpop.f32.mrb[17].mxu1  ;;  %v2582_v57 = vadd.f32 %v6729_v54, %v6067_v55  ;;  %v3072_v54 = vld [vmem:[%s8712_s14 + $0x20] sm:$0xff] }
 0xadf   : > { %v2577_v58 = vadd.f32 %v6067_v55, %v2576_v56  ;;  %v3073_v55 = vld [vmem:[%s8712_s14 + $0x28] sm:$0xff] }
 0xae0   : > { %v7207_v56 = vpack.c.bf16 %v3073_v55, %v3072_v54 }
 0xae1   : > { %v7185_v59 = vpack.c.bf16 %v2582_v57, %v2577_v58  ;;  %v3074_v57 = vld [vmem:[%s8712_s14 + $0x30] sm:$0xff]  ;;  %v3075_v58 = vld [vmem:[%s8712_s14 + $0x38] sm:$0xff] }
 0xae3   : > { %7187 = vmatprep.subr.msk.bf16.mxu1 %vm7874_vm7, %v7185_v59 }
 0xae4   : > { %7190 = vmatpush3.bf16.msk.msra.mxu1 %vm7874_vm7, %v7185_v59  ;;  %v7211_v59 = vpack.c.bf16 %v3075_v58, %v3074_v57 }
 0xbab   : > { %v6718_v26 = vpop.f32.mrb[18].mxu0 }
 0xbac   : > { %v2494_v27 = vadd.f32 %v6718_v26, %v6059_v22  ;;  %v2488_v29 = vpop.f32.mrb[19].mxu0  ;;  %v2923_v26 = vld [vmem:[%s8710_s12 + $0x8] sm:$0xff] }
 0xbad   : > { %v2489_v30 = vadd.f32 %v6059_v22, %v2488_v29  ;;  %v2924_v29 = vld [vmem:[%s8710_s12 + $0x10] sm:$0xff] }
 0xbaf   : > { %v7179_v31 = vpack.c.bf16 %v2494_v27, %v2489_v30  ;;  %v2925_v30 = vld [vmem:[%s8710_s12 + $0x18] sm:$0xff] }
 0xbb1   : > { %7181 = vmatprep.subr.msk.bf16.mxu0 %vm7841_vm2, %v7179_v31 }
 0xbb2   : > { %7184 = vmatpush3.bf16.xpose.msk.msra.mxu0 %vm7841_vm2, %v7179_v31  ;;  %v7195_v31 = vpack.c.bf16 %v2925_v30, %v2924_v29 }
 0xbb3   : > { %6744 = vmatprep.subr.mxu0 %v6077_v61 }
 0xbb9   : > { %6735 = vmatmul.mubr.msk.f32.vlgmr.msra.gmra.mrb[20].mxu0 %vm954_vm1, %v2406_v23 }
 0xbba   : > { %6745 = vmatpush3.msra.mxu0 %v6077_v61  ;;  %v6083_v61 = vld [vmem:[%s8711_s13] ss:$0 sm:$0xff] }
 0xc8c   : > { %v6736_v38 = vpop.f32.mrb[20].mxu0 }
 0xc8d   : > { %v2673_v39 = vmul.f32 0.35355338, %v6736_v38  ;;  %v2663_v40 = vpop.f32.mrb[21].mxu0 }
 0xc8e   : > { %v2672_v41 = vmul.f32 0.35355338, %v2663_v40 }
 0xc8f   : > { %v2677_v42 = vsel %vm1048_vm4, %v2673_v39, -inf }
 0xc90   : > { %2678 = vmax.xlane.f32.xlu1 %v2677_v42  ;;  %v2674_v43 = vsel %vm1044_vm3, %v2672_v41, -inf }
 0xc91   : > { %2675 = vmax.xlane.f32.xlu0 %v2674_v43  ;;  %v6082_v43 = vld [vmem:[%s8709_s11] ss:$0 sm:$0xff] }
 0xd1d   : > { %v2679_v44 = vpop.xlane.xlu1 %2678 }
 0xd1e   : > { %v2681_v45 = vsub.f32 %v2673_v39, %v2679_v44  ;;  %v2676_v46 = vpop.xlane.xlu0 %2675  ;;  %v6081_v39 = vld [vmem:[%s8708_s10] ss:$0 sm:$0xff] }
 0xd1f   : > { %v2680_v47 = vsub.f32 %v2672_v41, %v2676_v46 }
 0xd20   : > { %v2684_v48 = vmul.f32 1.442695, %v2681_v45 }
 0xd21   : > { %v2682_v49 = vmul.f32 1.442695, %v2680_v47 }
 0xd22   : > { %7481 = vpow2.f32 %v2684_v48  ;;  %v3068_v48 = vld [vmem:[%s8712_s14] sm:$0xff] }
 0xd23   : > { %7483 = vpow2.f32 %v2682_v49  ;;  %v3069_v49 = vld [vmem:[%s8712_s14 + $0x8] sm:$0xff] }
 0xd2c   : > { %v7482_v50 = vpop.eup %7481 }
 0xd2d   : > { %v7484_v51 = vpop.eup %7483  ;;  %v2689_v52 = vsel %vm1048_vm4, %v7482_v50, 0.0 }
 0xd2e   : > { %2690 = vadd.xlane.f32.xlu1 %v2689_v52  ;;  %v2686_v53 = vsel %vm1044_vm3, %v7484_v51, 0.0  ;;  %v3071_v52 = vld [vmem:[%s8712_s14 + $0x18] sm:$0xff] }
 0xd2f   : > { %2687 = vadd.xlane.f32.xlu0 %v2686_v53 }
 0xdbb   : > { %v2691_v62 = vpop.xlane.xlu1 %2690 }
 0xdbc   : > { %7485 = vrcp.f32 %v2691_v62  ;;  %v2688_v63 = vpop.xlane.xlu0 %2687 }
 0xdbd   : > { %7487 = vrcp.f32 %v2688_v63 }
 0xdc6   : > { %v7486_v0 = vpop.eup %7485 }
 0xdc7   : > { %v7488_v1 = vpop.eup %7487  ;;  %v2695_v3 = vmul.f32 %v7486_v0, %v7482_v50  ;;  %v7199_v50 = vpack.c.bf16 %v3069_v49, %v3068_v48 }
 0xdc8   : > { %v2694_v2 = vmul.f32 %v7488_v1, %v7484_v51  ;;  %v3070_v51 = vld [vmem:[%s8712_s14 + $0x10] sm:$0xff] }
 0xdc9   : > { %7200 = vmatprep.subr.bf16.mxu0 %v7199_v50  ;;  %v7203_v53 = vpack.c.bf16 %v3071_v52, %v3070_v51 }
 0xdca   : > { %6741 = vmatprep.mubr.msk.f32.mxu1 %vm1044_vm3, %v2694_v2 }
 0xdcb   : > { %6742 = vmatmul.mubr.msk.f32.vlgmr.msra.gmra.mrb[18].mxu1 %vm1044_vm3, %v2695_v3 }
 0xe9e   : > { %v6743_v4 = vpop.f32.mrb[18].mxu1 }
 0xe9f   : > { %v2771_v5 = vpop.f32.mrb[19].mxu1 }
 0xea0   : > { %6746 = vmatprep.mubr.msk.f32.mxu0 %vm954_vm1, %v2771_v5 }
 0xea1   : > { %6747 = vmatmul.mubr.msk.f32.vlgmr.msra.gmra.mrb[12].mxu0 %vm954_vm1, %v6743_v4 }
 0xea2   : > { %7202 = vmatpush3.bf16.msra.mxu0 %v7199_v50 }
 0xea3   : > { %7204 = vmatprep.subr.bf16.mxu0 %v7203_v53 }
 0xea6   : > { %7206 = vmatpush3.bf16.msra.mxu0 %v7203_v53 }
 0xea7   : > { %7208 = vmatprep.subr.bf16.mxu0 %v7207_v56 }
 0xeaa   : > { %7210 = vmatpush3.bf16.msra.mxu0 %v7207_v56  ;;  %v6086_v56 = vld [vmem:[%s8713_s15] ss:$0 sm:$0xff] }
 0xeab   : > { %7212 = vmatprep.subr.bf16.mxu0 %v7211_v59 }
 0xeae   : > { %7214 = vmatpush3.bf16.msra.mxu0 %v7211_v59 }
 0xf74   : > { %v6748_v7 = vpop.f32.mrb[12].mxu0 }
 0xf75   : > { %v2873_v8 = vadd.f32 %v6748_v7, %v6080_v6  ;;  %v2854_v9 = vpop.f32.mrb[13].mxu0 }
 0xf76   : > { %v2872_v10 = vadd.f32 %v6080_v6, %v2854_v9 }
 0xf77   : > { %v2875_v11 = vadd.f32 %v2873_v8, %v7821_v19 }
 0xf78   : > { %v2874_v12 = vadd.f32 %v2872_v10, %v7819_v18  ;;  %v2922_v18 = vld [vmem:[%s8710_s12] sm:$0xff] }
 0xf79   : > { %v2882_v13 = vsel %vm2881_vm8, %v2875_v11, 0.0  ;;  %v7191_v27 = vpack.c.bf16 %v2923_v26, %v2922_v18 }
 0xf7a   : > { %2883 = vadd.xlane.f32.xlu1 %v2882_v13  ;;  %v2878_v14 = vsel %vm700_vm0, %v2874_v12, 0.0 }
 0xf7b   : > { %2879 = vadd.xlane.f32.xlu0 %v2878_v14  ;;  %7192 = vmatprep.subr.bf16.mxu1 %v7191_v27 }
 0xf7c   : > { %7194 = vmatpush3.bf16.msra.mxu1 %v7191_v27 }
 0xf7d   : > { %7196 = vmatprep.subr.bf16.mxu1 %v7195_v31 }
 0xf80   : > { %7198 = vmatpush3.bf16.msra.mxu1 %v7195_v31 }
0x1007   : > { %v2884_v15 = vpop.xlane.xlu1 %2883 }
0x1008   : > { %v2887_v16 = vmul.f32 0.03125, %v2884_v15  ;;  %v2880_v17 = vpop.xlane.xlu0 %2879 }
0x1009   : > { %v2886_v20 = vmul.f32 0.03125, %v2880_v17 }
0x100a   : > { %v2889_v21 = vsub.f32 %v2875_v11, %v2887_v16 }
0x100b   : > { %v2888_v23 = vsub.f32 %v2874_v12, %v2886_v20 }
0x100c   : > { %v2891_v24 = vmul.f32 %v2889_v21, %v2889_v21 }
0x100d   : > { %v2890_v25 = vmul.f32 %v2888_v23, %v2888_v23 }
0x100e   : > { %v2895_v22 = vsel %vm2881_vm8, %v2891_v24, 0.0 }
0x100f   : > { %2896 = vadd.xlane.f32.xlu1 %v2895_v22  ;;  %v2892_v19 = vsel %vm700_vm0, %v2890_v25, 0.0 }
0x1010   : > { %2893 = vadd.xlane.f32.xlu0 %v2892_v19 }
0x109c   : > { %v2897_v32 = vpop.xlane.xlu1 %2896 }
0x109d   : > { %v2899_v33 = vmul.f32 0.03125, %v2897_v32  ;;  %v2894_v34 = vpop.xlane.xlu0 %2893 }
0x109e   : > { %v2898_v35 = vmul.f32 0.03125, %v2894_v34 }
0x109f   : > { %v2901_v36 = vadd.f32 1e-05, %v2899_v33 }
0x10a0   : > { %v2900_v37 = vadd.f32 1e-05, %v2898_v35 }
0x10a1   : > { %7489 = vrsqrt.f32 %v2901_v36 }
0x10a2   : > { %7491 = vrsqrt.f32 %v2900_v37 }
0x10ab   : > { %v7490_v38 = vpop.eup %7489 }
0x10ac   : > { %v7492_v40 = vpop.eup %7491  ;;  %v2905_v41 = vmul.f32 %v7490_v38, %v2889_v21 }
0x10ad   : > { %v2904_v42 = vmul.f32 %v7492_v40, %v2888_v23 }
0x10ae   : > { %v2913_v44 = vmul.f32 %v6081_v39, %v2905_v41 }
0x10af   : > { %v2912_v45 = vmul.f32 %v6081_v39, %v2904_v42  ;;  %v7616_v42 = vmov -1.0  }
0x10b0   : > { %v8156_v47 = vadd.f32 %v6082_v43, %v2913_v44 }
0x10b1   : > { %v8154_v46 = vadd.f32 %v6082_v43, %v2912_v45 }
0x10b3   : > { %6757 = vmatprep.mubr.msk.f32.mxu1 %vm700_vm0, %v8154_v46 }
0x10b4   : > { %6758 = vmatmul.mubr.msk.f32.vlgmr.msra.gmra.mrb[20].mxu1 %vm700_vm0, %v8156_v47 }
0x1187   : > { %v6759_v62 = vpop.f32.mrb[20].mxu1 }
0x1188   : > { %v3011_v63 = vadd.f32 %v6759_v62, %v6083_v61  ;;  %v3005_v0 = vpop.f32.mrb[21].mxu1 }
0x1189   : > { %v3006_v1 = vadd.f32 %v6083_v61, %v3005_v0 }
0x118a   : > { %v3017_v2 = vmul.f32 0.70710677, %v3011_v63  ;;  %v3015_v53 = vmul.f32 0.5, %v3011_v63 }
0x118b   : > { %v3016_v3 = vmul.f32 0.70710677, %v3006_v1  ;;  %v3014_v51 = vmul.f32 0.5, %v3006_v1 }
0x118c   : > { %v3023_v4 = vand.u32 2147483647, %v3017_v2  ;;  %vm3019_vm9 = vcmp.ge.f32.partialorder %v3017_v2, 0.0 }
0x118d   : > { %v3022_v5 = vand.u32 2147483647, %v3016_v3  ;;  %vm3018_vm10 = vcmp.ge.f32.partialorder %v3016_v3, 0.0  ;;  %v3021_v43 = vsel %vm3019_vm9, 1.0, %v7616_v42 }
0x118e   : > { %v3025_v6 = vmul.f32 0.3275911, %v3023_v4  ;;  %v3051_v10 = vsub.f32 0.0, %v3023_v4  ;;  %v3020_v48 = vsel %vm3018_vm10, 1.0, %v7616_v42 }
0x118f   : > { %v3024_v7 = vmul.f32 0.3275911, %v3022_v5  ;;  %v3050_v11 = vsub.f32 0.0, %v3022_v5 }
0x1190   : > { %v3027_v8 = vadd.f32 1.0, %v3025_v6  ;;  %v3053_v13 = vmul.f32 %v3051_v10, %v3023_v4 }
0x1191   : > { %v3026_v9 = vadd.f32 1.0, %v3024_v7  ;;  %v3052_v16 = vmul.f32 %v3050_v11, %v3022_v5  ;;  %v6092_v11 = vld [vmem:[%s8759_s26 + $0x88] sm:$0xff] }
0x1192   : > { %7493 = vrcp.f32 %v3027_v8  ;;  %v3056_v21 = vmul.f32 1.442695, %v3053_v13  ;;  %v6107_v13 = vld [vmem:[%s8768_s0 + $0x80] sm:$0xff] }
0x1193   : > { %7495 = vrcp.f32 %v3026_v9  ;;  %v3054_v25 = vmul.f32 1.442695, %v3052_v16  ;;  %v6093_v16 = vld [vmem:[%s8759_s26 + $0x90] sm:$0xff] }
0x1194   : > { %7497 = vpow2.f32 %v3056_v21  ;;  %v6109_v21 = vld [vmem:[%s8768_s0 + $0x90] sm:$0xff] }
0x1195   : > { %7499 = vpow2.f32 %v3054_v25  ;;  %v6099_v25 = vld [vmem:[%s8758_s27 + $0x80] sm:$0xff] }
0x119c   : > { %v7494_v12 = vpop.eup %7493 }
0x119d   : > { %v7496_v14 = vpop.eup %7495  ;;  %v3033_v15 = vmul.f32 1.0614054, %v7494_v12 }
0x119e   : > { %v3032_v17 = vmul.f32 1.0614054, %v7496_v14  ;;  %v7498_v36 = vpop.eup %7497 }
0x119f   : > { %v3035_v20 = vadd.f32 -1.4531521, %v3033_v15  ;;  %v7500_v38 = vpop.eup %7499 }
0x11a0   : > { %v3034_v23 = vadd.f32 -1.4531521, %v3032_v17  ;;  %v6094_v17 = vld [vmem:[%s8759_s26 + $0x98] sm:$0xff] }
0x11a1   : > { %v3037_v24 = vmul.f32 %v7494_v12, %v3035_v20  ;;  %v7219_v20 = vpack.c.bf16 %v6094_v17, %v6093_v16 }
0x11a2   : > { %v3036_v22 = vmul.f32 %v7496_v14, %v3034_v23  ;;  %v6110_v23 = vld [vmem:[%s8768_s0 + $0x98] sm:$0xff] }
0x11a3   : > { %v3039_v19 = vadd.f32 1.4214138, %v3037_v24  ;;  %v7235_v24 = vpack.c.bf16 %v6110_v23, %v6109_v21 }
0x11a4   : > { %v3038_v18 = vadd.f32 1.4214138, %v3036_v22  ;;  %v6100_v22 = vld [vmem:[%s8758_s27 + $0x88] sm:$0xff] }
0x11a5   : > { %v3041_v26 = vmul.f32 %v7494_v12, %v3039_v19  ;;  %v7223_v19 = vpack.c.bf16 %v6100_v22, %v6099_v25  ;;  %v6144_v25 = vld [vmem:[%s8769_s7 + $0x5] ss:$0 sm:$0xff] }
0x11a6   : > { %v3040_v27 = vmul.f32 %v7496_v14, %v3038_v18 }
0x11a7   : > { %v3043_v29 = vadd.f32 -0.28449672, %v3041_v26 }
0x11a8   : > { %v3042_v30 = vadd.f32 -0.28449672, %v3040_v27 }
0x11a9   : > { %v3045_v31 = vmul.f32 %v7494_v12, %v3043_v29 }
0x11aa   : > { %v3044_v32 = vmul.f32 %v7496_v14, %v3042_v30 }
0x11ab   : > { %v3047_v33 = vadd.f32 0.2548296, %v3045_v31 }
0x11ac   : > { %v3046_v34 = vadd.f32 0.2548296, %v3044_v32 }
0x11ad   : > { %v3049_v35 = vmul.f32 %v7494_v12, %v3047_v33  ;;  %v6089_v33 = vld [vmem:[%s8714_s16] ss:$0 sm:$0xff] }
0x11ae   : > { %v3048_v37 = vmul.f32 %v7496_v14, %v3046_v34  ;;  %v6108_v14 = vld [vmem:[%s8768_s0 + $0x88] sm:$0xff] }
0x11af   : > { %v3059_v39 = vmul.f32 %v7498_v36, %v3049_v35  ;;  %v7231_v15 = vpack.c.bf16 %v6108_v14, %v6107_v13 }
0x11b0   : > { %v3058_v40 = vmul.f32 %v7500_v38, %v3048_v37  ;;  %v6090_v37 = vld [vmem:[%s8715_s17] ss:$0 sm:$0xff] }
0x11b1   : > { %v3061_v41 = vsub.f32 1.0, %v3059_v39  ;;  %7232 = vmatprep.subr.bf16.mxu0 %v7231_v15 }
0x11b2   : > { %v3060_v44 = vsub.f32 1.0, %v3058_v40  ;;  %v6101_v40 = vld [vmem:[%s8758_s27 + $0x90] sm:$0xff] }
0x11b3   : > { %v3063_v45 = vmul.f32 %v3061_v41, %v3021_v43  ;;  %v6102_v41 = vld [vmem:[%s8758_s27 + $0x98] sm:$0xff] }
0x11b4   : > { %v3062_v49 = vmul.f32 %v3060_v44, %v3020_v48  ;;  %v6112_v48 = vld [vmem:[%s8769_s7 + $0x4] ss:$0 sm:$0xff] }
0x11b5   : > { %v3065_v50 = vadd.f32 1.0, %v3063_v45  ;;  %v7227_v45 = vpack.c.bf16 %v6102_v41, %v6101_v40  ;;  %v6132_v40 = vld [vmem:[%s8758_s27 + $0xa8] sm:$0xff] }
0x11b6   : > { %v3064_v52 = vadd.f32 1.0, %v3062_v49  ;;  %v6096_v49 = vld [vmem:[%s8764_s23 + $0x4] ss:$0 sm:$0xff] }
0x11b7   : > { %v3067_v55 = vmul.f32 %v3065_v50, %v3015_v53 }
0x11b8   : > { %v3066_v54 = vmul.f32 %v3064_v52, %v3014_v51 }
0x11ba   : > { %6776 = vmatprep.mubr.msk.f32.mxu0 %vm3083_vm11, %v3066_v54 }
0x11bb   : > { %6777 = vmatmul.mubr.msk.f32.vlgmr.msra.gmra.mrb[22].mxu0 %vm3083_vm11, %v3067_v55 }
0x11bc   : > { %7234 = vmatpush3.bf16.msra.mxu0 %v7231_v15 }
0x11bd   : > { %7236 = vmatprep.subr.bf16.mxu0 %v7235_v24 }
0x11c0   : > { %7238 = vmatpush3.bf16.msra.mxu0 %v7235_v24 }
0x128e   : > { %v6778_v57 = vpop.f32.mrb[22].mxu0 }
0x128f   : > { %v3162_v58 = vadd.f32 %v6778_v57, %v6086_v56  ;;  %v3156_v59 = vpop.f32.mrb[23].mxu0 }
0x1290   : > { %v3157_v61 = vadd.f32 %v6086_v56, %v3156_v59 }
0x1291   : > { %v3166_v62 = vadd.f32 %v3162_v58, %v8156_v47  ;;  %v6104_v58 = vld [vmem:[%s8762_s24 + $0x4] ss:$0 sm:$0xff] }
0x1292   : > { %v3165_v0 = vadd.f32 %v3157_v61, %v8154_v46  ;;  %v6091_v46 = vld [vmem:[%s8759_s26 + $0x80] sm:$0xff] }
0x1293   : > { %v3172_v63 = vsel %vm2881_vm8, %v3166_v62, 0.0  ;;  %v7215_v12 = vpack.c.bf16 %v6092_v11, %v6091_v46  ;;  %v6142_v46 = vld [vmem:[%s8768_s0 + $0xb8] sm:$0xff] }
0x1294   : > { %3173 = vadd.xlane.f32.xlu1 %v3172_v63  ;;  %v3169_v1 = vsel %vm700_vm0, %v3165_v0, 0.0  ;;  %v6124_v63 = vld [vmem:[%s8759_s26 + $0xa8] sm:$0xff] }
0x1295   : > { %3170 = vadd.xlane.f32.xlu0 %v3169_v1  ;;  %7216 = vmatprep.subr.bf16.mxu1 %v7215_v12 }
0x1296   : > { %7218 = vmatpush3.bf16.msra.mxu1 %v7215_v12 }
0x1297   : > { %7220 = vmatprep.subr.bf16.mxu1 %v7219_v20 }
0x129a   : > { %7222 = vmatpush3.bf16.msra.mxu1 %v7219_v20  ;;  %v6128_v20 = vld [vmem:[%s8764_s23 + $0x5] ss:$0 sm:$0xff] }
0x129b   : > { %7224 = vmatprep.subr.bf16.mxu1 %v7223_v19 }
0x1321   : > { %v3174_v2 = vpop.xlane.xlu1 %3173 }
0x1322   : > { %v3176_v3 = vmul.f32 0.03125, %v3174_v2  ;;  %v3171_v4 = vpop.xlane.xlu0 %3170 }
0x1323   : > { %v3175_v5 = vmul.f32 0.03125, %v3171_v4  ;;  %v6125_v4 = vld [vmem:[%s8759_s26 + $0xb0] sm:$0xff] }
0x1324   : > { %v3178_v6 = vsub.f32 %v3166_v62, %v3176_v3 }
0x1325   : > { %v3177_v7 = vsub.f32 %v3165_v0, %v3175_v5  ;;  %v6123_v0 = vld [vmem:[%s8759_s26 + $0xa0] sm:$0xff]  ;;  %v6126_v5 = vld [vmem:[%s8759_s26 + $0xb8] sm:$0xff] }
0x1326   : > { %v3180_v8 = vmul.f32 %v3178_v6, %v3178_v6  ;;  %v7251_v3 = vpack.c.bf16 %v6124_v63, %v6123_v0 }
0x1327   : > { %v3179_v9 = vmul.f32 %v3177_v7, %v3177_v7 }
0x1328   : > { %v3184_v10 = vsel %vm2881_vm8, %v3180_v8, 0.0  ;;  %v6139_v8 = vld [vmem:[%s8768_s0 + $0xa0] sm:$0xff] }
0x1329   : > { %3185 = vadd.xlane.f32.xlu1 %v3184_v10  ;;  %v3181_v47 = vsel %vm700_vm0, %v3179_v9, 0.0  ;;  %v6140_v9 = vld [vmem:[%s8768_s0 + $0xa8] sm:$0xff] }
0x132a   : > { %3182 = vadd.xlane.f32.xlu0 %v3181_v47  ;;  %v7267_v10 = vpack.c.bf16 %v6140_v9, %v6139_v8  ;;  %v6141_v47 = vld [vmem:[%s8768_s0 + $0xb0] sm:$0xff] }
0x132b   : > { %v7271_v11 = vpack.c.bf16 %v6142_v46, %v6141_v47 }
0x13b6   : > { %v3186_v18 = vpop.xlane.xlu1 %3185 }
0x13b7   : > { %v3188_v26 = vmul.f32 0.03125, %v3186_v18  ;;  %v3183_v27 = vpop.xlane.xlu0 %3182 }
0x13b8   : > { %v3187_v29 = vmul.f32 0.03125, %v3183_v27 }
0x13b9   : > { %v3190_v30 = vadd.f32 1e-05, %v3188_v26 }
0x13ba   : > { %v3189_v31 = vadd.f32 1e-05, %v3187_v29 }
0x13bb   : > { %7501 = vrsqrt.f32 %v3190_v30 }
0x13bc   : > { %7503 = vrsqrt.f32 %v3189_v31 }
0x13c5   : > { %v7502_v32 = vpop.eup %7501 }
0x13c6   : > { %v7504_v34 = vpop.eup %7503  ;;  %v3194_v35 = vmul.f32 %v7502_v32, %v3178_v6 }
0x13c7   : > { %v3193_v36 = vmul.f32 %v7504_v34, %v3177_v7  ;;  %v7255_v7 = vpack.c.bf16 %v6126_v5, %v6125_v4 }
0x13c8   : > { %v3202_v38 = vmul.f32 %v6089_v33, %v3194_v35 }
0x13c9   : > { %v3201_v39 = vmul.f32 %v6089_v33, %v3193_v36 }
0x13ca   : > { %v8246_v44 = vadd.f32 %v6090_v37, %v3202_v38 }
0x13cb   : > { %v8244_v43 = vadd.f32 %v6090_v37, %v3201_v39  ;;  %v6131_v39 = vld [vmem:[%s8758_s27 + $0xa0] sm:$0xff] }
0x13cc   : > { %v7259_v41 = vpack.c.bf16 %v6132_v40, %v6131_v39 }
0x13cd   : > { %6787 = vmatprep.mubr.msk.f32.mxu1 %vm700_vm0, %v8244_v43  ;;  %6809 = vmatprep.mubr.msk.f32.mxu0 %vm700_vm0, %v8244_v43 }
0x13ce   : > { %6788 = vmatmul.mubr.msk.f32.vlgmr.msra.gmra.mrb[22].mxu1 %vm700_vm0, %v8246_v44  ;;  %6810 = vmatmul.mubr.msk.f32.vlgmr.msra.gmra.mrb[24].mxu0 %vm700_vm0, %v8246_v44 }
0x13cf   : > { %7226 = vmatpush3.bf16.msra.mxu1 %v7223_v19  ;;  %6798 = vmatprep.mubr.msk.f32.mxu1 %vm700_vm0, %v8244_v43 }
0x13d0   : > { %7228 = vmatprep.subr.bf16.mxu1 %v7227_v45 }
0x13d3   : > { %7230 = vmatpush3.bf16.msra.mxu1 %v7227_v45 }
0x13d6   : > { %6799 = vmatmul.mubr.msk.f32.vlgmr.msra.gmra.mrb[24].mxu1 %vm700_vm0, %v8246_v44 }
0x14a1   : > { %v6789_v50 = vpop.f32.mrb[22].mxu1  ;;  %v6811_v51 = vpop.f32.mrb[24].mxu0 }
0x14a2   : > { %v3478_v52 = vadd.f32 %v6811_v51, %v6112_v48  ;;  %v3296_v53 = vpop.f32.mrb[23].mxu1  ;;  %v3472_v54 = vpop.f32.mrb[25].mxu0  ;;  %v3302_v6 = vadd.f32 %v6789_v50, %v6096_v49  ;;  %v6133_v50 = vld [vmem:[%s8758_s27 + $0xb0] sm:$0xff]  ;;  %v6134_v51 = vld [vmem:[%s8758_s27 + $0xb8] sm:$0xff] }
0x14a3   : > { %v3297_v55 = vadd.f32 %v6096_v49, %v3296_v53  ;;  %v3473_v56 = vadd.f32 %v6112_v48, %v3472_v54 }
0x14a5   : > { %v7245_v57 = vpack.c.bf16 %v3478_v52, %v3473_v56  ;;  %6816 = vmatprep.mubr.msk.f32.mxu1 %vm954_vm1, %v3297_v55  ;;  %v7263_v55 = vpack.c.bf16 %v6134_v51, %v6133_v50 }
0x14a7   : > { %7247 = vmatprep.subr.msk.bf16.mxu0 %vm7874_vm7, %v7245_v57 }
0x14a8   : > { %7250 = vmatpush3.bf16.msk.msra.mxu0 %vm7874_vm7, %v7245_v57 }
0x14a9   : > { %v6800_v59 = vpop.f32.mrb[24].mxu1  ;;  %7260 = vmatprep.subr.bf16.mxu0 %v7259_v41 }
0x14aa   : > { %v3390_v61 = vadd.f32 %v6800_v59, %v6104_v58  ;;  %v3384_v62 = vpop.f32.mrb[25].mxu1  ;;  %v6136_v59 = vld [vmem:[%s8762_s24 + $0x5] ss:$0 sm:$0xff] }
0x14ab   : > { %v3385_v1 = vadd.f32 %v6104_v58, %v3384_v62 }
0x14ad   : > { %v7239_v2 = vpack.c.bf16 %v3390_v61, %v3385_v1 }
0x14af   : > { %7241 = vmatprep.subr.msk.bf16.mxu1 %vm7841_vm2, %v7239_v2 }
0x14b0   : > { %7244 = vmatpush3.bf16.xpose.msk.msra.mxu1 %vm7841_vm2, %v7239_v2 }
0x14b1   : > { %7252 = vmatprep.subr.bf16.mxu1 %v7251_v3 }
0x14b7   : > { %6817 = vmatmul.mubr.msk.f32.vlgmr.msra.gmra.mrb[26].mxu1 %vm954_vm1, %v3302_v6 }
0x14b8   : > { %7254 = vmatpush3.bf16.msra.mxu1 %v7251_v3  ;;  %6834 = vmatprep.mubr.msk.f32.mxu1 %vm700_vm0, %v8244_v43 }
0x14b9   : > { %7256 = vmatprep.subr.bf16.mxu1 %v7255_v7 }
0x14bc   : > { %7258 = vmatpush3.bf16.msra.mxu1 %v7255_v7 }
0x14bd   : > { %7268 = vmatprep.subr.bf16.mxu1 %v7267_v10 }
0x14bf   : > { %6835 = vmatmul.mubr.msk.f32.vlgmr.msra.gmra.mrb[28].mxu1 %vm700_vm0, %v8246_v44 }
0x14c0   : > { %7270 = vmatpush3.bf16.msra.mxu1 %v7267_v10  ;;  %6856 = vmatprep.mubr.msk.f32.mxu1 %vm700_vm0, %v8244_v43 }
0x14c1   : > { %7272 = vmatprep.subr.bf16.mxu1 %v7271_v11 }
0x14c4   : > { %7274 = vmatpush3.bf16.msra.mxu1 %v7271_v11 }
0x14c7   : > { %6857 = vmatmul.mubr.msk.f32.vlgmr.msra.gmra.mrb[30].mxu1 %vm700_vm0, %v8246_v44 }
0x158a   : > { %v6818_v12 = vpop.f32.mrb[26].mxu1 }
0x158b   : > { %v3569_v13 = vmul.f32 0.35355338, %v6818_v12  ;;  %v3559_v14 = vpop.f32.mrb[27].mxu1 }
0x158c   : > { %v3568_v15 = vmul.f32 0.35355338, %v3559_v14 }
0x158d   : > { %v3573_v16 = vsel %vm1048_vm4, %v3569_v13, -inf }
0x158e   : > { %3574 = vmax.xlane.f32.xlu1 %v3573_v16  ;;  %v3570_v17 = vsel %vm1044_vm3, %v3568_v15, -inf  ;;  %v6159_v16 = vld [vmem:[%s8759_s26 + $0xc0] sm:$0xff] }
0x158f   : > { %3571 = vmax.xlane.f32.xlu0 %v3570_v17  ;;  %v6160_v17 = vld [vmem:[%s8759_s26 + $0xc8] sm:$0xff] }
0x1592   : > { %v6836_v21 = vpop.f32.mrb[28].mxu1 }
0x1593   : > { %v3763_v23 = vadd.f32 %v6836_v21, %v6128_v20  ;;  %v3757_v24 = vpop.f32.mrb[29].mxu1  ;;  %v6154_v21 = vld [vmem:[%s8772_s8 + $0x28] sm:$0xff] }
0x1594   : > { %v3758_v56 = vadd.f32 %v6128_v20, %v3757_v24  ;;  %v7287_v20 = vpack.c.bf16 %v6160_v17, %v6159_v16 }
0x159a   : > { %v6858_v22 = vpop.f32.mrb[30].mxu1 }
0x159b   : > { %v3939_v19 = vadd.f32 %v6858_v22, %v6144_v25  ;;  %v3933_v18 = vpop.f32.mrb[31].mxu1  ;;  %v6161_v22 = vld [vmem:[%s8759_s26 + $0xd0] sm:$0xff] }
0x159c   : > { %v3934_v26 = vadd.f32 %v6144_v25, %v3933_v18 }
0x159e   : > { %v7281_v27 = vpack.c.bf16 %v3939_v19, %v3934_v26  ;;  %v6162_v19 = vld [vmem:[%s8759_s26 + $0xd8] sm:$0xff] }
0x15a0   : > { %7283 = vmatprep.subr.msk.bf16.mxu1 %vm7874_vm7, %v7281_v27 }
0x15a1   : > { %7286 = vmatpush3.bf16.msk.msra.mxu1 %vm7874_vm7, %v7281_v27 }
0x15a2   : > { %7288 = vmatprep.subr.bf16.mxu1 %v7287_v20 }
0x161b   : > { %v3575_v29 = vpop.xlane.xlu1 %3574 }
0x161c   : > { %v3577_v30 = vsub.f32 %v3569_v13, %v3575_v29  ;;  %v3572_v31 = vpop.xlane.xlu0 %3571  ;;  %v7291_v29 = vpack.c.bf16 %v6162_v19, %v6161_v22 }
0x161d   : > { %v3576_v32 = vsub.f32 %v3568_v15, %v3572_v31  ;;  %v6176_v31 = vld [vmem:[%s8768_s0 + $0xc8] sm:$0xff] }
0x161e   : > { %v3580_v33 = vmul.f32 1.442695, %v3577_v30  ;;  %v6175_v30 = vld [vmem:[%s8768_s0 + $0xc0] sm:$0xff] }
0x161f   : > { %v3578_v34 = vmul.f32 1.442695, %v3576_v32  ;;  %v7303_v32 = vpack.c.bf16 %v6176_v31, %v6175_v30 }
0x1620   : > { %7505 = vpow2.f32 %v3580_v33  ;;  %v6177_v33 = vld [vmem:[%s8768_s0 + $0xd0] sm:$0xff] }
0x1621   : > { %7507 = vpow2.f32 %v3578_v34  ;;  %v6178_v34 = vld [vmem:[%s8768_s0 + $0xd8] sm:$0xff] }
0x162a   : > { %v7506_v35 = vpop.eup %7505 }
0x162b   : > { %v7508_v36 = vpop.eup %7507  ;;  %v3585_v37 = vsel %vm1048_vm4, %v7506_v35, 0.0 }
0x162c   : > { %3586 = vadd.xlane.f32.xlu1 %v3585_v37  ;;  %v3582_v38 = vsel %vm1044_vm3, %v7508_v36, 0.0  ;;  %v6167_v37 = vld [vmem:[%s8758_s27 + $0xc0] sm:$0xff] }
0x162d   : > { %3583 = vadd.xlane.f32.xlu0 %v3582_v38  ;;  %v6168_v38 = vld [vmem:[%s8758_s27 + $0xc8] sm:$0xff] }
0x16b9   : > { %v3587_v45 = vpop.xlane.xlu1 %3586 }
0x16ba   : > { %7509 = vrcp.f32 %v3587_v45  ;;  %v3584_v48 = vpop.xlane.xlu0 %3583  ;;  %v6164_v45 = vld [vmem:[%s8764_s23 + $0x6] ss:$0 sm:$0xff] }
0x16bb   : > { %7511 = vrcp.f32 %v3584_v48  ;;  %v6169_v48 = vld [vmem:[%s8758_s27 + $0xd0] sm:$0xff] }
0x16c4   : > { %v7510_v49 = vpop.eup %7509 }
0x16c5   : > { %v7512_v52 = vpop.eup %7511  ;;  %v3591_v54 = vmul.f32 %v7510_v49, %v7506_v35  ;;  %v7307_v35 = vpack.c.bf16 %v6178_v34, %v6177_v33  ;;  %v6170_v49 = vld [vmem:[%s8758_s27 + $0xd8] sm:$0xff]  ;;  %v6210_v33 = vld [vmem:[%s8768_s0 + $0xe8] sm:$0xff] }
0x16c6   : > { %v3590_v53 = vmul.f32 %v7512_v52, %v7508_v36  ;;  %v6122_v36 = vld [vmem:[%s8772_s8 + $0x20] sm:$0xff] }
0x16c8   : > { %6823 = vmatprep.mubr.msk.f32.mxu0 %vm1044_vm3, %v3590_v53  ;;  %v7299_v53 = vpack.c.bf16 %v6170_v49, %v6169_v48 }
0x16c9   : > { %6824 = vmatmul.mubr.msk.f32.vlgmr.msra.gmra.mrb[26].mxu0 %vm1044_vm3, %v3591_v54  ;;  %v6180_v54 = vld [vmem:[%s8769_s7 + $0x6] ss:$0 sm:$0xff] }
0x16ca   : > { %7262 = vmatpush3.bf16.msra.mxu0 %v7259_v41  ;;  %6845 = vmatprep.mubr.msk.f32.mxu0 %vm700_vm0, %v8244_v43  ;;  %v7295_v41 = vpack.c.bf16 %v6168_v38, %v6167_v37  ;;  %v6201_v38 = vld [vmem:[%s8758_s27 + $0xe0] sm:$0xff] }
0x16cb   : > { %7264 = vmatprep.subr.bf16.mxu0 %v7263_v55 }
0x16ce   : > { %7266 = vmatpush3.bf16.msra.mxu0 %v7263_v55 }
0x16d1   : > { %6846 = vmatmul.mubr.msk.f32.vlgmr.msra.gmra.mrb[28].mxu0 %vm700_vm0, %v8246_v44 }
0x16d2   : > { %6863 = vmatprep.mubr.msk.f32.mxu0 %vm954_vm1, %v3758_v56 }
0x179c   : > { %v8344_v57 = vpop.f32.mrb[26].mxu0 }
0x179d   : > { %v8346_v58 = vpop.f32.mrb[27].mxu0 }
0x17a4   : > { %v6847_v61 = vpop.f32.mrb[28].mxu0 }
0x17a5   : > { %v3851_v62 = vadd.f32 %v6847_v61, %v6136_v59  ;;  %v3845_v0 = vpop.f32.mrb[29].mxu0 }
0x17a6   : > { %v3846_v63 = vadd.f32 %v6136_v59, %v3845_v0 }
0x17a8   : > { %v7275_v1 = vpack.c.bf16 %v3851_v62, %v3846_v63 }
0x17aa   : > { %7277 = vmatprep.subr.msk.bf16.mxu0 %vm7841_vm2, %v7275_v1 }
0x17ab   : > { %7280 = vmatpush3.bf16.xpose.msk.msra.mxu0 %vm7841_vm2, %v7275_v1 }
0x17ac   : > { %6873 = vmatprep.subr.mxu0 %v6154_v21 }
0x17b2   : > { %6864 = vmatmul.mubr.msk.f32.vlgmr.msra.gmra.mrb[30].mxu0 %vm954_vm1, %v3763_v23 }
0x17b3   : > { %6874 = vmatpush3.msra.mxu0 %v6154_v21  ;;  %v6194_v21 = vld [vmem:[%s8759_s26 + $0xe8] sm:$0xff] }
0x17b4   : > { %6878 = vmatprep.subr.mxu0 %v6122_v36 }
0x1885   : > { %v6865_v2 = vpop.f32.mrb[30].mxu0 }
0x1886   : > { %v4030_v3 = vmul.f32 0.35355338, %v6865_v2  ;;  %v4020_v4 = vpop.f32.mrb[31].mxu0 }
0x1887   : > { %v4029_v5 = vmul.f32 0.35355338, %v4020_v4 }
0x1888   : > { %v4034_v6 = vsel %vm1048_vm4, %v4030_v3, -inf }
0x1889   : > { %4035 = vmax.xlane.f32.xlu1 %v4034_v6  ;;  %v4031_v7 = vsel %vm1044_vm3, %v4029_v5, -inf }
0x188a   : > { %4032 = vmax.xlane.f32.xlu0 %v4031_v7 }
0x1916   : > { %v4036_v8 = vpop.xlane.xlu1 %4035 }
0x1917   : > { %v4038_v9 = vsub.f32 %v4030_v3, %v4036_v8  ;;  %v4033_v10 = vpop.xlane.xlu0 %4032 }
0x1918   : > { %v4037_v47 = vsub.f32 %v4029_v5, %v4033_v10 }
0x1919   : > { %v4041_v46 = vmul.f32 1.442695, %v4038_v9 }
0x191a   : > { %v4039_v11 = vmul.f32 1.442695, %v4037_v47 }
0x191b   : > { %7513 = vpow2.f32 %v4041_v46 }
0x191c   : > { %7515 = vpow2.f32 %v4039_v11 }
0x1925   : > { %v7514_v12 = vpop.eup %7513 }
0x1926   : > { %v7516_v13 = vpop.eup %7515  ;;  %v4046_v14 = vsel %vm1048_vm4, %v7514_v12, 0.0 }
0x1927   : > { %4047 = vadd.xlane.f32.xlu1 %v4046_v14  ;;  %v4043_v15 = vsel %vm1044_vm3, %v7516_v13, 0.0 }
0x1928   : > { %4044 = vadd.xlane.f32.xlu0 %v4043_v15 }
0x19b4   : > { %v4048_v23 = vpop.xlane.xlu1 %4047 }
0x19b5   : > { %7517 = vrcp.f32 %v4048_v23  ;;  %v4045_v24 = vpop.xlane.xlu0 %4044 }
0x19b6   : > { %7519 = vrcp.f32 %v4045_v24  ;;  %v6190_v24 = vld [vmem:[%s8772_s8 + $0x30] sm:$0xff] }
0x19bf   : > { %v7518_v25 = vpop.eup %7517 }
0x19c0   : > { %v7520_v18 = vpop.eup %7519  ;;  %v4052_v27 = vmul.f32 %v7518_v25, %v7514_v12 }
0x19c1   : > { %v4051_v26 = vmul.f32 %v7520_v18, %v7516_v13  ;;  %v6195_v18 = vld [vmem:[%s8759_s26 + $0xf0] sm:$0xff] }
0x19c3   : > { %6870 = vmatprep.mubr.msk.f32.mxu1 %vm1044_vm3, %v4051_v26  ;;  %v6196_v26 = vld [vmem:[%s8759_s26 + $0xf8] sm:$0xff] }
0x19c4   : > { %6871 = vmatmul.mubr.msk.f32.vlgmr.msra.gmra.mrb[32].mxu1 %vm1044_vm3, %v4052_v27  ;;  %v7327_v31 = vpack.c.bf16 %v6196_v26, %v6195_v18  ;;  %v6228_v26 = vld [vmem:[%s8707_s9 + $0x1] ss:$0 sm:$0xff] }
0x19c5   : > { %7290 = vmatpush3.bf16.msra.mxu1 %v7287_v20  ;;  %6891 = vmatprep.mubr.msk.f32.mxu1 %vm700_vm0, %v8244_v43  ;;  %v6193_v20 = vld [vmem:[%s8759_s26 + $0xe0] sm:$0xff] }
0x19c6   : > { %7292 = vmatprep.subr.bf16.mxu1 %v7291_v29  ;;  %v7323_v23 = vpack.c.bf16 %v6194_v21, %v6193_v20 }
0x19c9   : > { %7294 = vmatpush3.bf16.msra.mxu1 %v7291_v29 }
0x19ca   : > { %7304 = vmatprep.subr.bf16.mxu1 %v7303_v32 }
0x19cc   : > { %6892 = vmatmul.mubr.msk.f32.vlgmr.msra.gmra.mrb[34].mxu1 %vm700_vm0, %v8246_v44 }
0x19cd   : > { %7306 = vmatpush3.bf16.msra.mxu1 %v7303_v32  ;;  %6913 = vmatprep.mubr.msk.f32.mxu1 %vm700_vm0, %v8244_v43  ;;  %v6209_v32 = vld [vmem:[%s8768_s0 + $0xe0] sm:$0xff] }
0x19ce   : > { %7308 = vmatprep.subr.bf16.mxu1 %v7307_v35  ;;  %v7339_v34 = vpack.c.bf16 %v6210_v33, %v6209_v32 }
0x19d1   : > { %7310 = vmatpush3.bf16.msra.mxu1 %v7307_v35  ;;  %v6211_v35 = vld [vmem:[%s8768_s0 + $0xf0] sm:$0xff] }
0x19d4   : > { %6914 = vmatmul.mubr.msk.f32.vlgmr.msra.gmra.mrb[36].mxu1 %vm700_vm0, %v8246_v44 }
0x1a97   : > { %v6872_v39 = vpop.f32.mrb[32].mxu1 }
0x1a98   : > { %v4128_v40 = vpop.f32.mrb[33].mxu1 }
0x1a99   : > { %6875 = vmatprep.mubr.msk.f32.mxu0 %vm954_vm1, %v4128_v40 }
0x1a9a   : > { %6876 = vmatmul.mubr.msk.f32.vlgmr.msra.gmra.mrb[32].mxu0 %vm954_vm1, %v6872_v39  ;;  %v6202_v39 = vld [vmem:[%s8758_s27 + $0xe8] sm:$0xff] }
0x1a9b   : > { %6879 = vmatpush3.msra.mxu0 %v6122_v36  ;;  %6880 = vmatprep.mubr.msk.f32.mxu0 %vm954_vm1, %v8346_v58  ;;  %v6212_v36 = vld [vmem:[%s8768_s0 + $0xf8] sm:$0xff]  ;;  %v7331_v40 = vpack.c.bf16 %v6202_v39, %v6201_v38  ;;  %s8775_s0 = sld [smem:[#allocation22_spill]] }
0x1a9c   : > { %7296 = vmatprep.subr.bf16.mxu0 %v7295_v41  ;;  %v7343_v37 = vpack.c.bf16 %v6212_v36, %v6211_v35 }
0x1a9f   : > { %v6893_v50 = vpop.f32.mrb[34].mxu1 }
0x1aa0   : > { %v4386_v51 = vadd.f32 %v6893_v50, %v6164_v45  ;;  %v4380_v52 = vpop.f32.mrb[35].mxu1 }
0x1aa1   : > { %v4381_v59 = vadd.f32 %v6164_v45, %v4380_v52  ;;  %v6204_v45 = vld [vmem:[%s8758_s27 + $0xf8] sm:$0xff] }
0x1aa2   : > { %6881 = vmatmul.mubr.msk.f32.vlgmr.msra.gmra.mrb[32].mxu0 %vm954_vm1, %v8344_v57  ;;  %v6172_v57 = vld [vmem:[%s8762_s24 + $0x6] ss:$0 sm:$0xff] }
0x1aa3   : > { %7298 = vmatpush3.bf16.msra.mxu0 %v7295_v41  ;;  %6902 = vmatprep.mubr.msk.f32.mxu0 %vm700_vm0, %v8244_v43  ;;  %v6203_v41 = vld [vmem:[%s8758_s27 + $0xf0] sm:$0xff] }
0x1aa4   : > { %7300 = vmatprep.subr.bf16.mxu0 %v7299_v53  ;;  %v7335_v50 = vpack.c.bf16 %v6204_v45, %v6203_v41 }
0x1aa7   : > { %7302 = vmatpush3.bf16.msra.mxu0 %v7299_v53  ;;  %v6915_v55 = vpop.f32.mrb[36].mxu1 }
0x1aa8   : > { %v4562_v56 = vadd.f32 %v6915_v55, %v6180_v54  ;;  %v4556_v58 = vpop.f32.mrb[37].mxu1 }
0x1aa9   : > { %v4557_v61 = vadd.f32 %v6180_v54, %v4556_v58 }
0x1aaa   : > { %6903 = vmatmul.mubr.msk.f32.vlgmr.msra.gmra.mrb[34].mxu0 %vm700_vm0, %v8246_v44 }
0x1aab   : > { %v7317_v62 = vpack.c.bf16 %v4562_v56, %v4557_v61  ;;  %6920 = vmatprep.mubr.msk.f32.mxu0 %vm954_vm1, %v4381_v59  ;;  %v6214_v56 = vld [vmem:[%s8769_s7 + $0x7] ss:$0 sm:$0xff]  ;;  %s8656_s7 = scalar_lea.hbm %s8775_s0, %s6259_s21 }
0x1aad   : > { %7319 = vmatprep.subr.msk.bf16.mxu1 %vm7874_vm7, %v7317_v62 }
0x1aae   : > { %7322 = vmatpush3.bf16.msk.msra.mxu1 %vm7874_vm7, %v7317_v62 }
0x1aaf   : > { %7324 = vmatprep.subr.bf16.mxu1 %v7323_v23 }
0x1b7d   : > { %v6904_v0 = vpop.f32.mrb[34].mxu0 }
0x1b7e   : > { %v4474_v63 = vadd.f32 %v6904_v0, %v6172_v57  ;;  %v4468_v1 = vpop.f32.mrb[35].mxu0  ;;  %v6206_v0 = vld [vmem:[%s8762_s24 + $0x7] ss:$0 sm:$0xff] }
0x1b7f   : > { %v4469_v2 = vadd.f32 %v6172_v57, %v4468_v1 }
0x1b81   : > { %v7311_v3 = vpack.c.bf16 %v4474_v63, %v4469_v2 }
0x1b83   : > { %7313 = vmatprep.subr.msk.bf16.mxu0 %vm7841_vm2, %v7311_v3 }
0x1b84   : > { %7316 = vmatpush3.bf16.xpose.msk.msra.mxu0 %vm7841_vm2, %v7311_v3 }
0x1b85   : > { %6930 = vmatprep.subr.mxu0 %v6190_v24 }
0x1b8b   : > { %6921 = vmatmul.mubr.msk.f32.vlgmr.msra.gmra.mrb[36].mxu0 %vm954_vm1, %v4386_v51  ;;  %v6198_v51 = vld [vmem:[%s8764_s23 + $0x7] ss:$0 sm:$0xff] }
0x1b8c   : > { %6931 = vmatpush3.msra.mxu0 %v6190_v24 }
0x1b8d   : > { %7332 = vmatprep.subr.bf16.mxu0 %v7331_v40 }
0x1c5e   : > { %v6922_v4 = vpop.f32.mrb[36].mxu0 }
0x1c5f   : > { %v4653_v5 = vmul.f32 0.35355338, %v6922_v4  ;;  %v4643_v6 = vpop.f32.mrb[37].mxu0 }
0x1c60   : > { %v4652_v7 = vmul.f32 0.35355338, %v4643_v6 }
0x1c61   : > { %v4657_v8 = vsel %vm1048_vm4, %v4653_v5, -inf }
0x1c62   : > { %4658 = vmax.xlane.f32.xlu1 %v4657_v8  ;;  %v4654_v9 = vsel %vm1044_vm3, %v4652_v7, -inf }
0x1c63   : > { %4655 = vmax.xlane.f32.xlu0 %v4654_v9 }
0x1cef   : > { %v4659_v10 = vpop.xlane.xlu1 %4658 }
0x1cf0   : > { %v4661_v47 = vsub.f32 %v4653_v5, %v4659_v10  ;;  %v4656_v46 = vpop.xlane.xlu0 %4655 }
0x1cf1   : > { %v4660_v11 = vsub.f32 %v4652_v7, %v4656_v46 }
0x1cf2   : > { %v4664_v12 = vmul.f32 1.442695, %v4661_v47 }
0x1cf3   : > { %v4662_v13 = vmul.f32 1.442695, %v4660_v11 }
0x1cf4   : > { %7521 = vpow2.f32 %v4664_v12 }
0x1cf5   : > { %7523 = vpow2.f32 %v4662_v13 }
0x1cfe   : > { %v7522_v14 = vpop.eup %7521 }
0x1cff   : > { %v7524_v15 = vpop.eup %7523  ;;  %v4669_v16 = vsel %vm1048_vm4, %v7522_v14, 0.0 }
0x1d00   : > { %4670 = vadd.xlane.f32.xlu1 %v4669_v16  ;;  %v4666_v17 = vsel %vm1044_vm3, %v7524_v15, 0.0 }
0x1d01   : > { %4667 = vadd.xlane.f32.xlu0 %v4666_v17  ;;  %v6224_v17 = vld [vmem:[%s8772_s8 + $0x38] sm:$0xff]  ;;  %s5887_s8 = scalar_lea.sflag [#allocation3], %s674_s22 }
0x1d8d   : > { %v4671_v25 = vpop.xlane.xlu1 %4670 }
0x1d8e   : > { %7525 = vrcp.f32 %v4671_v25  ;;  %v4668_v22 = vpop.xlane.xlu0 %4667 }
0x1d8f   : > { %7527 = vrcp.f32 %v4668_v22 }
0x1d98   : > { %v7526_v19 = vpop.eup %7525 }
0x1d99   : > { %v7528_v27 = vpop.eup %7527  ;;  %v4675_v30 = vmul.f32 %v7526_v19, %v7522_v14 }
0x1d9a   : > { %v4674_v29 = vmul.f32 %v7528_v27, %v7524_v15 }
0x1d9c   : > { %6927 = vmatprep.mubr.msk.f32.mxu1 %vm1044_vm3, %v4674_v29 }
0x1d9d   : > { %6928 = vmatmul.mubr.msk.f32.vlgmr.msra.gmra.mrb[38].mxu1 %vm1044_vm3, %v4675_v30 }
0x1d9e   : > { %7326 = vmatpush3.bf16.msra.mxu1 %v7323_v23  ;;  %6943 = vmatprep.mubr.msk.f32.mxu1 %vm700_vm0, %v8244_v43 }
0x1d9f   : > { %7328 = vmatprep.subr.bf16.mxu1 %v7327_v31 }
0x1da2   : > { %7330 = vmatpush3.bf16.msra.mxu1 %v7327_v31 }
0x1da3   : > { %7340 = vmatprep.subr.bf16.mxu1 %v7339_v34 }
0x1da5   : > { %6944 = vmatmul.mubr.msk.f32.vlgmr.msra.gmra.mrb[40].mxu1 %vm700_vm0, %v8246_v44 }
0x1da6   : > { %7342 = vmatpush3.bf16.msra.mxu1 %v7339_v34  ;;  %6965 = vmatprep.mubr.msk.f32.mxu1 %vm700_vm0, %v8244_v43 }
0x1da7   : > { %7344 = vmatprep.subr.bf16.mxu1 %v7343_v37 }
0x1daa   : > { %7346 = vmatpush3.bf16.msra.mxu1 %v7343_v37 }
0x1dad   : > { %6966 = vmatmul.mubr.msk.f32.vlgmr.msra.gmra.mrb[42].mxu1 %vm700_vm0, %v8246_v44 }
0x1e70   : > { %v6929_v48 = vpop.f32.mrb[38].mxu1 }
0x1e71   : > { %v4751_v49 = vpop.f32.mrb[39].mxu1 }
0x1e72   : > { %6932 = vmatprep.mubr.msk.f32.mxu0 %vm954_vm1, %v4751_v49 }
0x1e73   : > { %6933 = vmatmul.mubr.msk.f32.vlgmr.msra.gmra.mrb[32].mxu0 %vm954_vm1, %v6929_v48 }
0x1e74   : > { %7334 = vmatpush3.bf16.msra.mxu0 %v7331_v40  ;;  %6954 = vmatprep.mubr.msk.f32.mxu0 %vm700_vm0, %v8244_v43 }
0x1e75   : > { %7336 = vmatprep.subr.bf16.mxu0 %v7335_v50 }
0x1e78   : > { %v6945_v52 = vpop.f32.mrb[40].mxu1  ;;  %7338 = vmatpush3.bf16.msra.mxu0 %v7335_v50  ;;  %v6234_v50 = vld [vmem:[%s8710_s12 + $0x28] sm:$0xff] }
0x1e79   : > { %v4930_v53 = vadd.f32 %v6945_v52, %v6198_v51  ;;  %v4924_v54 = vpop.f32.mrb[41].mxu1  ;;  %v6235_v52 = vld [vmem:[%s8710_s12 + $0x30] sm:$0xff] }
0x1e7a   : > { %v4925_v55 = vadd.f32 %v6198_v51, %v4924_v54 }
0x1e7b   : > { %6955 = vmatmul.mubr.msk.f32.vlgmr.msra.gmra.mrb[38].mxu0 %vm700_vm0, %v8246_v44 }
0x1e7c   : > { %6972 = vmatprep.mubr.msk.f32.mxu0 %vm954_vm1, %v4925_v55 }
0x1e80   : > { %v6967_v58 = vpop.f32.mrb[42].mxu1 }
0x1e81   : > { %v5106_v59 = vadd.f32 %v6967_v58, %v6214_v56  ;;  %v5100_v61 = vpop.f32.mrb[43].mxu1 }
0x1e82   : > { %v5101_v62 = vadd.f32 %v6214_v56, %v5100_v61 }
0x1e84   : > { %v7353_v57 = vpack.c.bf16 %v5106_v59, %v5101_v62 }
0x1e86   : > { %7355 = vmatprep.subr.msk.bf16.mxu1 %vm7874_vm7, %v7353_v57 }
0x1e87   : > { %7358 = vmatpush3.bf16.msk.msra.mxu1 %vm7874_vm7, %v7353_v57 }
0x1f4e   : > { %v6956_v63 = vpop.f32.mrb[38].mxu0 }
0x1f4f   : > { %v5018_v1 = vadd.f32 %v6956_v63, %v6206_v0  ;;  %v5012_v2 = vpop.f32.mrb[39].mxu0 }
0x1f50   : > { %v5013_v3 = vadd.f32 %v6206_v0, %v5012_v2  ;;  %v6231_v0 = vld [vmem:[%s8708_s10 + $0x1] ss:$0 sm:$0xff] }
0x1f52   : > { %v7347_v4 = vpack.c.bf16 %v5018_v1, %v5013_v3  ;;  %v6232_v3 = vld [vmem:[%s8709_s11 + $0x1] ss:$0 sm:$0xff] }
0x1f54   : > { %7349 = vmatprep.subr.msk.bf16.mxu0 %vm7841_vm2, %v7347_v4 }
0x1f55   : > { %7352 = vmatpush3.bf16.xpose.msk.msra.mxu0 %vm7841_vm2, %v7347_v4 }
0x1f56   : > { %6982 = vmatprep.subr.mxu0 %v6224_v17 }
0x1f5c   : > { %6973 = vmatmul.mubr.msk.f32.vlgmr.msra.gmra.mrb[40].mxu0 %vm954_vm1, %v4930_v53  ;;  %v6236_v53 = vld [vmem:[%s8710_s12 + $0x38] sm:$0xff] }
0x1f5d   : > { %6983 = vmatpush3.msra.mxu0 %v6224_v17  ;;  %v7363_v54 = vpack.c.bf16 %v6236_v53, %v6235_v52 }
0x202f   : > { %v6974_v5 = vpop.f32.mrb[40].mxu0 }
0x2030   : > { %v5197_v60 = vmul.f32 0.35355338, %v6974_v5  ;;  %v5187_v6 = vpop.f32.mrb[41].mxu0 }
0x2031   : > { %v5196_v7 = vmul.f32 0.35355338, %v5187_v6 }
0x2032   : > { %v5201_v8 = vsel %vm1048_vm4, %v5197_v60, -inf }
0x2033   : > { %5202 = vmax.xlane.f32.xlu1 %v5201_v8  ;;  %v5198_v9 = vsel %vm1044_vm3, %v5196_v7, -inf  ;;  %v6242_v8 = vld [vmem:[%s8712_s14 + $0x48] sm:$0xff] }
0x2034   : > { %5199 = vmax.xlane.f32.xlu0 %v5198_v9 }
0x20c0   : > { %v5203_v10 = vpop.xlane.xlu1 %5202 }
0x20c1   : > { %v5205_v47 = vsub.f32 %v5197_v60, %v5203_v10  ;;  %v5200_v46 = vpop.xlane.xlu0 %5199  ;;  %v6243_v10 = vld [vmem:[%s8712_s14 + $0x50] sm:$0xff] }
0x20c2   : > { %v5204_v11 = vsub.f32 %v5196_v7, %v5200_v46  ;;  %v6241_v7 = vld [vmem:[%s8712_s14 + $0x40] sm:$0xff] }
0x20c3   : > { %v5208_v12 = vmul.f32 1.442695, %v5205_v47  ;;  %v7367_v9 = vpack.c.bf16 %v6242_v8, %v6241_v7  ;;  %v6244_v47 = vld [vmem:[%s8712_s14 + $0x58] sm:$0xff] }
0x20c4   : > { %v5206_v13 = vmul.f32 1.442695, %v5204_v11  ;;  %v7371_v46 = vpack.c.bf16 %v6244_v47, %v6243_v10  ;;  %v6245_v11 = vld [vmem:[%s8712_s14 + $0x60] sm:$0xff] }
0x20c5   : > { %7529 = vpow2.f32 %v5208_v12  ;;  %7368 = vmatprep.subr.bf16.mxu0 %v7367_v9  ;;  %v6246_v12 = vld [vmem:[%s8712_s14 + $0x68] sm:$0xff] }
0x20c6   : > { %7531 = vpow2.f32 %v5206_v13  ;;  %v7375_v13 = vpack.c.bf16 %v6246_v12, %v6245_v11 }
0x20cf   : > { %v7530_v28 = vpop.eup %7529 }
0x20d0   : > { %v7532_v14 = vpop.eup %7531  ;;  %v5213_v15 = vsel %vm1048_vm4, %v7530_v28, 0.0 }
0x20d1   : > { %5214 = vadd.xlane.f32.xlu1 %v5213_v15  ;;  %v5210_v16 = vsel %vm1044_vm3, %v7532_v14, 0.0 }
0x20d2   : > { %5211 = vadd.xlane.f32.xlu0 %v5210_v16  ;;  %v6238_v16 = vld [vmem:[%s8711_s13 + $0x1] ss:$0 sm:$0xff] }
0x215e   : > { %v5215_v20 = vpop.xlane.xlu1 %5214 }
0x215f   : > { %7533 = vrcp.f32 %v5215_v20  ;;  %v5212_v21 = vpop.xlane.xlu0 %5211 }
0x2160   : > { %7535 = vrcp.f32 %v5212_v21 }
0x2169   : > { %v7534_v23 = vpop.eup %7533 }
0x216a   : > { %v7536_v24 = vpop.eup %7535  ;;  %v5219_v22 = vmul.f32 %v7534_v23, %v7530_v28  ;;  %v6247_v28 = vld [vmem:[%s8712_s14 + $0x70] sm:$0xff] }
0x216b   : > { %v5218_v25 = vmul.f32 %v7536_v24, %v7532_v14  ;;  %v6248_v14 = vld [vmem:[%s8712_s14 + $0x78] sm:$0xff] }
0x216c   : > { %v7379_v15 = vpack.c.bf16 %v6248_v14, %v6247_v28 }
0x216d   : > { %6979 = vmatprep.mubr.msk.f32.mxu1 %vm1044_vm3, %v5218_v25 }
0x216e   : > { %6980 = vmatmul.mubr.msk.f32.vlgmr.msra.gmra.mrb[44].mxu1 %vm1044_vm3, %v5219_v22 }
0x2241   : > { %v6981_v19 = vpop.f32.mrb[44].mxu1 }
0x2242   : > { %v5295_v18 = vpop.f32.mrb[45].mxu1 }
0x2243   : > { %6984 = vmatprep.mubr.msk.f32.mxu0 %vm954_vm1, %v5295_v18 }
0x2244   : > { %6985 = vmatmul.mubr.msk.f32.vlgmr.msra.gmra.mrb[32].mxu0 %vm954_vm1, %v6981_v19 }
0x2245   : > { %7370 = vmatpush3.bf16.msra.mxu0 %v7367_v9 }
0x2246   : > { %7372 = vmatprep.subr.bf16.mxu0 %v7371_v46 }
0x2249   : > { %7374 = vmatpush3.bf16.msra.mxu0 %v7371_v46  ;;  %v6250_v46 = vld [vmem:[%s8713_s15 + $0x1] ss:$0 sm:$0xff] }
0x224a   : > { %7376 = vmatprep.subr.bf16.mxu0 %v7375_v13 }
0x224d   : > { %7378 = vmatpush3.bf16.msra.mxu0 %v7375_v13 }
0x224e   : > { %7380 = vmatprep.subr.bf16.mxu0 %v7379_v15 }
0x2251   : > { %7382 = vmatpush3.bf16.msra.mxu0 %v7379_v15 }
0x2317   : > { %v6986_v27 = vpop.f32.mrb[32].mxu0 }
0x2318   : > { %v5398_v29 = vadd.f32 %v6986_v27, %v6228_v26  ;;  %v5378_v30 = vpop.f32.mrb[33].mxu0 }
0x2319   : > { %v5397_v31 = vadd.f32 %v6228_v26, %v5378_v30 }
0x231a   : > { %v5400_v32 = vadd.f32 %v5398_v29, %v8246_v44 }
0x231b   : > { %v5399_v33 = vadd.f32 %v5397_v31, %v8244_v43  ;;  %v6233_v43 = vld [vmem:[%s8710_s12 + $0x20] sm:$0xff] }
0x231c   : > { %v5408_v34 = vsel %vm2881_vm8, %v5400_v32, 0.0  ;;  %v7359_v51 = vpack.c.bf16 %v6234_v50, %v6233_v43 }
0x231d   : > { %5409 = vadd.xlane.f32.xlu1 %v5408_v34  ;;  %v5405_v35 = vsel %vm700_vm0, %v5399_v33, 0.0 }
0x231e   : > { %5406 = vadd.xlane.f32.xlu0 %v5405_v35  ;;  %7360 = vmatprep.subr.bf16.mxu1 %v7359_v51 }
0x231f   : > { %7362 = vmatpush3.bf16.msra.mxu1 %v7359_v51 }
0x2320   : > { %7364 = vmatprep.subr.bf16.mxu1 %v7363_v54 }
0x2323   : > { %7366 = vmatpush3.bf16.msra.mxu1 %v7363_v54 }
0x23aa   : > { %v5410_v36 = vpop.xlane.xlu1 %5409 }
0x23ab   : > { %v5412_v37 = vmul.f32 0.03125, %v5410_v36  ;;  %v5407_v38 = vpop.xlane.xlu0 %5406 }
0x23ac   : > { %v5411_v39 = vmul.f32 0.03125, %v5407_v38 }
0x23ad   : > { %v5414_v40 = vsub.f32 %v5400_v32, %v5412_v37 }
0x23ae   : > { %v5413_v41 = vsub.f32 %v5399_v33, %v5411_v39 }
0x23af   : > { %v5416_v45 = vmul.f32 %v5414_v40, %v5414_v40 }
0x23b0   : > { %v5415_v48 = vmul.f32 %v5413_v41, %v5413_v41 }
0x23b1   : > { %v5420_v49 = vsel %vm2881_vm8, %v5416_v45, 0.0 }
0x23b2   : > { %5421 = vadd.xlane.f32.xlu1 %v5420_v49  ;;  %v5417_v44 = vsel %vm700_vm0, %v5415_v48, 0.0 }
0x23b3   : > { %5418 = vadd.xlane.f32.xlu0 %v5417_v44 }
0x243f   : > { %v5422_v55 = vpop.xlane.xlu1 %5421 }
0x2440   : > { %v5424_v56 = vmul.f32 0.03125, %v5422_v55  ;;  %v5419_v58 = vpop.xlane.xlu0 %5418 }
0x2441   : > { %v5423_v59 = vmul.f32 0.03125, %v5419_v58 }
0x2442   : > { %v5426_v61 = vadd.f32 1e-05, %v5424_v56 }
0x2443   : > { %v5425_v62 = vadd.f32 1e-05, %v5423_v59 }
0x2444   : > { %7537 = vrsqrt.f32 %v5426_v61 }
0x2445   : > { %7539 = vrsqrt.f32 %v5425_v62 }
0x244e   : > { %v7538_v57 = vpop.eup %7537 }
0x244f   : > { %v7540_v63 = vpop.eup %7539  ;;  %v5430_v1 = vmul.f32 %v7538_v57, %v5414_v40 }
0x2450   : > { %v5429_v2 = vmul.f32 %v7540_v63, %v5413_v41 }
0x2451   : > { %v5438_v4 = vmul.f32 %v6231_v0, %v5430_v1 }
0x2452   : > { %v5437_v5 = vmul.f32 %v6231_v0, %v5429_v2 }
0x2453   : > { %v5446_v6 = vadd.f32 %v6232_v3, %v5438_v4 }
0x2454   : > { %v8557_v60 = vadd.f32 %v6232_v3, %v5437_v5 }
0x2456   : > { %6995 = vmatprep.mubr.msk.f32.mxu1 %vm700_vm0, %v8557_v60 }
0x2457   : > { %6996 = vmatmul.mubr.msk.f32.vlgmr.msra.gmra.mrb[46].mxu1 %vm700_vm0, %v5446_v6 }
0x252a   : > { %v6997_v17 = vpop.f32.mrb[46].mxu1 }
0x252b   : > { %v5538_v20 = vadd.f32 %v6997_v17, %v6238_v16  ;;  %v5532_v21 = vpop.f32.mrb[47].mxu1 }
0x252c   : > { %v5533_v23 = vadd.f32 %v6238_v16, %v5532_v21  ;;  %v5724_v21 = vld [vmem:[%s8716_s18] sm:$0xff] }
0x252d   : > { %v5544_v24 = vmul.f32 0.70710677, %v5538_v20  ;;  %v5542_v9 = vmul.f32 0.5, %v5538_v20 }
0x252e   : > { %v5543_v25 = vmul.f32 0.70710677, %v5533_v23  ;;  %v5541_v7 = vmul.f32 0.5, %v5533_v23  ;;  %v5725_v23 = vld [vmem:[%s8716_s18 + $0x8] sm:$0xff] }
0x252f   : > { %v5550_v22 = vand.u32 2147483647, %v5544_v24  ;;  %vm5546_vm12 = vcmp.ge.f32.partialorder %v5544_v24, 0.0  ;;  %v7384_v24 = vpack.c.bf16 %v5725_v23, %v5724_v21 }
0x2530   : > { %v5549_v19 = vand.u32 2147483647, %v5543_v25  ;;  %vm5545_vm13 = vcmp.ge.f32.partialorder %v5543_v25, 0.0  ;;  %v5548_v1 = vsel %vm5546_vm12, 1.0, %v7616_v42  ;;  %v5726_v25 = vld [vmem:[%s8716_s18 + $0x10] sm:$0xff] }
0x2531   : > { %v5552_v18 = vmul.f32 0.3275911, %v5550_v22  ;;  %v5578_v30 = vsub.f32 0.0, %v5550_v22  ;;  %v5547_v4 = vsel %vm5545_vm13, 1.0, %v7616_v42 }
0x2532   : > { %v5551_v26 = vmul.f32 0.3275911, %v5549_v19  ;;  %v5577_v31 = vsub.f32 0.0, %v5549_v19 }
0x2533   : > { %v5554_v27 = vadd.f32 1.0, %v5552_v18  ;;  %v5580_v33 = vmul.f32 %v5578_v30, %v5550_v22  ;;  %v5727_v22 = vld [vmem:[%s8716_s18 + $0x18] sm:$0xff]  ;;  %v7619_v18 = vmov 0.0  }
0x2534   : > { %v5553_v29 = vadd.f32 1.0, %v5551_v26  ;;  %v5579_v36 = vmul.f32 %v5577_v31, %v5549_v19  ;;  %v7387_v19 = vpack.c.bf16 %v5727_v22, %v5726_v25  ;;  %7025 = vmatprep.mubr.msk.f32.mxu1 %vm7618_vm14, %v7619_v18  ;;  %v6255_v31 = vld [vmem:[%s8714_s16 + $0x1] ss:$0 sm:$0xff] }
0x2535   : > { %7541 = vrcp.f32 %v5554_v27  ;;  %v5583_v39 = vmul.f32 1.442695, %v5580_v33  ;;  %v5803_v33 = vld [vmem:[%s8718_s20] sm:$0xff] }
0x2536   : > { %7543 = vrcp.f32 %v5553_v29  ;;  %v5581_v45 = vmul.f32 1.442695, %v5579_v36 }
0x2537   : > { %7545 = vpow2.f32 %v5583_v39  ;;  %v5805_v39 = vld [vmem:[%s8718_s20 + $0x10] sm:$0xff] }
0x2538   : > { %7547 = vpow2.f32 %v5581_v45  ;;  %v5807_v45 = vld [vmem:[%s8718_s20 + $0x20] sm:$0xff] }
0x253f   : > { %v7542_v32 = vpop.eup %7541 }
0x2540   : > { %v7544_v34 = vpop.eup %7543  ;;  %v5560_v35 = vmul.f32 1.0614054, %v7542_v32 }
0x2541   : > { %v5559_v37 = vmul.f32 1.0614054, %v7544_v34  ;;  %v7546_v59 = vpop.eup %7545 }
0x2542   : > { %v5562_v38 = vadd.f32 -1.4531521, %v5560_v35  ;;  %v7548_v62 = vpop.eup %7547  ;;  %v6256_v35 = vld [vmem:[%s8715_s17 + $0x1] ss:$0 sm:$0xff] }
0x2543   : > { %v5561_v40 = vadd.f32 -1.4531521, %v5559_v37 }
0x2544   : > { %v5564_v41 = vmul.f32 %v7542_v32, %v5562_v38 }
0x2545   : > { %v5563_v48 = vmul.f32 %v7544_v34, %v5561_v40  ;;  %v5806_v40 = vld [vmem:[%s8718_s20 + $0x18] sm:$0xff] }
0x2546   : > { %v5566_v49 = vadd.f32 1.4214138, %v5564_v41  ;;  %v7393_v41 = vpack.c.bf16 %v5806_v40, %v5805_v39 }
0x2547   : > { %v5565_v44 = vadd.f32 1.4214138, %v5563_v48  ;;  %v5808_v48 = vld [vmem:[%s8718_s20 + $0x28] sm:$0xff] }
0x2548   : > { %v5568_v43 = vmul.f32 %v7542_v32, %v5566_v49  ;;  %v7396_v49 = vpack.c.bf16 %v5808_v48, %v5807_v45 }
0x2549   : > { %v5567_v50 = vmul.f32 %v7544_v34, %v5565_v44  ;;  %v5809_v44 = vld [vmem:[%s8718_s20 + $0x30] sm:$0xff] }
0x254a   : > { %v5570_v51 = vadd.f32 -0.28449672, %v5568_v43  ;;  %v5810_v43 = vld [vmem:[%s8718_s20 + $0x38] sm:$0xff] }
0x254b   : > { %v5569_v52 = vadd.f32 -0.28449672, %v5567_v50  ;;  %v7399_v50 = vpack.c.bf16 %v5810_v43, %v5809_v44 }
0x254c   : > { %v5572_v53 = vmul.f32 %v7542_v32, %v5570_v51  ;;  %v5728_v51 = vld [vmem:[%s8717_s19] sm:$0x1] }
0x254d   : > { %v5571_v54 = vmul.f32 %v7544_v34, %v5569_v52 }
0x254e   : > { %v5574_v55 = vadd.f32 0.2548296, %v5572_v53 }
0x254f   : > { %v5573_v56 = vadd.f32 0.2548296, %v5571_v54 }
0x2550   : > { %v5576_v58 = vmul.f32 %v7542_v32, %v5574_v55 }
0x2551   : > { %v5575_v61 = vmul.f32 %v7544_v34, %v5573_v56  ;;  %v5804_v34 = vld [vmem:[%s8718_s20 + $0x8] sm:$0xff]  ;;  %v5811_v56 = vld [vmem:[%s8774_s6] sm:$0x1]  ;;  %s7557_s6 = scalar_lea.vmem %s7556_s1, 32 }
0x2552   : > { %v5586_v57 = vmul.f32 %v7546_v59, %v5576_v58  ;;  %v7390_v37 = vpack.c.bf16 %v5804_v34, %v5803_v33  ;;  %p7559_p1 = scmp.lt.s32.totalorder %s7557_s6, %s7551_s30 }
0x2553   : > { %v5585_v0 = vmul.f32 %v7548_v62, %v5575_v61 }
0x2554   : > { %v5588_v63 = vsub.f32 1.0, %v5586_v57  ;;  %p7560_p2 = por %p7559_p1, %p7558_p0 }
0x2555   : > { %v5587_v2 = vsub.f32 1.0, %v5585_v0 }
0x2556   : > { %v5590_v3 = vmul.f32 %v5588_v63, %v5548_v1  ;;  %p7561_p3 = pnand %p7560_p2, %p7554_p13 }
0x2557   : > { %v5589_v5 = vmul.f32 %v5587_v2, %v5547_v4 }
0x2558   : > { %v5592_v6 = vadd.f32 1.0, %v5590_v3 }
0x2559   : > { %v5591_v8 = vadd.f32 1.0, %v5589_v5 }
0x255a   : > { %v5594_v47 = vmul.f32 %v5592_v6, %v5542_v9 }
0x255b   : > { %v5593_v10 = vmul.f32 %v5591_v8, %v5541_v7 }
0x255d   : > { %7014 = vmatprep.mubr.msk.f32.mxu0 %vm3083_vm11, %v5593_v10 }
0x255e   : > { %7015 = vmatmul.mubr.msk.f32.vlgmr.msra.gmra.mrb[42].mxu0 %vm3083_vm11, %v5594_v47 }
0x2631   : > { %v7016_v11 = vpop.f32.mrb[42].mxu0 }
0x2632   : > { %v5684_v12 = vpop.f32.mrb[43].mxu0 }
0x2633   : > { %v5685_v13 = vadd.f32 %v6250_v46, %v5684_v12 }
0x2635   : > { %v5692_v42 = vadd.f32 %v5685_v13, %v8557_v60  ;;  %v7617_v60 = vmov 0.0|0.0  }
0x2636   : > { %7383 = vmatprep.subr.bf16.mxu1 %v7617_v60 }
0x2637   : > { %v5697_v28 = vsel %vm700_vm0, %v5692_v42, 0.0  ;;  %7385 = vmatpush3.bf16.msra.mxu1 %v7384_v24 }
0x2638   : > { %5698 = vadd.xlane.f32.xlu0 %v5697_v28  ;;  %7386 = vmatprep.subr.bf16.mxu1 %v7617_v60 }
0x263b   : > { %7388 = vmatpush3.bf16.msra.mxu1 %v7387_v19 }
0x263c   : > { %7389 = vmatprep.subr.bf16.mxu1 %v7617_v60 }
0x26c5   : > { %v5699_v14 = vpop.xlane.xlu0 %5698 }
0x26c6   : > { %v5700_v15 = vmul.f32 0.03125, %v5699_v14 }
0x26c8   : > { %v5701_v16 = vsub.f32 %v5692_v42, %v5700_v15 }
0x26ca   : > { %v5702_v17 = vmul.f32 %v5701_v16, %v5701_v16 }
0x26cc   : > { %v5703_v20 = vsel %vm700_vm0, %v5702_v17, 0.0 }
0x26cd   : > { %5704 = vadd.xlane.f32.xlu1 %v5703_v20 }
0x275a   : > { %v5705_v26 = vpop.xlane.xlu1 %5704 }
0x275b   : > { %v5706_v27 = vmul.f32 0.03125, %v5705_v26 }
0x275d   : > { %v5707_v29 = vadd.f32 1e-05, %v5706_v27 }
0x275f   : > { %7549 = vrsqrt.f32 %v5707_v29 }
0x2769   : > { %v7550_v30 = vpop.eup %7549 }
0x276a   : > { %v5709_v32 = vmul.f32 %v7550_v30, %v5701_v16 }
0x276c   : > { %v5716_v36 = vmul.f32 %v6255_v31, %v5709_v32 }
0x276e   : > { %v5723_v38 = vadd.f32 %v6256_v35, %v5716_v36 }
0x2770   : > { %7026 = vmatmul.mubr.msk.f32.vlgmr.msra.gmra.mrb[48].mxu1 %vm700_vm0, %v5723_v38 }
0x2771   : > { %7391 = vmatpush3.bf16.msra.mxu1 %v7390_v37  ;;  %7044 = vmatprep.mubr.msk.f32.mxu1 %vm7618_vm14, %v7619_v18 }
0x2772   : > { %7392 = vmatprep.subr.bf16.mxu1 %v7617_v60 }
0x2775   : > { %7394 = vmatpush3.bf16.msra.mxu1 %v7393_v41 }
0x2776   : > { %7395 = vmatprep.subr.bf16.mxu1 %v7617_v60 }
0x2779   : > { %7397 = vmatpush3.bf16.msra.mxu1 %v7396_v49 }
0x277a   : > { %7398 = vmatprep.subr.bf16.mxu1 %v7617_v60 }
0x277d   : > { %7400 = vmatpush3.bf16.msra.mxu1 %v7399_v50 }
0x2843   : > { %v5798_v52 = vpop.f32.mrb[48].mxu1 }
0x2844   : > { %v5799_v53 = vadd.f32 %v5798_v52, %v5728_v51  ;;  %v7027_v54 = vpop.f32.mrb[49].mxu1 }
0x2846   : > { %v5802_v55 = vmax.f32 %v5799_v53, 0.0 }
0x2848   : > { %7045 = vmatmul.mubr.msk.f32.vlgmr.msra.gmra.mrb[50].mxu1 %vm3083_vm11, %v5802_v55 }
0x291b   : > { %v5881_v58 = vpop.f32.mrb[50].mxu1 }
0x291c   : > { %v5882_v59 = vadd.f32 %v5881_v58, %v5811_v56  ;;  %v7046_v61 = vpop.f32.mrb[51].mxu1 }
0x291e   : > { %5885 = vst [vmem:[%s675_s2] sm:$0x1] %v5882_v59 }
0x291f   : > { %7564 = shalt.err (!%p7561_p3)
}
0x2920   : > { %s7565_s22 = scalar_lea.hbm %s8656_s7, 16  ;;  %s7569_s29 = scalar_lea.hbm %s8775_s0, 32 }
0x2921   : > { %p7566_p4 = scmp.ne.s32.totalorder %s8656_s7, %s7565_s22  ;;  %p7570_p9 = scmp.lt.u32.totalorder %s8656_s7, %s8775_s0 }
0x2922   : > { %p7571_p10 = scmp.lt.u32.totalorder %s7569_s29, %s7565_s22  ;;  %p7573_p12 = scmp.lt.u32.totalorder %s7565_s22, %s8656_s7 }
0x2923   : > { %p7567_p7 = pnand %p7566_p4, %p7774_p5 }
0x2924   : > { %p7572_p11 = por %p7571_p10, %p7570_p9 }
0x2925   : > { %p7568_p8 = pneg %p7567_p7 }
0x2926   : > { %p7574_p13 = por %p7573_p12, %p7572_p11 }
0x2928   : > { %p7575_p0 = pnand %p7574_p13, %p7568_p8 }
0x292a   : > { %7578 = shalt.err (!%p7575_p0)
}
0x292b   : > { %7413 = dma.vmem_to_hbm [thread:$0]  (%p7774_p5), %s8658_s5, 16, %s8656_s7, %s5887_s8  }
0x292c PF: > { %s8776_s30 = sld [smem:[#allocation7_spill]]  ;;  %s8777_s1 = sld [smem:[#allocation5_spill]] }
0x2932   : > { %p7419_p1 = scmp.ge.s32.totalorder %s8776_s30, 2  ;;  %s5911_s21 = sand.u32 1, %s8777_s1  }
0x2933   : > { %s5912_s2 = scalar_lea.sflag [#allocation3], %s5911_s21 }
0x2934   : > { %p7416_p2 = pnand %p7419_p1, %p7778_p6 }
0x2936   : > { %7596 = dma.done.wait (!%p7416_p2), %s5912_s2, 16  }
0x2937   : > { %7598 = vsyncadd (!%p7416_p2), %s5912_s2, 4294967280  ;;  %s8779_s30 = sld [smem:[#allocation8_spill]]  ;;  %s8780_s22 = sld [smem:[#allocation6_spill]] }
0x2938   : > { %s8781_s29 = sld [smem:[#allocation9_spill]]  ;;  %s8782_s3 = smov %s7605_s28 }
0x293d   : > { %p32_p3 = scmp.ge.s32.totalorder %s8779_s30, 4   ;;  %s8783_s28 = smov %s8780_s22 }
0x293f   :  { %34 = sbr.rel (!%p32_p3) target bundleno = 15 (0xf), region = 201 }
0x2946   :  { %5916 = vsyncpa [#allocation3], 1 }
0x2947   :  { %5918 = vsyncpa [#allocation3 + $0x1], 1 }

</bundles_post_ra>
